<compile_context>
chip_gen: v5e
topology: v5e:2x2
jax: 0.10.0
libtpu: 0.0.40
codegen_flags: <defaults>
</compile_context>

<pallas_src>
import functools

import jax
import jax.numpy as jnp
from jax import lax
from jax.experimental import pallas as pl
from jax.experimental.pallas import tpu as pltpu
import numpy as np


# ----------------------------------------------------------------------------
# Kernels
# ----------------------------------------------------------------------------

def deconv_kernel(x_ref, w_ref, b_ref, o_ref):
    """ConvTranspose2d(k=2, s=2) as one lane-dense matmul.

    x_ref: (1, H, W*Cin)        bf16, lanes ordered (col j, channel ci)
    w_ref: (W*Cin, 2*2W*Cout)   bf16, columns ordered (row-parity a, out col, co)
    b_ref: (1, 2*2W*Cout)       f32, bias tiled over (a, out col)
    o_ref: (1, H, 2*2W*Cout)    bf16; a contiguous reshape in the wrapper turns
                                this into the interleaved (N, 2H, 2W*Cout) map.
    """
    acc = jnp.dot(x_ref[0], w_ref[...], preferred_element_type=jnp.float32)
    o_ref[0] = (acc + b_ref[...]).astype(o_ref.dtype)


def conv_bn_kernel(x_ref, scale_ref, shift_ref, wb_ref, bias_ref,
                   y_ref, sum_ref, sq_ref, pbuf_ref, *, apply_act, cin):
    """Fused [prev-layer BN scale/shift + ReLU] -> 3x3 SAME conv -> BN partial stats.

    x_ref:     (1, H, W*Cin)            bf16 raw (pre-BN) activation of prev layer
    scale_ref: (1, W*Cin)               f32  prev-layer BN scale, tiled over W
    shift_ref: (1, W*Cin)               f32  prev-layer BN shift, tiled over W
    wb_ref:    (3, (W+2)*Cin, W*Cout)   bf16 banded (block-Toeplitz) conv weights
    bias_ref:  (1, W*Cout)              f32  conv bias tiled over W
    y_ref:     (1, H, W*Cout)           bf16 raw conv output (pre-BN), lane dense
    sum_ref:   (1, 1, W*Cout)           f32  per-sample sum over rows
    sq_ref:    (1, 1, W*Cout)           f32  per-sample sum of squares over rows
    pbuf_ref:  (H+2, (W+2)*Cin)         bf16 VMEM scratch holding the padded input
    """
    H = x_ref.shape[1]
    wcin = x_ref.shape[2]                      # W * Cin

    # Activate the previous layer's raw output in f32, store bf16 into the halo
    # buffer (halo handled here -> no XLA-side jnp.pad round trip).
    x = x_ref[0].astype(jnp.float32)
    if apply_act:
        x = jnp.maximum(x * scale_ref[...] + shift_ref[...], 0.0)
    pbuf_ref[...] = jnp.zeros(pbuf_ref.shape, pbuf_ref.dtype)
    pbuf_ref[1:H + 1, cin:cin + wcin] = x.astype(pbuf_ref.dtype)

    # 3x3 conv = 3 banded matmuls (one per kh); the kw taps are folded into the
    # banded weight so K = (W+2)*Cin and N = W*Cout feed the MXU properly.
    acc = jnp.dot(pbuf_ref[0:H, :], wb_ref[0],
                  preferred_element_type=jnp.float32)
    acc = acc + jnp.dot(pbuf_ref[1:H + 1, :], wb_ref[1],
                        preferred_element_type=jnp.float32)
    acc = acc + jnp.dot(pbuf_ref[2:H + 2, :], wb_ref[2],
                        preferred_element_type=jnp.float32)
    acc = acc + bias_ref[...]

    y_ref[0] = acc.astype(y_ref.dtype)
    # Per-sample BN partial sums (train-mode batch stats); the tiny per-channel
    # reduction over (N, W) finishes in XLA.
    sum_ref[0] = jnp.sum(acc, axis=0, keepdims=True)
    sq_ref[0] = jnp.sum(acc * acc, axis=0, keepdims=True)


def bn_relu_kernel(x_ref, scale_ref, shift_ref, o_ref):
    """Final layer's BatchNorm affine + ReLU (lane dense, f32 output)."""
    y = x_ref[0].astype(jnp.float32) * scale_ref[...] + shift_ref[...]
    o_ref[0] = jnp.maximum(y, 0.0).astype(o_ref.dtype)


# ----------------------------------------------------------------------------
# Weight re-layout helpers (wrapper-side, tiny, run once per forward under jit)
# ----------------------------------------------------------------------------

def build_deconv_matrix(w_iohw, W):
    """(Cin, Cout, 2, 2) -> (W*Cin, 2*2W*Cout) block-Toeplitz deconv matmul weight.

    Column index = a*(2W*Cout) + jout*Cout + co ; value = w[ci, co, a, jout-2j]
    (zero when jout-2j not in {0, 1}).
    """
    Cin, Cout = w_iohw.shape[0], w_iohw.shape[1]
    j = jnp.arange(W)[:, None]
    jout = jnp.arange(2 * W)[None, :]
    b = jout - 2 * j
    valid = ((b >= 0) & (b <= 1)).astype(w_iohw.dtype)
    b_c = jnp.clip(b, 0, 1)
    wt = jnp.transpose(w_iohw, (2, 3, 0, 1))              # (a, b, Cin, Cout)
    g = wt[:, b_c] * valid[None, :, :, None, None]        # (a, j, jout, Cin, Cout)
    g = jnp.transpose(g, (1, 3, 0, 2, 4))                 # (j, Cin, a, jout, Cout)
    return g.reshape(W * Cin, 2 * 2 * W * Cout)


def build_banded_conv(w_oihw, W):
    """(Cout, Cin, 3, 3) -> (3, (W+2)*Cin, W*Cout) banded conv weights (one per kh).

    wb[kh, s*Cin+ci, jout*Cout+co] = w[kh, s-jout, ci, co] if 0 <= s-jout <= 2 else 0,
    where s indexes the W-padded input column.
    """
    Cout, Cin = w_oihw.shape[0], w_oihw.shape[1]
    w_hwio = jnp.transpose(w_oihw, (2, 3, 1, 0))          # (3, 3, Cin, Cout)
    s = jnp.arange(W + 2)[:, None]
    jout = jnp.arange(W)[None, :]
    kw = s - jout
    valid = ((kw >= 0) & (kw <= 2)).astype(w_oihw.dtype)
    kw_c = jnp.clip(kw, 0, 2)
    banded = w_hwio[:, kw_c] * valid[None, :, :, None, None]   # (3, W+2, W, Cin, Cout)
    banded = jnp.transpose(banded, (0, 1, 3, 2, 4))            # (3, W+2, Cin, W, Cout)
    return banded.reshape(3, (W + 2) * Cin, W * Cout)


# ----------------------------------------------------------------------------
# Pallas wrappers
# ----------------------------------------------------------------------------

def deconv2x2_s2(x_ld, w_iohw, bias, H, W):
    """x_ld: (N, H, W*Cin) f32 -> (N, 2H, 2W*Cout) bf16 (lane-dense NHWC)."""
    N = x_ld.shape[0]
    Cin, Cout = w_iohw.shape[0], w_iohw.shape[1]
    wmat = build_deconv_matrix(w_iohw, W).astype(jnp.bfloat16)
    b_t = jnp.tile(bias, 2 * 2 * W)[None, :].astype(jnp.float32)   # (1, 2*2W*Cout)

    out = pl.pallas_call(
        deconv_kernel,
        out_shape=jax.ShapeDtypeStruct((N, H, 2 * 2 * W * Cout), jnp.bfloat16),
        grid=(N,),
        in_specs=[
            pl.BlockSpec((1, H, W * Cin), lambda n: (n, 0, 0)),
            pl.BlockSpec((W * Cin, 2 * 2 * W * Cout), lambda n: (0, 0)),
            pl.BlockSpec((1, 2 * 2 * W * Cout), lambda n: (0, 0)),
        ],
        out_specs=pl.BlockSpec((1, H, 2 * 2 * W * Cout), lambda n: (n, 0, 0)),
        compiler_params=pltpu.CompilerParams(dimension_semantics=("parallel",)),
    )(x_ld.astype(jnp.bfloat16), wmat, b_t)

    # Contiguous reshape only (no transpose): rows interleave as 2i + parity.
    return out.reshape(N, 2 * H, 2 * W * Cout)


def conv3x3_bn_stats(y_prev, scale_t, shift_t, w_oihw, bias, H, W, apply_act):
    """Fused prev-BN/ReLU + 3x3 conv + BN partial stats. Returns (y, sum, sumsq)."""
    N = y_prev.shape[0]
    Cout, Cin = w_oihw.shape[0], w_oihw.shape[1]
    wb = build_banded_conv(w_oihw, W).astype(jnp.bfloat16)
    b_t = jnp.tile(bias, W)[None, :].astype(jnp.float32)           # (1, W*Cout)

    kern = functools.partial(conv_bn_kernel, apply_act=apply_act, cin=Cin)
    return pl.pallas_call(
        kern,
        out_shape=(
            jax.ShapeDtypeStruct((N, H, W * Cout), jnp.bfloat16),
            jax.ShapeDtypeStruct((N, 1, W * Cout), jnp.float32),
            jax.ShapeDtypeStruct((N, 1, W * Cout), jnp.float32),
        ),
        grid=(N,),
        in_specs=[
            pl.BlockSpec((1, H, W * Cin), lambda n: (n, 0, 0)),
            pl.BlockSpec((1, W * Cin), lambda n: (0, 0)),
            pl.BlockSpec((1, W * Cin), lambda n: (0, 0)),
            pl.BlockSpec((3, (W + 2) * Cin, W * Cout), lambda n: (0, 0, 0)),
            pl.BlockSpec((1, W * Cout), lambda n: (0, 0)),
        ],
        out_specs=(
            pl.BlockSpec((1, H, W * Cout), lambda n: (n, 0, 0)),
            pl.BlockSpec((1, 1, W * Cout), lambda n: (n, 0, 0)),
            pl.BlockSpec((1, 1, W * Cout), lambda n: (n, 0, 0)),
        ),
        scratch_shapes=[pltpu.VMEM((H + 2, (W + 2) * Cin), jnp.bfloat16)],
        compiler_params=pltpu.CompilerParams(dimension_semantics=("parallel",)),
    )(y_prev, scale_t, shift_t, wb, b_t)


def bn_relu_apply(y, scale_t, shift_t):
    """Final BN affine + ReLU on lane-dense (N, H, W*C) bf16 input -> f32."""
    N, H, L = y.shape
    return pl.pallas_call(
        bn_relu_kernel,
        out_shape=jax.ShapeDtypeStruct((N, H, L), jnp.float32),
        grid=(N,),
        in_specs=[
            pl.BlockSpec((1, H, L), lambda n: (n, 0, 0)),
            pl.BlockSpec((1, L), lambda n: (0, 0)),
            pl.BlockSpec((1, L), lambda n: (0, 0)),
        ],
        out_specs=pl.BlockSpec((1, H, L), lambda n: (n, 0, 0)),
        compiler_params=pltpu.CompilerParams(dimension_semantics=("parallel",)),
    )(y, scale_t, shift_t)


def bn_affine_from_stats(s, sq, gamma, beta, count, W, Cout, eps):
    """Combine per-sample partial sums into BN scale/shift, tiled over W (lanes)."""
    ssum = s.reshape(-1, W, Cout).sum(axis=(0, 1))
    sqsum = sq.reshape(-1, W, Cout).sum(axis=(0, 1))
    mean = ssum / count
    var = jnp.maximum(sqsum / count - mean * mean, 0.0)   # biased var, clamped >= 0
    scale = gamma * lax.rsqrt(var + eps)
    shift = beta - mean * scale
    return (jnp.tile(scale, W)[None, :].astype(jnp.float32),
            jnp.tile(shift, W)[None, :].astype(jnp.float32))


# ----------------------------------------------------------------------------
# Module: parameters + forward
# ----------------------------------------------------------------------------

def init_decoder_params(key, in_channels, out_channels, num_conv_layers):
    mid = int(in_channels / 2)
    keys = jax.random.split(key, 2 + 4 * num_conv_layers)
    it = iter(keys)
    params = {
        # ConvTranspose2d weight layout: (Cin, Cout, kH, kW)
        "deconv_w": 0.1 * jax.random.normal(next(it), (in_channels, in_channels, 2, 2), jnp.float32),
        "deconv_b": 0.1 * jax.random.normal(next(it), (in_channels,), jnp.float32),
        "convs": [],
    }
    plan = [(in_channels, mid)] + [(mid, mid)] * (num_conv_layers - 2) + [(mid, out_channels)]
    for ci, co in plan:
        w = 0.1 * jax.random.normal(next(it), (co, ci, 3, 3), jnp.float32)   # OIHW
        b = 0.1 * jax.random.normal(next(it), (co,), jnp.float32)
        gamma = 1.0 + 0.1 * jax.random.normal(next(it), (co,), jnp.float32)
        beta = 0.1 * jax.random.normal(next(it), (co,), jnp.float32)
        params["convs"].append((w, b, gamma, beta))
    return params


def decoder_block_forward(params, x_nchw, eps=1e-5):
    N, C0, H, W = x_nchw.shape
    # NCHW -> lane-dense NHWC (N, H, W*C); the reshape is free (contiguous).
    x_ld = jnp.transpose(x_nchw, (0, 2, 3, 1)).reshape(N, H, W * C0)

    y = deconv2x2_s2(x_ld, params["deconv_w"], params["deconv_b"], H, W)
    H2, W2 = 2 * H, 2 * W
    count = float(N * H2 * W2)

    # Layer 0 consumes the raw deconv output: identity affine, no ReLU.
    scale_t = jnp.ones((1, W2 * C0), jnp.float32)
    shift_t = jnp.zeros((1, W2 * C0), jnp.float32)
    apply_act = False
    c_last = C0
    for (w, b, gamma, beta) in params["convs"]:
        c_last = w.shape[0]
        y, s, sq = conv3x3_bn_stats(y, scale_t, shift_t, w, b, H2, W2, apply_act)
        scale_t, shift_t = bn_affine_from_stats(s, sq, gamma, beta, count,
                                                W2, c_last, eps)
        apply_act = True

    out = bn_relu_apply(y, scale_t, shift_t)               # (N, H2, W2*Clast) f32
    out = out.reshape(N, H2, W2, c_last)
    return jnp.transpose(out, (0, 3, 1, 2))                # NHWC -> NCHW


# ----------------------------------------------------------------------------
# Pure-JAX reference (mirrors the kernel's bf16-operand / f32-accumulate policy)
# ----------------------------------------------------------------------------

def decoder_block_reference(params, x_nchw, eps=1e-5):
    f32, bf16 = jnp.float32, jnp.bfloat16
    x = jnp.transpose(x_nchw, (0, 2, 3, 1))                       # NHWC
    wd = jnp.transpose(params["deconv_w"], (0, 2, 3, 1)).astype(bf16).astype(f32)
    xb = x.astype(bf16).astype(f32)
    u = jnp.einsum("nhwi,iabo->nhawbo", xb, wd)
    N, H, _, W, _, C = u.shape
    u = u.reshape(N, 2 * H, 2 * W, C) + params["deconv_b"]
    act_bf = u.astype(bf16)                                        # stored precision
    act = None
    for (w, b, gamma, beta) in params["convs"]:
        w_hwio = jnp.transpose(w, (2, 3, 1, 0)).astype(bf16).astype(f32)
        y = lax.conv_general_dilated(
            act_bf.astype(f32), w_hwio, window_strides=(1, 1), padding="SAME",
            dimension_numbers=("NHWC", "HWIO", "NHWC")) + b
        mean = jnp.mean(y, axis=(0, 1, 2))
        var = jnp.maximum(jnp.mean(y * y, axis=(0, 1, 2)) - mean * mean, 0.0)
        scale = gamma * lax.rsqrt(var + eps)
        shift = beta - mean * scale
        y_bf = y.astype(bf16)                                      # stored precision
        act = jnp.maximum(y_bf.astype(f32) * scale + shift, 0.0)
        act_bf = act.astype(bf16)
    return jnp.transpose(act, (0, 3, 1, 2))                        # NHWC -> NCHW


# ----------------------------------------------------------------------------
# Main
# ----------------------------------------------------------------------------

if __name__ == "__main__":
    in_channels, out_channels, num_conv_layers = 8, 8, 3
    N, H, W = 2, 16, 16

    key = jax.random.PRNGKey(0)
    kp, kx = jax.random.split(key)
    params = init_decoder_params(kp, in_channels, out_channels, num_conv_layers)
    x = jax.random.normal(kx, (N, in_channels, H, W), jnp.float32)   # NCHW, like PyTorch

    fwd = jax.jit(decoder_block_forward)
    out = jax.block_until_ready(fwd(params, x))

    ref = jax.block_until_ready(decoder_block_reference(params, x))
    assert out.shape == (N, out_channels, 2 * H, 2 * W), out.shape
    np.testing.assert_allclose(np.asarray(out), np.asarray(ref), rtol=2e-3, atol=2e-3)

    print("KERNEL_OK")
</pallas_src>

<mosaic_0001>
module attributes {stable_mosaic.version = 11 : i64} {
  func.func @deconv_kernel(%arg0: i32, %arg1: memref<1x16x128xbf16, #tpu.memory_space<vmem>>, %arg2: memref<128x512xbf16, #tpu.memory_space<vmem>>, %arg3: memref<1x512xf32, #tpu.memory_space<vmem>>, %arg4: memref<1x16x512xbf16, #tpu.memory_space<vmem>>) attributes {dimension_semantics = [#tpu.dimension_semantics<parallel>], iteration_bounds = array<i64: 2>, scalar_prefetch = 0 : i64, scratch_operands = 0 : i64, tpu.core_type = #tpu.core_type<tc>, window_params = [{transform_indices = @transform_0, window_bounds = array<i64: 1, 16, 128>}, {pipeline_mode = #tpu.pipeline_mode<synchronous>, transform_indices = @transform_1, window_bounds = array<i64: 128, 512>}, {pipeline_mode = #tpu.pipeline_mode<synchronous>, transform_indices = @transform_2, window_bounds = array<i64: 1, 512>}, {transform_indices = @transform_3, window_bounds = array<i64: 1, 16, 512>}]} {
    %c0 = arith.constant 0 : index
    %c0_0 = arith.constant 0 : index
    %c0_1 = arith.constant 0 : index
    %0 = vector.load %arg1[%c0, %c0_0, %c0_1] : memref<1x16x128xbf16, #tpu.memory_space<vmem>>, vector<1x16x128xbf16>
    %1 = vector.shape_cast %0 : vector<1x16x128xbf16> to vector<16x128xbf16>
    %c0_2 = arith.constant 0 : index
    %c0_3 = arith.constant 0 : index
    %2 = vector.load %arg2[%c0_2, %c0_3] : memref<128x512xbf16, #tpu.memory_space<vmem>>, vector<128x512xbf16>
    %cst = arith.constant dense<0.000000e+00> : vector<16x512xf32>
    %3 = tpu.matmul %1, %2, %cst {dimension_numbers = #tpu.dot_dimension_numbers<[1], [0], [0], [1], [0, 0, 1, 1], [], []>} : vector<16x128xbf16>, vector<128x512xbf16>, vector<16x512xf32> -> vector<16x512xf32>
    %c0_4 = arith.constant 0 : index
    %c0_5 = arith.constant 0 : index
    %4 = vector.load %arg3[%c0_4, %c0_5] : memref<1x512xf32, #tpu.memory_space<vmem>>, vector<1x512xf32>
    %5 = vector.broadcast %4 : vector<1x512xf32> to vector<16x512xf32>
    %6 = arith.addf %3, %5 : vector<16x512xf32>
    %7 = arith.truncf %6 : vector<16x512xf32> to vector<16x512xbf16>
    %c0_6 = arith.constant 0 : index
    %c0_7 = arith.constant 0 : index
    %c0_8 = arith.constant 0 : index
    %8 = vector.load %arg4[%c0_6, %c0_7, %c0_8] : memref<1x16x512xbf16, #tpu.memory_space<vmem>>, vector<1x16x512xbf16>
    %9 = vector.shape_cast %8 : vector<1x16x512xbf16> to vector<16x512xbf16>
    %10 = vector.shape_cast %7 : vector<16x512xbf16> to vector<1x16x512xbf16>
    tpu.vector_store %arg4[%c0_6, %c0_7, %c0_8], %10 {strides = array<i32>} : memref<1x16x512xbf16, #tpu.memory_space<vmem>>, vector<1x16x512xbf16>,
    return
  }
  func.func @transform_0(%arg0: i32) -> (i32, i32, i32) {
    %c0_i32 = arith.constant 0 : i32
    %c0_i32_0 = arith.constant 0 : i32
    %c0_i32_1 = arith.constant 0 : i32
    return %arg0, %c0_i32, %c0_i32_0 : i32, i32, i32
  }
  func.func @transform_1(%arg0: i32) -> (i32, i32) {
    %c0_i32 = arith.constant 0 : i32
    %c0_i32_0 = arith.constant 0 : i32
    %c0_i32_1 = arith.constant 0 : i32
    return %c0_i32, %c0_i32_0 : i32, i32
  }
  func.func @transform_2(%arg0: i32) -> (i32, i32) {
    %c0_i32 = arith.constant 0 : i32
    %c0_i32_0 = arith.constant 0 : i32
    %c0_i32_1 = arith.constant 0 : i32
    return %c0_i32, %c0_i32_0 : i32, i32
  }
  func.func @transform_3(%arg0: i32) -> (i32, i32, i32) {
    %c0_i32 = arith.constant 0 : i32
    %c0_i32_0 = arith.constant 0 : i32
    %c0_i32_1 = arith.constant 0 : i32
    return %arg0, %c0_i32, %c0_i32_0 : i32, i32, i32
  }
}

module attributes {stable_mosaic.version = 11 : i64} {
  func.func @conv_bn_kernel(%arg0: i32, %arg1: memref<1x32x256xbf16, #tpu.memory_space<vmem>>, %arg2: memref<1x256xf32, #tpu.memory_space<vmem>>, %arg3: memref<1x256xf32, #tpu.memory_space<vmem>>, %arg4: memref<3x272x128xbf16, #tpu.memory_space<vmem>>, %arg5: memref<1x128xf32, #tpu.memory_space<vmem>>, %arg6: memref<1x32x128xbf16, #tpu.memory_space<vmem>>, %arg7: memref<1x1x128xf32, #tpu.memory_space<vmem>>, %arg8: memref<1x1x128xf32, #tpu.memory_space<vmem>>, %arg9: memref<34x272xbf16, #tpu.memory_space<vmem>>) attributes {dimension_semantics = [#tpu.dimension_semantics<parallel>], iteration_bounds = array<i64: 2>, scalar_prefetch = 0 : i64, scratch_operands = 1 : i64, tpu.core_type = #tpu.core_type<tc>, window_params = [{transform_indices = @transform_0, window_bounds = array<i64: 1, 32, 256>}, {pipeline_mode = #tpu.pipeline_mode<synchronous>, transform_indices = @transform_1, window_bounds = array<i64: 1, 256>}, {pipeline_mode = #tpu.pipeline_mode<synchronous>, transform_indices = @transform_2, window_bounds = array<i64: 1, 256>}, {pipeline_mode = #tpu.pipeline_mode<synchronous>, transform_indices = @transform_3, window_bounds = array<i64: 3, 272, 128>}, {pipeline_mode = #tpu.pipeline_mode<synchronous>, transform_indices = @transform_4, window_bounds = array<i64: 1, 128>}, {transform_indices = @transform_5, window_bounds = array<i64: 1, 32, 128>}, {transform_indices = @transform_6, window_bounds = array<i64: 1, 1, 128>}, {transform_indices = @transform_7, window_bounds = array<i64: 1, 1, 128>}]} {
    %c0 = arith.constant 0 : index
    %c0_0 = arith.constant 0 : index
    %c0_1 = arith.constant 0 : index
    %0 = vector.load %arg1[%c0, %c0_0, %c0_1] : memref<1x32x256xbf16, #tpu.memory_space<vmem>>, vector<1x32x256xbf16>
    %1 = vector.shape_cast %0 : vector<1x32x256xbf16> to vector<32x256xbf16>
    %2 = arith.extf %1 : vector<32x256xbf16> to vector<32x256xf32>
    %cst = arith.constant 0.000000e+00 : bf16
    %3 = vector.broadcast %cst : bf16 to vector<34x272xbf16>
    %c0_2 = arith.constant 0 : index
    %c0_3 = arith.constant 0 : index
    %4 = vector.load %arg9[%c0_2, %c0_3] : memref<34x272xbf16, #tpu.memory_space<vmem>>, vector<34x272xbf16>
    tpu.vector_store %arg9[%c0_2, %c0_3], %3 {strides = array<i32>} : memref<34x272xbf16, #tpu.memory_space<vmem>>, vector<34x272xbf16>,
    %5 = arith.truncf %2 : vector<32x256xf32> to vector<32x256xbf16>
    %c1 = arith.constant 1 : index
    %c8 = arith.constant 8 : index
    %6 = vector.load %arg9[%c1, %c8] : memref<34x272xbf16, #tpu.memory_space<vmem>>, vector<32x256xbf16>
    tpu.vector_store %arg9[%c1, %c8], %5 {strides = array<i32>} : memref<34x272xbf16, #tpu.memory_space<vmem>>, vector<32x256xbf16>,
    %c0_4 = arith.constant 0 : index
    %c0_5 = arith.constant 0 : index
    %7 = vector.load %arg9[%c0_4, %c0_5] : memref<34x272xbf16, #tpu.memory_space<vmem>>, vector<32x272xbf16>
    %c0_6 = arith.constant 0 : index
    %c0_7 = arith.constant 0 : index
    %c0_8 = arith.constant 0 : index
    %8 = vector.load %arg4[%c0_6, %c0_7, %c0_8] : memref<3x272x128xbf16, #tpu.memory_space<vmem>>, vector<1x272x128xbf16>
    %9 = vector.shape_cast %8 : vector<1x272x128xbf16> to vector<272x128xbf16>
    %cst_9 = arith.constant dense<0.000000e+00> : vector<32x128xf32>
    %10 = tpu.matmul %7, %9, %cst_9 {dimension_numbers = #tpu.dot_dimension_numbers<[1], [0], [0], [1], [0, 0, 1, 1], [], []>} : vector<32x272xbf16>, vector<272x128xbf16>, vector<32x128xf32> -> vector<32x128xf32>
    %c1_10 = arith.constant 1 : index
    %c0_11 = arith.constant 0 : index
    %11 = vector.load %arg9[%c1_10, %c0_11] : memref<34x272xbf16, #tpu.memory_space<vmem>>, vector<32x272xbf16>
    %c1_12 = arith.constant 1 : index
    %c0_13 = arith.constant 0 : index
    %c0_14 = arith.constant 0 : index
    %12 = vector.load %arg4[%c1_12, %c0_13, %c0_14] : memref<3x272x128xbf16, #tpu.memory_space<vmem>>, vector<1x272x128xbf16>
    %13 = vector.shape_cast %12 : vector<1x272x128xbf16> to vector<272x128xbf16>
    %cst_15 = arith.constant dense<0.000000e+00> : vector<32x128xf32>
    %14 = tpu.matmul %11, %13, %cst_15 {dimension_numbers = #tpu.dot_dimension_numbers<[1], [0], [0], [1], [0, 0, 1, 1], [], []>} : vector<32x272xbf16>, vector<272x128xbf16>, vector<32x128xf32> -> vector<32x128xf32>
    %15 = arith.addf %10, %14 : vector<32x128xf32>
    %c2 = arith.constant 2 : index
    %c0_16 = arith.constant 0 : index
    %16 = vector.load %arg9[%c2, %c0_16] : memref<34x272xbf16, #tpu.memory_space<vmem>>, vector<32x272xbf16>
    %c2_17 = arith.constant 2 : index
    %c0_18 = arith.constant 0 : index
    %c0_19 = arith.constant 0 : index
    %17 = vector.load %arg4[%c2_17, %c0_18, %c0_19] : memref<3x272x128xbf16, #tpu.memory_space<vmem>>, vector<1x272x128xbf16>
    %18 = vector.shape_cast %17 : vector<1x272x128xbf16> to vector<272x128xbf16>
    %cst_20 = arith.constant dense<0.000000e+00> : vector<32x128xf32>
    %19 = tpu.matmul %16, %18, %cst_20 {dimension_numbers = #tpu.dot_dimension_numbers<[1], [0], [0], [1], [0, 0, 1, 1], [], []>} : vector<32x272xbf16>, vector<272x128xbf16>, vector<32x128xf32> -> vector<32x128xf32>
    %20 = arith.addf %15, %19 : vector<32x128xf32>
    %c0_21 = arith.constant 0 : index
    %c0_22 = arith.constant 0 : index
    %21 = vector.load %arg5[%c0_21, %c0_22] : memref<1x128xf32, #tpu.memory_space<vmem>>, vector<1x128xf32>
    %22 = vector.broadcast %21 : vector<1x128xf32> to vector<32x128xf32>
    %23 = arith.addf %20, %22 : vector<32x128xf32>
    %24 = arith.truncf %23 : vector<32x128xf32> to vector<32x128xbf16>
    %c0_23 = arith.constant 0 : index
    %c0_24 = arith.constant 0 : index
    %c0_25 = arith.constant 0 : index
    %25 = vector.load %arg6[%c0_23, %c0_24, %c0_25] : memref<1x32x128xbf16, #tpu.memory_space<vmem>>, vector<1x32x128xbf16>
    %26 = vector.shape_cast %25 : vector<1x32x128xbf16> to vector<32x128xbf16>
    %27 = vector.shape_cast %24 : vector<32x128xbf16> to vector<1x32x128xbf16>
    tpu.vector_store %arg6[%c0_23, %c0_24, %c0_25], %27 {strides = array<i32>} : memref<1x32x128xbf16, #tpu.memory_space<vmem>>, vector<1x32x128xbf16>,
    %cst_26 = arith.constant dense<0.000000e+00> : vector<128xf32>
    %28 = vector.multi_reduction <add>, %23, %cst_26 [0] : vector<32x128xf32> to vector<128xf32>
    %29 = vector.shape_cast %28 : vector<128xf32> to vector<1x128xf32>
    %c0_27 = arith.constant 0 : index
    %c0_28 = arith.constant 0 : index
    %c0_29 = arith.constant 0 : index
    %30 = vector.load %arg7[%c0_27, %c0_28, %c0_29] : memref<1x1x128xf32, #tpu.memory_space<vmem>>, vector<1x1x128xf32>
    %31 = vector.shape_cast %30 : vector<1x1x128xf32> to vector<1x128xf32>
    %32 = vector.shape_cast %29 : vector<1x128xf32> to vector<1x1x128xf32>
    tpu.vector_store %arg7[%c0_27, %c0_28, %c0_29], %32 {strides = array<i32>} : memref<1x1x128xf32, #tpu.memory_space<vmem>>, vector<1x1x128xf32>,
    %33 = arith.mulf %23, %23 : vector<32x128xf32>
    %cst_30 = arith.constant dense<0.000000e+00> : vector<128xf32>
    %34 = vector.multi_reduction <add>, %33, %cst_30 [0] : vector<32x128xf32> to vector<128xf32>
    %35 = vector.shape_cast %34 : vector<128xf32> to vector<1x128xf32>
    %c0_31 = arith.constant 0 : index
    %c0_32 = arith.constant 0 : index
    %c0_33 = arith.constant 0 : index
    %36 = vector.load %arg8[%c0_31, %c0_32, %c0_33] : memref<1x1x128xf32, #tpu.memory_space<vmem>>, vector<1x1x128xf32>
    %37 = vector.shape_cast %36 : vector<1x1x128xf32> to vector<1x128xf32>
    %38 = vector.shape_cast %35 : vector<1x128xf32> to vector<1x1x128xf32>
    tpu.vector_store %arg8[%c0_31, %c0_32, %c0_33], %38 {strides = array<i32>} : memref<1x1x128xf32, #tpu.memory_space<vmem>>, vector<1x1x128xf32>,
    return
  }
  func.func @transform_0(%arg0: i32) -> (i32, i32, i32) {
    %c0_i32 = arith.constant 0 : i32
    %c0_i32_0 = arith.constant 0 : i32
    %c0_i32_1 = arith.constant 0 : i32
    return %arg0, %c0_i32, %c0_i32_0 : i32, i32, i32
  }
  func.func @transform_1(%arg0: i32) -> (i32, i32) {
    %c0_i32 = arith.constant 0 : i32
    %c0_i32_0 = arith.constant 0 : i32
    %c0_i32_1 = arith.constant 0 : i32
    return %c0_i32, %c0_i32_0 : i32, i32
  }
  func.func @transform_2(%arg0: i32) -> (i32, i32) {
    %c0_i32 = arith.constant 0 : i32
    %c0_i32_0 = arith.constant 0 : i32
    %c0_i32_1 = arith.constant 0 : i32
    return %c0_i32, %c0_i32_0 : i32, i32
  }
  func.func @transform_3(%arg0: i32) -> (i32, i32, i32) {
    %c0_i32 = arith.constant 0 : i32
    %c0_i32_0 = arith.constant 0 : i32
    %c0_i32_1 = arith.constant 0 : i32
    %c0_i32_2 = arith.constant 0 : i32
    return %c0_i32, %c0_i32_0, %c0_i32_1 : i32, i32, i32
  }
  func.func @transform_4(%arg0: i32) -> (i32, i32) {
    %c0_i32 = arith.constant 0 : i32
    %c0_i32_0 = arith.constant 0 : i32
    %c0_i32_1 = arith.constant 0 : i32
    return %c0_i32, %c0_i32_0 : i32, i32
  }
  func.func @transform_5(%arg0: i32) -> (i32, i32, i32) {
    %c0_i32 = arith.constant 0 : i32
    %c0_i32_0 = arith.constant 0 : i32
    %c0_i32_1 = arith.constant 0 : i32
    return %arg0, %c0_i32, %c0_i32_0 : i32, i32, i32
  }
  func.func @transform_6(%arg0: i32) -> (i32, i32, i32) {
    %c0_i32 = arith.constant 0 : i32
    %c0_i32_0 = arith.constant 0 : i32
    %c0_i32_1 = arith.constant 0 : i32
    return %arg0, %c0_i32, %c0_i32_0 : i32, i32, i32
  }
  func.func @transform_7(%arg0: i32) -> (i32, i32, i32) {
    %c0_i32 = arith.constant 0 : i32
    %c0_i32_0 = arith.constant 0 : i32
    %c0_i32_1 = arith.constant 0 : i32
    return %arg0, %c0_i32, %c0_i32_0 : i32, i32, i32
  }
}

module attributes {stable_mosaic.version = 11 : i64} {
  func.func @conv_bn_kernel(%arg0: i32, %arg1: memref<1x32x128xbf16, #tpu.memory_space<vmem>>, %arg2: memref<1x128xf32, #tpu.memory_space<vmem>>, %arg3: memref<1x128xf32, #tpu.memory_space<vmem>>, %arg4: memref<3x136x128xbf16, #tpu.memory_space<vmem>>, %arg5: memref<1x128xf32, #tpu.memory_space<vmem>>, %arg6: memref<1x32x128xbf16, #tpu.memory_space<vmem>>, %arg7: memref<1x1x128xf32, #tpu.memory_space<vmem>>, %arg8: memref<1x1x128xf32, #tpu.memory_space<vmem>>, %arg9: memref<34x136xbf16, #tpu.memory_space<vmem>>) attributes {dimension_semantics = [#tpu.dimension_semantics<parallel>], iteration_bounds = array<i64: 2>, scalar_prefetch = 0 : i64, scratch_operands = 1 : i64, tpu.core_type = #tpu.core_type<tc>, window_params = [{transform_indices = @transform_0, window_bounds = array<i64: 1, 32, 128>}, {pipeline_mode = #tpu.pipeline_mode<synchronous>, transform_indices = @transform_1, window_bounds = array<i64: 1, 128>}, {pipeline_mode = #tpu.pipeline_mode<synchronous>, transform_indices = @transform_2, window_bounds = array<i64: 1, 128>}, {pipeline_mode = #tpu.pipeline_mode<synchronous>, transform_indices = @transform_3, window_bounds = array<i64: 3, 136, 128>}, {pipeline_mode = #tpu.pipeline_mode<synchronous>, transform_indices = @transform_4, window_bounds = array<i64: 1, 128>}, {transform_indices = @transform_5, window_bounds = array<i64: 1, 32, 128>}, {transform_indices = @transform_6, window_bounds = array<i64: 1, 1, 128>}, {transform_indices = @transform_7, window_bounds = array<i64: 1, 1, 128>}]} {
    %c0 = arith.constant 0 : index
    %c0_0 = arith.constant 0 : index
    %c0_1 = arith.constant 0 : index
    %0 = vector.load %arg1[%c0, %c0_0, %c0_1] : memref<1x32x128xbf16, #tpu.memory_space<vmem>>, vector<1x32x128xbf16>
    %1 = vector.shape_cast %0 : vector<1x32x128xbf16> to vector<32x128xbf16>
    %2 = arith.extf %1 : vector<32x128xbf16> to vector<32x128xf32>
    %c0_2 = arith.constant 0 : index
    %c0_3 = arith.constant 0 : index
    %3 = vector.load %arg2[%c0_2, %c0_3] : memref<1x128xf32, #tpu.memory_space<vmem>>, vector<1x128xf32>
    %4 = vector.broadcast %3 : vector<1x128xf32> to vector<32x128xf32>
    %5 = arith.mulf %2, %4 : vector<32x128xf32>
    %c0_4 = arith.constant 0 : index
    %c0_5 = arith.constant 0 : index
    %6 = vector.load %arg3[%c0_4, %c0_5] : memref<1x128xf32, #tpu.memory_space<vmem>>, vector<1x128xf32>
    %7 = vector.broadcast %6 : vector<1x128xf32> to vector<32x128xf32>
    %8 = arith.addf %5, %7 : vector<32x128xf32>
    %cst = arith.constant 0.000000e+00 : f32
    %9 = vector.broadcast %cst : f32 to vector<32x128xf32>
    %10 = arith.maximumf %8, %9 : vector<32x128xf32>
    %cst_6 = arith.constant 0.000000e+00 : bf16
    %11 = vector.broadcast %cst_6 : bf16 to vector<34x136xbf16>
    %c0_7 = arith.constant 0 : index
    %c0_8 = arith.constant 0 : index
    %12 = vector.load %arg9[%c0_7, %c0_8] : memref<34x136xbf16, #tpu.memory_space<vmem>>, vector<34x136xbf16>
    tpu.vector_store %arg9[%c0_7, %c0_8], %11 {strides = array<i32>} : memref<34x136xbf16, #tpu.memory_space<vmem>>, vector<34x136xbf16>,
    %13 = arith.truncf %10 : vector<32x128xf32> to vector<32x128xbf16>
    %c1 = arith.constant 1 : index
    %c4 = arith.constant 4 : index
    %14 = vector.load %arg9[%c1, %c4] : memref<34x136xbf16, #tpu.memory_space<vmem>>, vector<32x128xbf16>
    tpu.vector_store %arg9[%c1, %c4], %13 {strides = array<i32>} : memref<34x136xbf16, #tpu.memory_space<vmem>>, vector<32x128xbf16>,
    %c0_9 = arith.constant 0 : index
    %c0_10 = arith.constant 0 : index
    %15 = vector.load %arg9[%c0_9, %c0_10] : memref<34x136xbf16, #tpu.memory_space<vmem>>, vector<32x136xbf16>
    %c0_11 = arith.constant 0 : index
    %c0_12 = arith.constant 0 : index
    %c0_13 = arith.constant 0 : index
    %16 = vector.load %arg4[%c0_11, %c0_12, %c0_13] : memref<3x136x128xbf16, #tpu.memory_space<vmem>>, vector<1x136x128xbf16>
    %17 = vector.shape_cast %16 : vector<1x136x128xbf16> to vector<136x128xbf16>
    %cst_14 = arith.constant dense<0.000000e+00> : vector<32x128xf32>
    %18 = tpu.matmul %15, %17, %cst_14 {dimension_numbers = #tpu.dot_dimension_numbers<[1], [0], [0], [1], [0, 0, 1, 1], [], []>} : vector<32x136xbf16>, vector<136x128xbf16>, vector<32x128xf32> -> vector<32x128xf32>
    %c1_15 = arith.constant 1 : index
    %c0_16 = arith.constant 0 : index
    %19 = vector.load %arg9[%c1_15, %c0_16] : memref<34x136xbf16, #tpu.memory_space<vmem>>, vector<32x136xbf16>
    %c1_17 = arith.constant 1 : index
    %c0_18 = arith.constant 0 : index
    %c0_19 = arith.constant 0 : index
    %20 = vector.load %arg4[%c1_17, %c0_18, %c0_19] : memref<3x136x128xbf16, #tpu.memory_space<vmem>>, vector<1x136x128xbf16>
    %21 = vector.shape_cast %20 : vector<1x136x128xbf16> to vector<136x128xbf16>
    %cst_20 = arith.constant dense<0.000000e+00> : vector<32x128xf32>
    %22 = tpu.matmul %19, %21, %cst_20 {dimension_numbers = #tpu.dot_dimension_numbers<[1], [0], [0], [1], [0, 0, 1, 1], [], []>} : vector<32x136xbf16>, vector<136x128xbf16>, vector<32x128xf32> -> vector<32x128xf32>
    %23 = arith.addf %18, %22 : vector<32x128xf32>
    %c2 = arith.constant 2 : index
    %c0_21 = arith.constant 0 : index
    %24 = vector.load %arg9[%c2, %c0_21] : memref<34x136xbf16, #tpu.memory_space<vmem>>, vector<32x136xbf16>
    %c2_22 = arith.constant 2 : index
    %c0_23 = arith.constant 0 : index
    %c0_24 = arith.constant 0 : index
    %25 = vector.load %arg4[%c2_22, %c0_23, %c0_24] : memref<3x136x128xbf16, #tpu.memory_space<vmem>>, vector<1x136x128xbf16>
    %26 = vector.shape_cast %25 : vector<1x136x128xbf16> to vector<136x128xbf16>
    %cst_25 = arith.constant dense<0.000000e+00> : vector<32x128xf32>
    %27 = tpu.matmul %24, %26, %cst_25 {dimension_numbers = #tpu.dot_dimension_numbers<[1], [0], [0], [1], [0, 0, 1, 1], [], []>} : vector<32x136xbf16>, vector<136x128xbf16>, vector<32x128xf32> -> vector<32x128xf32>
    %28 = arith.addf %23, %27 : vector<32x128xf32>
    %c0_26 = arith.constant 0 : index
    %c0_27 = arith.constant 0 : index
    %29 = vector.load %arg5[%c0_26, %c0_27] : memref<1x128xf32, #tpu.memory_space<vmem>>, vector<1x128xf32>
    %30 = vector.broadcast %29 : vector<1x128xf32> to vector<32x128xf32>
    %31 = arith.addf %28, %30 : vector<32x128xf32>
    %32 = arith.truncf %31 : vector<32x128xf32> to vector<32x128xbf16>
    %c0_28 = arith.constant 0 : index
    %c0_29 = arith.constant 0 : index
    %c0_30 = arith.constant 0 : index
    %33 = vector.load %arg6[%c0_28, %c0_29, %c0_30] : memref<1x32x128xbf16, #tpu.memory_space<vmem>>, vector<1x32x128xbf16>
    %34 = vector.shape_cast %33 : vector<1x32x128xbf16> to vector<32x128xbf16>
    %35 = vector.shape_cast %32 : vector<32x128xbf16> to vector<1x32x128xbf16>
    tpu.vector_store %arg6[%c0_28, %c0_29, %c0_30], %35 {strides = array<i32>} : memref<1x32x128xbf16, #tpu.memory_space<vmem>>, vector<1x32x128xbf16>,
    %cst_31 = arith.constant dense<0.000000e+00> : vector<128xf32>
    %36 = vector.multi_reduction <add>, %31, %cst_31 [0] : vector<32x128xf32> to vector<128xf32>
    %37 = vector.shape_cast %36 : vector<128xf32> to vector<1x128xf32>
    %c0_32 = arith.constant 0 : index
    %c0_33 = arith.constant 0 : index
    %c0_34 = arith.constant 0 : index
    %38 = vector.load %arg7[%c0_32, %c0_33, %c0_34] : memref<1x1x128xf32, #tpu.memory_space<vmem>>, vector<1x1x128xf32>
    %39 = vector.shape_cast %38 : vector<1x1x128xf32> to vector<1x128xf32>
    %40 = vector.shape_cast %37 : vector<1x128xf32> to vector<1x1x128xf32>
    tpu.vector_store %arg7[%c0_32, %c0_33, %c0_34], %40 {strides = array<i32>} : memref<1x1x128xf32, #tpu.memory_space<vmem>>, vector<1x1x128xf32>,
    %41 = arith.mulf %31, %31 : vector<32x128xf32>
    %cst_35 = arith.constant dense<0.000000e+00> : vector<128xf32>
    %42 = vector.multi_reduction <add>, %41, %cst_35 [0] : vector<32x128xf32> to vector<128xf32>
    %43 = vector.shape_cast %42 : vector<128xf32> to vector<1x128xf32>
    %c0_36 = arith.constant 0 : index
    %c0_37 = arith.constant 0 : index
    %c0_38 = arith.constant 0 : index
    %44 = vector.load %arg8[%c0_36, %c0_37, %c0_38] : memref<1x1x128xf32, #tpu.memory_space<vmem>>, vector<1x1x128xf32>
    %45 = vector.shape_cast %44 : vector<1x1x128xf32> to vector<1x128xf32>
    %46 = vector.shape_cast %43 : vector<1x128xf32> to vector<1x1x128xf32>
    tpu.vector_store %arg8[%c0_36, %c0_37, %c0_38], %46 {strides = array<i32>} : memref<1x1x128xf32, #tpu.memory_space<vmem>>, vector<1x1x128xf32>,
    return
  }
  func.func @transform_0(%arg0: i32) -> (i32, i32, i32) {
    %c0_i32 = arith.constant 0 : i32
    %c0_i32_0 = arith.constant 0 : i32
    %c0_i32_1 = arith.constant 0 : i32
    return %arg0, %c0_i32, %c0_i32_0 : i32, i32, i32
  }
  func.func @transform_1(%arg0: i32) -> (i32, i32) {
    %c0_i32 = arith.constant 0 : i32
    %c0_i32_0 = arith.constant 0 : i32
    %c0_i32_1 = arith.constant 0 : i32
    return %c0_i32, %c0_i32_0 : i32, i32
  }
  func.func @transform_2(%arg0: i32) -> (i32, i32) {
    %c0_i32 = arith.constant 0 : i32
    %c0_i32_0 = arith.constant 0 : i32
    %c0_i32_1 = arith.constant 0 : i32
    return %c0_i32, %c0_i32_0 : i32, i32
  }
  func.func @transform_3(%arg0: i32) -> (i32, i32, i32) {
    %c0_i32 = arith.constant 0 : i32
    %c0_i32_0 = arith.constant 0 : i32
    %c0_i32_1 = arith.constant 0 : i32
    %c0_i32_2 = arith.constant 0 : i32
    return %c0_i32, %c0_i32_0, %c0_i32_1 : i32, i32, i32
  }
  func.func @transform_4(%arg0: i32) -> (i32, i32) {
    %c0_i32 = arith.constant 0 : i32
    %c0_i32_0 = arith.constant 0 : i32
    %c0_i32_1 = arith.constant 0 : i32
    return %c0_i32, %c0_i32_0 : i32, i32
  }
  func.func @transform_5(%arg0: i32) -> (i32, i32, i32) {
    %c0_i32 = arith.constant 0 : i32
    %c0_i32_0 = arith.constant 0 : i32
    %c0_i32_1 = arith.constant 0 : i32
    return %arg0, %c0_i32, %c0_i32_0 : i32, i32, i32
  }
  func.func @transform_6(%arg0: i32) -> (i32, i32, i32) {
    %c0_i32 = arith.constant 0 : i32
    %c0_i32_0 = arith.constant 0 : i32
    %c0_i32_1 = arith.constant 0 : i32
    return %arg0, %c0_i32, %c0_i32_0 : i32, i32, i32
  }
  func.func @transform_7(%arg0: i32) -> (i32, i32, i32) {
    %c0_i32 = arith.constant 0 : i32
    %c0_i32_0 = arith.constant 0 : i32
    %c0_i32_1 = arith.constant 0 : i32
    return %arg0, %c0_i32, %c0_i32_0 : i32, i32, i32
  }
}

module attributes {stable_mosaic.version = 11 : i64} {
  func.func @conv_bn_kernel(%arg0: i32, %arg1: memref<1x32x128xbf16, #tpu.memory_space<vmem>>, %arg2: memref<1x128xf32, #tpu.memory_space<vmem>>, %arg3: memref<1x128xf32, #tpu.memory_space<vmem>>, %arg4: memref<3x136x256xbf16, #tpu.memory_space<vmem>>, %arg5: memref<1x256xf32, #tpu.memory_space<vmem>>, %arg6: memref<1x32x256xbf16, #tpu.memory_space<vmem>>, %arg7: memref<1x1x256xf32, #tpu.memory_space<vmem>>, %arg8: memref<1x1x256xf32, #tpu.memory_space<vmem>>, %arg9: memref<34x136xbf16, #tpu.memory_space<vmem>>) attributes {dimension_semantics = [#tpu.dimension_semantics<parallel>], iteration_bounds = array<i64: 2>, scalar_prefetch = 0 : i64, scratch_operands = 1 : i64, tpu.core_type = #tpu.core_type<tc>, window_params = [{transform_indices = @transform_0, window_bounds = array<i64: 1, 32, 128>}, {pipeline_mode = #tpu.pipeline_mode<synchronous>, transform_indices = @transform_1, window_bounds = array<i64: 1, 128>}, {pipeline_mode = #tpu.pipeline_mode<synchronous>, transform_indices = @transform_2, window_bounds = array<i64: 1, 128>}, {pipeline_mode = #tpu.pipeline_mode<synchronous>, transform_indices = @transform_3, window_bounds = array<i64: 3, 136, 256>}, {pipeline_mode = #tpu.pipeline_mode<synchronous>, transform_indices = @transform_4, window_bounds = array<i64: 1, 256>}, {transform_indices = @transform_5, window_bounds = array<i64: 1, 32, 256>}, {transform_indices = @transform_6, window_bounds = array<i64: 1, 1, 256>}, {transform_indices = @transform_7, window_bounds = array<i64: 1, 1, 256>}]} {
    %c0 = arith.constant 0 : index
    %c0_0 = arith.constant 0 : index
    %c0_1 = arith.constant 0 : index
    %0 = vector.load %arg1[%c0, %c0_0, %c0_1] : memref<1x32x128xbf16, #tpu.memory_space<vmem>>, vector<1x32x128xbf16>
    %1 = vector.shape_cast %0 : vector<1x32x128xbf16> to vector<32x128xbf16>
    %2 = arith.extf %1 : vector<32x128xbf16> to vector<32x128xf32>
    %c0_2 = arith.constant 0 : index
    %c0_3 = arith.constant 0 : index
    %3 = vector.load %arg2[%c0_2, %c0_3] : memref<1x128xf32, #tpu.memory_space<vmem>>, vector<1x128xf32>
    %4 = vector.broadcast %3 : vector<1x128xf32> to vector<32x128xf32>
    %5 = arith.mulf %2, %4 : vector<32x128xf32>
    %c0_4 = arith.constant 0 : index
    %c0_5 = arith.constant 0 : index
    %6 = vector.load %arg3[%c0_4, %c0_5] : memref<1x128xf32, #tpu.memory_space<vmem>>, vector<1x128xf32>
    %7 = vector.broadcast %6 : vector<1x128xf32> to vector<32x128xf32>
    %8 = arith.addf %5, %7 : vector<32x128xf32>
    %cst = arith.constant 0.000000e+00 : f32
    %9 = vector.broadcast %cst : f32 to vector<32x128xf32>
    %10 = arith.maximumf %8, %9 : vector<32x128xf32>
    %cst_6 = arith.constant 0.000000e+00 : bf16
    %11 = vector.broadcast %cst_6 : bf16 to vector<34x136xbf16>
    %c0_7 = arith.constant 0 : index
    %c0_8 = arith.constant 0 : index
    %12 = vector.load %arg9[%c0_7, %c0_8] : memref<34x136xbf16, #tpu.memory_space<vmem>>, vector<34x136xbf16>
    tpu.vector_store %arg9[%c0_7, %c0_8], %11 {strides = array<i32>} : memref<34x136xbf16, #tpu.memory_space<vmem>>, vector<34x136xbf16>,
    %13 = arith.truncf %10 : vector<32x128xf32> to vector<32x128xbf16>
    %c1 = arith.constant 1 : index
    %c4 = arith.constant 4 : index
    %14 = vector.load %arg9[%c1, %c4] : memref<34x136xbf16, #tpu.memory_space<vmem>>, vector<32x128xbf16>
    tpu.vector_store %arg9[%c1, %c4], %13 {strides = array<i32>} : memref<34x136xbf16, #tpu.memory_space<vmem>>, vector<32x128xbf16>,
    %c0_9 = arith.constant 0 : index
    %c0_10 = arith.constant 0 : index
    %15 = vector.load %arg9[%c0_9, %c0_10] : memref<34x136xbf16, #tpu.memory_space<vmem>>, vector<32x136xbf16>
    %c0_11 = arith.constant 0 : index
    %c0_12 = arith.constant 0 : index
    %c0_13 = arith.constant 0 : index
    %16 = vector.load %arg4[%c0_11, %c0_12, %c0_13] : memref<3x136x256xbf16, #tpu.memory_space<vmem>>, vector<1x136x256xbf16>
    %17 = vector.shape_cast %16 : vector<1x136x256xbf16> to vector<136x256xbf16>
    %cst_14 = arith.constant dense<0.000000e+00> : vector<32x256xf32>
    %18 = tpu.matmul %15, %17, %cst_14 {dimension_numbers = #tpu.dot_dimension_numbers<[1], [0], [0], [1], [0, 0, 1, 1], [], []>} : vector<32x136xbf16>, vector<136x256xbf16>, vector<32x256xf32> -> vector<32x256xf32>
    %c1_15 = arith.constant 1 : index
    %c0_16 = arith.constant 0 : index
    %19 = vector.load %arg9[%c1_15, %c0_16] : memref<34x136xbf16, #tpu.memory_space<vmem>>, vector<32x136xbf16>
    %c1_17 = arith.constant 1 : index
    %c0_18 = arith.constant 0 : index
    %c0_19 = arith.constant 0 : index
    %20 = vector.load %arg4[%c1_17, %c0_18, %c0_19] : memref<3x136x256xbf16, #tpu.memory_space<vmem>>, vector<1x136x256xbf16>
    %21 = vector.shape_cast %20 : vector<1x136x256xbf16> to vector<136x256xbf16>
    %cst_20 = arith.constant dense<0.000000e+00> : vector<32x256xf32>
    %22 = tpu.matmul %19, %21, %cst_20 {dimension_numbers = #tpu.dot_dimension_numbers<[1], [0], [0], [1], [0, 0, 1, 1], [], []>} : vector<32x136xbf16>, vector<136x256xbf16>, vector<32x256xf32> -> vector<32x256xf32>
    %23 = arith.addf %18, %22 : vector<32x256xf32>
    %c2 = arith.constant 2 : index
    %c0_21 = arith.constant 0 : index
    %24 = vector.load %arg9[%c2, %c0_21] : memref<34x136xbf16, #tpu.memory_space<vmem>>, vector<32x136xbf16>
    %c2_22 = arith.constant 2 : index
    %c0_23 = arith.constant 0 : index
    %c0_24 = arith.constant 0 : index
    %25 = vector.load %arg4[%c2_22, %c0_23, %c0_24] : memref<3x136x256xbf16, #tpu.memory_space<vmem>>, vector<1x136x256xbf16>
    %26 = vector.shape_cast %25 : vector<1x136x256xbf16> to vector<136x256xbf16>
    %cst_25 = arith.constant dense<0.000000e+00> : vector<32x256xf32>
    %27 = tpu.matmul %24, %26, %cst_25 {dimension_numbers = #tpu.dot_dimension_numbers<[1], [0], [0], [1], [0, 0, 1, 1], [], []>} : vector<32x136xbf16>, vector<136x256xbf16>, vector<32x256xf32> -> vector<32x256xf32>
    %28 = arith.addf %23, %27 : vector<32x256xf32>
    %c0_26 = arith.constant 0 : index
    %c0_27 = arith.constant 0 : index
    %29 = vector.load %arg5[%c0_26, %c0_27] : memref<1x256xf32, #tpu.memory_space<vmem>>, vector<1x256xf32>
    %30 = vector.broadcast %29 : vector<1x256xf32> to vector<32x256xf32>
    %31 = arith.addf %28, %30 : vector<32x256xf32>
    %32 = arith.truncf %31 : vector<32x256xf32> to vector<32x256xbf16>
    %c0_28 = arith.constant 0 : index
    %c0_29 = arith.constant 0 : index
    %c0_30 = arith.constant 0 : index
    %33 = vector.load %arg6[%c0_28, %c0_29, %c0_30] : memref<1x32x256xbf16, #tpu.memory_space<vmem>>, vector<1x32x256xbf16>
    %34 = vector.shape_cast %33 : vector<1x32x256xbf16> to vector<32x256xbf16>
    %35 = vector.shape_cast %32 : vector<32x256xbf16> to vector<1x32x256xbf16>
    tpu.vector_store %arg6[%c0_28, %c0_29, %c0_30], %35 {strides = array<i32>} : memref<1x32x256xbf16, #tpu.memory_space<vmem>>, vector<1x32x256xbf16>,
    %cst_31 = arith.constant dense<0.000000e+00> : vector<256xf32>
    %36 = vector.multi_reduction <add>, %31, %cst_31 [0] : vector<32x256xf32> to vector<256xf32>
    %37 = vector.shape_cast %36 : vector<256xf32> to vector<1x256xf32>
    %c0_32 = arith.constant 0 : index
    %c0_33 = arith.constant 0 : index
    %c0_34 = arith.constant 0 : index
    %38 = vector.load %arg7[%c0_32, %c0_33, %c0_34] : memref<1x1x256xf32, #tpu.memory_space<vmem>>, vector<1x1x256xf32>
    %39 = vector.shape_cast %38 : vector<1x1x256xf32> to vector<1x256xf32>
    %40 = vector.shape_cast %37 : vector<1x256xf32> to vector<1x1x256xf32>
    tpu.vector_store %arg7[%c0_32, %c0_33, %c0_34], %40 {strides = array<i32>} : memref<1x1x256xf32, #tpu.memory_space<vmem>>, vector<1x1x256xf32>,
    %41 = arith.mulf %31, %31 : vector<32x256xf32>
    %cst_35 = arith.constant dense<0.000000e+00> : vector<256xf32>
    %42 = vector.multi_reduction <add>, %41, %cst_35 [0] : vector<32x256xf32> to vector<256xf32>
    %43 = vector.shape_cast %42 : vector<256xf32> to vector<1x256xf32>
    %c0_36 = arith.constant 0 : index
    %c0_37 = arith.constant 0 : index
    %c0_38 = arith.constant 0 : index
    %44 = vector.load %arg8[%c0_36, %c0_37, %c0_38] : memref<1x1x256xf32, #tpu.memory_space<vmem>>, vector<1x1x256xf32>
    %45 = vector.shape_cast %44 : vector<1x1x256xf32> to vector<1x256xf32>
    %46 = vector.shape_cast %43 : vector<1x256xf32> to vector<1x1x256xf32>
    tpu.vector_store %arg8[%c0_36, %c0_37, %c0_38], %46 {strides = array<i32>} : memref<1x1x256xf32, #tpu.memory_space<vmem>>, vector<1x1x256xf32>,
    return
  }
  func.func @transform_0(%arg0: i32) -> (i32, i32, i32) {
    %c0_i32 = arith.constant 0 : i32
    %c0_i32_0 = arith.constant 0 : i32
    %c0_i32_1 = arith.constant 0 : i32
    return %arg0, %c0_i32, %c0_i32_0 : i32, i32, i32
  }
  func.func @transform_1(%arg0: i32) -> (i32, i32) {
    %c0_i32 = arith.constant 0 : i32
    %c0_i32_0 = arith.constant 0 : i32
    %c0_i32_1 = arith.constant 0 : i32
    return %c0_i32, %c0_i32_0 : i32, i32
  }
  func.func @transform_2(%arg0: i32) -> (i32, i32) {
    %c0_i32 = arith.constant 0 : i32
    %c0_i32_0 = arith.constant 0 : i32
    %c0_i32_1 = arith.constant 0 : i32
    return %c0_i32, %c0_i32_0 : i32, i32
  }
  func.func @transform_3(%arg0: i32) -> (i32, i32, i32) {
    %c0_i32 = arith.constant 0 : i32
    %c0_i32_0 = arith.constant 0 : i32
    %c0_i32_1 = arith.constant 0 : i32
    %c0_i32_2 = arith.constant 0 : i32
    return %c0_i32, %c0_i32_0, %c0_i32_1 : i32, i32, i32
  }
  func.func @transform_4(%arg0: i32) -> (i32, i32) {
    %c0_i32 = arith.constant 0 : i32
    %c0_i32_0 = arith.constant 0 : i32
    %c0_i32_1 = arith.constant 0 : i32
    return %c0_i32, %c0_i32_0 : i32, i32
  }
  func.func @transform_5(%arg0: i32) -> (i32, i32, i32) {
    %c0_i32 = arith.constant 0 : i32
    %c0_i32_0 = arith.constant 0 : i32
    %c0_i32_1 = arith.constant 0 : i32
    return %arg0, %c0_i32, %c0_i32_0 : i32, i32, i32
  }
  func.func @transform_6(%arg0: i32) -> (i32, i32, i32) {
    %c0_i32 = arith.constant 0 : i32
    %c0_i32_0 = arith.constant 0 : i32
    %c0_i32_1 = arith.constant 0 : i32
    return %arg0, %c0_i32, %c0_i32_0 : i32, i32, i32
  }
  func.func @transform_7(%arg0: i32) -> (i32, i32, i32) {
    %c0_i32 = arith.constant 0 : i32
    %c0_i32_0 = arith.constant 0 : i32
    %c0_i32_1 = arith.constant 0 : i32
    return %arg0, %c0_i32, %c0_i32_0 : i32, i32, i32
  }
}

module attributes {stable_mosaic.version = 11 : i64} {
  func.func @bn_relu_kernel(%arg0: i32, %arg1: memref<1x32x256xbf16, #tpu.memory_space<vmem>>, %arg2: memref<1x256xf32, #tpu.memory_space<vmem>>, %arg3: memref<1x256xf32, #tpu.memory_space<vmem>>, %arg4: memref<1x32x256xf32, #tpu.memory_space<vmem>>) attributes {dimension_semantics = [#tpu.dimension_semantics<parallel>], iteration_bounds = array<i64: 2>, scalar_prefetch = 0 : i64, scratch_operands = 0 : i64, tpu.core_type = #tpu.core_type<tc>, window_params = [{transform_indices = @transform_0, window_bounds = array<i64: 1, 32, 256>}, {pipeline_mode = #tpu.pipeline_mode<synchronous>, transform_indices = @transform_1, window_bounds = array<i64: 1, 256>}, {pipeline_mode = #tpu.pipeline_mode<synchronous>, transform_indices = @transform_2, window_bounds = array<i64: 1, 256>}, {transform_indices = @transform_3, window_bounds = array<i64: 1, 32, 256>}]} {
    %c0 = arith.constant 0 : index
    %c0_0 = arith.constant 0 : index
    %c0_1 = arith.constant 0 : index
    %0 = vector.load %arg1[%c0, %c0_0, %c0_1] : memref<1x32x256xbf16, #tpu.memory_space<vmem>>, vector<1x32x256xbf16>
    %1 = vector.shape_cast %0 : vector<1x32x256xbf16> to vector<32x256xbf16>
    %2 = arith.extf %1 : vector<32x256xbf16> to vector<32x256xf32>
    %c0_2 = arith.constant 0 : index
    %c0_3 = arith.constant 0 : index
    %3 = vector.load %arg2[%c0_2, %c0_3] : memref<1x256xf32, #tpu.memory_space<vmem>>, vector<1x256xf32>
    %4 = vector.broadcast %3 : vector<1x256xf32> to vector<32x256xf32>
    %5 = arith.mulf %2, %4 : vector<32x256xf32>
    %c0_4 = arith.constant 0 : index
    %c0_5 = arith.constant 0 : index
    %6 = vector.load %arg3[%c0_4, %c0_5] : memref<1x256xf32, #tpu.memory_space<vmem>>, vector<1x256xf32>
    %7 = vector.broadcast %6 : vector<1x256xf32> to vector<32x256xf32>
    %8 = arith.addf %5, %7 : vector<32x256xf32>
    %cst = arith.constant 0.000000e+00 : f32
    %9 = vector.broadcast %cst : f32 to vector<32x256xf32>
    %10 = arith.maximumf %8, %9 : vector<32x256xf32>
    %c0_6 = arith.constant 0 : index
    %c0_7 = arith.constant 0 : index
    %c0_8 = arith.constant 0 : index
    %11 = vector.load %arg4[%c0_6, %c0_7, %c0_8] : memref<1x32x256xf32, #tpu.memory_space<vmem>>, vector<1x32x256xf32>
    %12 = vector.shape_cast %11 : vector<1x32x256xf32> to vector<32x256xf32>
    %13 = vector.shape_cast %10 : vector<32x256xf32> to vector<1x32x256xf32>
    tpu.vector_store %arg4[%c0_6, %c0_7, %c0_8], %13 {strides = array<i32>} : memref<1x32x256xf32, #tpu.memory_space<vmem>>, vector<1x32x256xf32>,
    return
  }
  func.func @transform_0(%arg0: i32) -> (i32, i32, i32) {
    %c0_i32 = arith.constant 0 : i32
    %c0_i32_0 = arith.constant 0 : i32
    %c0_i32_1 = arith.constant 0 : i32
    return %arg0, %c0_i32, %c0_i32_0 : i32, i32, i32
  }
  func.func @transform_1(%arg0: i32) -> (i32, i32) {
    %c0_i32 = arith.constant 0 : i32
    %c0_i32_0 = arith.constant 0 : i32
    %c0_i32_1 = arith.constant 0 : i32
    return %c0_i32, %c0_i32_0 : i32, i32
  }
  func.func @transform_2(%arg0: i32) -> (i32, i32) {
    %c0_i32 = arith.constant 0 : i32
    %c0_i32_0 = arith.constant 0 : i32
    %c0_i32_1 = arith.constant 0 : i32
    return %c0_i32, %c0_i32_0 : i32, i32
  }
  func.func @transform_3(%arg0: i32) -> (i32, i32, i32) {
    %c0_i32 = arith.constant 0 : i32
    %c0_i32_0 = arith.constant 0 : i32
    %c0_i32_1 = arith.constant 0 : i32
    return %arg0, %c0_i32, %c0_i32_0 : i32, i32, i32
  }
}

</mosaic_0001>

<bundles_post_ra>
// kernel: tile.53
= control target key start
LH: loop header
LB: loop body
LE: loop exit
PB: predicated region body
PF: predicated region fallthrough
CT: control target
= control target key end

     0   :  { %s64_s0 = inlined_call_operand.vmem [shape: f32[8], index: 0, kind: input, shape index: {}]   ;;  %s65_s1 = inlined_call_operand.vmem [shape: f32[64,8], index: 1, kind: output, shape index: {}]  }
   0x1   :  { %v4_v0 = vld [vmem:[%s64_s0] ss:$0 sm:$0xff] }
   0x2   :  { %5 = vst [vmem:[%s65_s1] sm:$0xff] %v4_v0 }
   0x3   :  { %20 = vst [vmem:[%s65_s1 + $0x8] sm:$0xff] %v4_v0 }
   0x4   :  { %21 = vst [vmem:[%s65_s1 + $0x10] sm:$0xff] %v4_v0 }
   0x5   :  { %22 = vst [vmem:[%s65_s1 + $0x18] sm:$0xff] %v4_v0 }
   0x6   :  { %23 = vst [vmem:[%s65_s1 + $0x20] sm:$0xff] %v4_v0 }
   0x7   :  { %24 = vst [vmem:[%s65_s1 + $0x28] sm:$0xff] %v4_v0 }
   0x8   :  { %25 = vst [vmem:[%s65_s1 + $0x30] sm:$0xff] %v4_v0 }
   0x9   :  { %26 = vst [vmem:[%s65_s1 + $0x38] sm:$0xff] %v4_v0 }

// kernel: tile.54
= control target key start
LH: loop header
LB: loop body
LE: loop exit
PB: predicated region body
PF: predicated region fallthrough
CT: control target
= control target key end

     0   :  { %vm6_vm0 = vcmask 1043458   ;;  %s11_s6 = smov 3  ;;  %s14_s7 = smov 12  ;;  %vm8_vm1 = vcmask 64512   ;;  %vm20_vm2 = vcmask 1048512   ;;  %vm32_vm3 = vcmask 982912   ;;  %s411_s0 = inlined_call_operand.vmem [shape: f32[64,8], index: 0, kind: input, shape index: {}]   ;;  %s412_s1 = inlined_call_operand.vmem [shape: f32[1,512], index: 1, kind: output, shape index: {}]  }
   0x1   :  { %v214_v0 = vld [vmem:[%s411_s0 + $0xf] ss:$16 sm:%s11_s6]   ;;  %s35_s12 = smov 3  ;;  %s38_s15 = smov 12  ;;  %vm44_vm4 = vcmask 917312   ;;  %vm56_vm5 = vcmask 851712  }
   0x2   :  { %v215_v1 = vld [vmem:[%s411_s0 + $0xf] ss:$16 sm:%s14_s7]   ;;  %v218_v3 = vld [vmem:[%s411_s0 + $0xd] ss:$16 sm:%s35_s12]   ;;  %s262_s16 = smov 120   ;;  %s23_s19 = smov 3 }
   0x3   :  { %v17_v2 = vsel %vm6_vm0, %v215_v1, %v214_v0  ;;  %v219_v4 = vld [vmem:[%s411_s0 + $0xd] ss:$16 sm:%s38_s15]   ;;  %s26_s20 = smov 12  ;;  %v216_v6 = vld [vmem:[%s411_s0 + $0xe] ss:$16 sm:%s23_s19]   ;;  %s47_s23 = smov 3 }
   0x4   :  { %18 = vrot.lane.b32.xlu0 %v17_v2, %s262_s16  ;;  %v41_v5 = vsel %vm6_vm0, %v219_v4, %v218_v3  ;;  %s263_s24 = smov 104   ;;  %v217_v7 = vld [vmem:[%s411_s0 + $0xe] ss:$16 sm:%s26_s20]   ;;  %s50_s27 = smov 12  ;;  %vm68_vm6 = vcmask 786112   ;;  %vm80_vm7 = vcmask 720512  }
   0x5   :  { %42 = vrot.lane.b32.xlu1 %v41_v5, %s263_s24  ;;  %v220_v8 = vld [vmem:[%s411_s0 + $0xc] ss:$16 sm:%s47_s23]   ;;  %v29_v10 = vsel %vm6_vm0, %v217_v7, %v216_v6  ;;  %s83_s3 = smov 3  ;;  %s86_s4 = smov 12  ;;  %vm92_vm8 = vcmask 654912   ;;  %vm104_vm9 = vcmask 589312  }
   0x6   :  { %v221_v9 = vld [vmem:[%s411_s0 + $0xc] ss:$16 sm:%s50_s27]   ;;  %s264_s5 = smov 112   ;;  %s95_s6 = smov 3  ;;  %v226_v12 = vld [vmem:[%s411_s0 + $0x9] ss:$16 sm:%s83_s3]  }
   0x7   :  { %v53_v11 = vsel %vm6_vm0, %v221_v9, %v220_v8  ;;  %s98_s7 = smov 12  ;;  %v227_v13 = vld [vmem:[%s411_s0 + $0x9] ss:$16 sm:%s86_s4]   ;;  %s59_s12 = smov 3  ;;  %v228_v16 = vld [vmem:[%s411_s0 + $0x8] ss:$16 sm:%s95_s6]  }
   0x8   :  { %s62_s13 = smov 12  ;;  %s265_s14 = smov 96   ;;  %v222_v14 = vld [vmem:[%s411_s0 + $0xb] ss:$16 sm:%s59_s12]   ;;  %v229_v17 = vld [vmem:[%s411_s0 + $0x8] ss:$16 sm:%s98_s7]   ;;  %v89_v19 = vsel %vm6_vm0, %v227_v13, %v226_v12 }
   0x9   :  { %v223_v15 = vld [vmem:[%s411_s0 + $0xb] ss:$16 sm:%s62_s13]   ;;  %s266_s23 = smov 88   ;;  %s71_s24 = smov 3  ;;  %v101_v20 = vsel %vm6_vm0, %v229_v17, %v228_v16  ;;  %vm116_vm10 = vcmask 523712   ;;  %vm128_vm11 = vcmask 458112  }
   0xa   :  { %v65_v18 = vsel %vm6_vm0, %v223_v15, %v222_v14  ;;  %s119_s25 = smov 3  ;;  %s74_s26 = smov 12  ;;  %v224_v21 = vld [vmem:[%s411_s0 + $0xa] ss:$16 sm:%s71_s24]   ;;  %vm140_vm12 = vcmask 392512   ;;  %vm152_vm13 = vcmask 326912  }
   0xb   :  { %66 = vrot.lane.b32.xlu2 %v65_v18, %s266_s23  ;;  %s122_s27 = smov 12  ;;  %v225_v22 = vld [vmem:[%s411_s0 + $0xa] ss:$16 sm:%s74_s26]   ;;  %s267_s3 = smov 72   ;;  %vm164_vm14 = vcmask 261312   ;;  %vm176_vm15 = vcmask 195712  }
   0xc   :  { %30 = vrot.lane.b32.xlu0 %v29_v10, %s264_s5  ;;  %v232_v23 = vld [vmem:[%s411_s0 + $0x6] ss:$16 sm:%s119_s25]   ;;  %s131_s6 = smov 3  ;;  %s134_s7 = smov 12  ;;  %v77_v25 = vsel %vm6_vm0, %v225_v22, %v224_v21 }
   0xd   :  { %54 = vrot.lane.b32.xlu1 %v53_v11, %s265_s14  ;;  %s268_s8 = smov 64   ;;  %v233_v24 = vld [vmem:[%s411_s0 + $0x6] ss:$16 sm:%s122_s27]   ;;  %s107_s15 = smov 3 }
   0xe   :  { %v234_v26 = vld [vmem:[%s411_s0 + $0x5] ss:$16 sm:%s131_s6]   ;;  %s110_s16 = smov 12  ;;  %v125_v28 = vsel %vm6_vm0, %v233_v24, %v232_v23  ;;  %s269_s17 = smov 80   ;;  %v230_v30 = vld [vmem:[%s411_s0 + $0x7] ss:$16 sm:%s107_s15]  }
   0xf   :  { %v235_v27 = vld [vmem:[%s411_s0 + $0x5] ss:$16 sm:%s134_s7]   ;;  %s155_s18 = smov 3  ;;  %s158_s19 = smov 12  ;;  %v231_v31 = vld [vmem:[%s411_s0 + $0x7] ss:$16 sm:%s110_s16]  }
  0x10   :  { %v137_v29 = vsel %vm6_vm0, %v235_v27, %v234_v26  ;;  %s270_s24 = smov 48   ;;  %v238_v32 = vld [vmem:[%s411_s0 + $0x3] ss:$16 sm:%s155_s18]   ;;  %s167_s27 = smov 3  ;;  %v113_v34 = vsel %vm6_vm0, %v231_v31, %v230_v30 }
  0x11   :  { %s170_s28 = smov 12  ;;  %s271_s29 = smov 40   ;;  %v239_v33 = vld [vmem:[%s411_s0 + $0x3] ss:$16 sm:%s158_s19]   ;;  %v240_v35 = vld [vmem:[%s411_s0 + $0x2] ss:$16 sm:%s167_s27]  }
  0x12   :  { %v241_v36 = vld [vmem:[%s411_s0 + $0x2] ss:$16 sm:%s170_s28]   ;;  %s143_s7 = smov 3  ;;  %v161_v37 = vsel %vm6_vm0, %v239_v33, %v238_v32  ;;  %s272_s9 = smov 56  }
  0x13   :  { %78 = vrot.lane.b32.xlu2 %v77_v25, %s269_s17  ;;  %v173_v38 = vsel %vm6_vm0, %v241_v36, %v240_v35  ;;  %v236_v39 = vld [vmem:[%s411_s0 + $0x4] ss:$16 sm:%s143_s7]   ;;  %s273_s14 = smov 24   ;;  %s274_s15 = smov 16  }
  0x14   :  { %90 = vrot.lane.b32.xlu0 %v89_v19, %s267_s3  ;;  %s179_s16 = smov 3  ;;  %s182_s17 = smov 12 }
  0x15   :  { %102 = vrot.lane.b32.xlu1 %v101_v20, %s268_s8  ;;  %s146_s8 = smov 12  ;;  %s275_s18 = smov 32   ;;  %v242_v42 = vld [vmem:[%s411_s0 + $0x1] ss:$16 sm:%s179_s16]  }
  0x16   :  { %v237_v40 = vld [vmem:[%s411_s0 + $0x4] ss:$16 sm:%s146_s8]   ;;  %v243_v43 = vld [vmem:[%s411_s0 + $0x1] ss:$16 sm:%s182_s17]   ;;  %s276_s23 = smov 8   ;;  %s4_s25 = smov 12 }
  0x17   :  { %v149_v41 = vsel %vm6_vm0, %v237_v40, %v236_v39  ;;  %v185_v44 = vsel %vm6_vm0, %v243_v43, %v242_v42  ;;  %v5_v46 = vld [vmem:[%s411_s0] ss:$16 sm:%s4_s25]  }
  0x1b   :  { %114 = vrot.lane.b32.xlu2 %v113_v34, %s272_s9 }
  0x1c   :  { %126 = vrot.lane.b32.xlu0 %v125_v28, %s270_s24  ;;  %s2_s24 = smov 3 }
  0x1d   :  { %138 = vrot.lane.b32.xlu1 %v137_v29, %s271_s29  ;;  %v3_v45 = vld [vmem:[%s411_s0] ss:$16 sm:%s2_s24]  }
  0x1e   :  { %v7_v47 = vsel %vm6_vm0, %v5_v46, %v3_v45  ;;  %vm188_vm0 = vcmask 130112  }
  0x1f   :  { %9 = vst.msk [vmem:[#allocation0] ss:$8 sm:$0xf] %vm8_vm1, %v7_v47  }
  0x23   :  { %150 = vrot.lane.b32.xlu2 %v149_v41, %s275_s18 }
  0x24   :  { %162 = vrot.lane.b32.xlu0 %v161_v37, %s273_s14 }
  0x25   :  { %174 = vrot.lane.b32.xlu1 %v173_v38, %s274_s15 }
  0x2b   :  { %186 = vrot.lane.b32.xlu2 %v185_v44, %s276_s23 }
  0x65   :  { %v67_v48 = vpop.permute.xlu2 %66  }
  0x6d   :  { %v79_v49 = vpop.permute.xlu2 %78  }
  0x75   :  { %v115_v52 = vpop.permute.xlu2 %114  }
  0x76   :  { %v19_v50 = vpop.permute.xlu0 %18  }
  0x77   :  { %21 = vst.msk [vmem:[#allocation0] ss:$8 sm:$0xf] %vm20_vm2, %v19_v50   ;;  %v43_v51 = vpop.permute.xlu1 %42  }
  0x7d   :  { %v151_v55 = vpop.permute.xlu2 %150  }
  0x7e   :  { %v31_v53 = vpop.permute.xlu0 %30  }
  0x7f   :  { %33 = vst.msk [vmem:[#allocation0] ss:$8 sm:$0xf] %vm32_vm3, %v31_v53   ;;  %v55_v54 = vpop.permute.xlu1 %54  }
  0x80   :  { %45 = vst.msk [vmem:[#allocation0] ss:$8 sm:$0xf] %vm44_vm4, %v43_v51  }
  0x81   :  { %57 = vst.msk [vmem:[#allocation0] ss:$8 sm:$0xf] %vm56_vm5, %v55_v54  }
  0x82   :  { %69 = vst.msk [vmem:[#allocation0] ss:$8 sm:$0xf] %vm68_vm6, %v67_v48  }
  0x83   :  { %81 = vst.msk [vmem:[#allocation0] ss:$8 sm:$0xf] %vm80_vm7, %v79_v49  }
  0x85   :  { %v187_v58 = vpop.permute.xlu2 %186  }
  0x86   :  { %v91_v56 = vpop.permute.xlu0 %90  }
  0x87   :  { %93 = vst.msk [vmem:[#allocation0] ss:$8 sm:$0xf] %vm92_vm8, %v91_v56   ;;  %v103_v57 = vpop.permute.xlu1 %102  }
  0x88   :  { %105 = vst.msk [vmem:[#allocation0] ss:$8 sm:$0xf] %vm104_vm9, %v103_v57  }
  0x89   :  { %117 = vst.msk [vmem:[#allocation0] ss:$8 sm:$0xf] %vm116_vm10, %v115_v52  }
  0x8e   :  { %v127_v59 = vpop.permute.xlu0 %126  }
  0x8f   :  { %129 = vst.msk [vmem:[#allocation0] ss:$8 sm:$0xf] %vm128_vm11, %v127_v59   ;;  %v139_v60 = vpop.permute.xlu1 %138  }
  0x90   :  { %141 = vst.msk [vmem:[#allocation0] ss:$8 sm:$0xf] %vm140_vm12, %v139_v60  }
  0x91   :  { %153 = vst.msk [vmem:[#allocation0] ss:$8 sm:$0xf] %vm152_vm13, %v151_v55  }
  0x96   :  { %v163_v61 = vpop.permute.xlu0 %162  }
  0x97   :  { %165 = vst.msk [vmem:[#allocation0] ss:$8 sm:$0xf] %vm164_vm14, %v163_v61   ;;  %v175_v62 = vpop.permute.xlu1 %174  }
  0x98   :  { %177 = vst.msk [vmem:[#allocation0] ss:$8 sm:$0xf] %vm176_vm15, %v175_v62  }
  0x99   :  { %189 = vst.msk [vmem:[#allocation0] ss:$8 sm:$0xf] %vm188_vm0, %v187_v58  }
  0xa0   :  { %v192_v63 = vld [vmem:[#allocation0] sm:$0x1]  ;;  %v197_v0 = vld [vmem:[#allocation0 + $0x8] sm:$0x1]  ;;  %v203_v1 = vld [vmem:[#allocation0 + $0x10] sm:$0x1] }
  0xa1   :  { %195 = vst [vmem:[%s412_s1] sm:$0x1] %v192_v63  ;;  %v209_v2 = vld [vmem:[#allocation0 + $0x18] sm:$0x1] }
  0xa2   :  { %244 = vst [vmem:[%s412_s1 + $0x1] sm:$0x1] %v197_v0 }
  0xa3   :  { %245 = vst [vmem:[%s412_s1 + $0x2] sm:$0x1] %v203_v1 }
  0xa4   :  { %246 = vst [vmem:[%s412_s1 + $0x3] sm:$0x1] %v209_v2 }

// kernel: tile.58
= control target key start
LH: loop header
LB: loop body
LE: loop exit
PB: predicated region body
PF: predicated region fallthrough
CT: control target
= control target key end

     0   :  { %s40_s0 = inlined_call_operand.vmem [shape: f32[4], index: 0, kind: input, shape index: {}]   ;;  %s41_s1 = inlined_call_operand.vmem [shape: f32[32,4], index: 1, kind: output, shape index: {}]  }
   0x1   :  { %v4_v0 = vld [vmem:[%s40_s0] ss:$0 sm:$0xff] }
   0x2   :  { %5 = vst [vmem:[%s41_s1] sm:$0xff] %v4_v0 }
   0x3   :  { %12 = vst [vmem:[%s41_s1 + $0x8] sm:$0xff] %v4_v0 }
   0x4   :  { %13 = vst [vmem:[%s41_s1 + $0x10] sm:$0xff] %v4_v0 }
   0x5   :  { %14 = vst [vmem:[%s41_s1 + $0x18] sm:$0xff] %v4_v0 }

// kernel: tile.59
= control target key start
LH: loop header
LB: loop body
LE: loop exit
PB: predicated region body
PF: predicated region fallthrough
CT: control target
= control target key end

     0   :  { %s259_s10 = smov 124   ;;  %s260_s11 = smov 116   ;;  %vm3_vm0 = vcmask 31744   ;;  %vm9_vm1 = vcmask 1048544   ;;  %vm15_vm2 = vcmask 1015744   ;;  %vm21_vm3 = vcmask 982944   ;;  %s399_s0 = inlined_call_operand.vmem [shape: f32[32,4], index: 0, kind: input, shape index: {}]   ;;  %s400_s1 = inlined_call_operand.vmem [shape: f32[1,128], index: 1, kind: output, shape index: {}]  }
   0x1   :  { %v197_v0 = vld [vmem:[%s399_s0 + $0x1f] sm:$0x1]   ;;  %v199_v1 = vld [vmem:[%s399_s0 + $0x1d] sm:$0x1]   ;;  %v201_v2 = vld [vmem:[%s399_s0 + $0x1b] sm:$0x1]  }
   0x2   :  { %7 = vrot.lane.b32.xlu0 %v197_v0, %s259_s10  ;;  %19 = vrot.lane.b32.xlu1 %v199_v1, %s260_s11  ;;  %s261_s14 = smov 108   ;;  %v198_v3 = vld [vmem:[%s399_s0 + $0x1e] sm:$0x1]   ;;  %v200_v4 = vld [vmem:[%s399_s0 + $0x1c] sm:$0x1]   ;;  %s262_s19 = smov 120  }
   0x3   :  { %31 = vrot.lane.b32.xlu2 %v201_v2, %s261_s14  ;;  %s263_s20 = smov 112   ;;  %v202_v5 = vld [vmem:[%s399_s0 + $0x1a] sm:$0x1]   ;;  %s264_s23 = smov 104   ;;  %v203_v6 = vld [vmem:[%s399_s0 + $0x19] sm:$0x1]  }
   0x4   :  { %v204_v7 = vld [vmem:[%s399_s0 + $0x18] sm:$0x1]   ;;  %s265_s28 = smov 100   ;;  %s266_s29 = smov 96   ;;  %v205_v8 = vld [vmem:[%s399_s0 + $0x17] sm:$0x1]  }
   0x5   :  { %s267_s3 = smov 92   ;;  %v206_v9 = vld [vmem:[%s399_s0 + $0x16] sm:$0x1]   ;;  %v207_v10 = vld [vmem:[%s399_s0 + $0x15] sm:$0x1]   ;;  %s268_s8 = smov 88  }
   0x6   :  { %s269_s9 = smov 84   ;;  %v208_v11 = vld [vmem:[%s399_s0 + $0x14] sm:$0x1]   ;;  %s270_s12 = smov 80   ;;  %v209_v12 = vld [vmem:[%s399_s0 + $0x13] sm:$0x1]  }
   0x7   :  { %v210_v13 = vld [vmem:[%s399_s0 + $0x12] sm:$0x1]   ;;  %s271_s17 = smov 76   ;;  %s272_s18 = smov 72   ;;  %v211_v14 = vld [vmem:[%s399_s0 + $0x11] sm:$0x1]  }
   0x8   :  { %s273_s21 = smov 68   ;;  %v212_v15 = vld [vmem:[%s399_s0 + $0x10] sm:$0x1]   ;;  %v213_v16 = vld [vmem:[%s399_s0 + $0xf] sm:$0x1]   ;;  %s274_s26 = smov 64  }
   0x9   :  { %s275_s27 = smov 60   ;;  %v214_v17 = vld [vmem:[%s399_s0 + $0xe] sm:$0x1]   ;;  %s276_s30 = smov 56   ;;  %v215_v18 = vld [vmem:[%s399_s0 + $0xd] sm:$0x1]  }
   0xa   :  { %13 = vrot.lane.b32.xlu0 %v198_v3, %s262_s19  ;;  %25 = vrot.lane.b32.xlu1 %v200_v4, %s263_s20  ;;  %v216_v19 = vld [vmem:[%s399_s0 + $0xc] sm:$0x1]   ;;  %s277_s6 = smov 52   ;;  %s278_s7 = smov 48   ;;  %v217_v20 = vld [vmem:[%s399_s0 + $0xb] sm:$0x1]  }
   0xb   :  { %37 = vrot.lane.b32.xlu2 %v202_v5, %s264_s23  ;;  %s279_s10 = smov 44   ;;  %v218_v21 = vld [vmem:[%s399_s0 + $0xa] sm:$0x1]   ;;  %v219_v22 = vld [vmem:[%s399_s0 + $0x9] sm:$0x1]   ;;  %s280_s15 = smov 40  }
   0xc   :  { %s281_s16 = smov 36   ;;  %v220_v23 = vld [vmem:[%s399_s0 + $0x8] sm:$0x1]   ;;  %s282_s19 = smov 32   ;;  %v221_v24 = vld [vmem:[%s399_s0 + $0x7] sm:$0x1]  }
   0xd   :  { %v222_v25 = vld [vmem:[%s399_s0 + $0x6] sm:$0x1]   ;;  %s283_s24 = smov 28   ;;  %s284_s25 = smov 24   ;;  %v223_v26 = vld [vmem:[%s399_s0 + $0x5] sm:$0x1]  }
   0xe   :  { %v224_v27 = vld [vmem:[%s399_s0 + $0x4] sm:$0x1]   ;;  %v225_v28 = vld [vmem:[%s399_s0 + $0x3] sm:$0x1]   ;;  %s286_s4 = smov 16   ;;  %s287_s5 = smov 12  }
   0xf   :  { %v226_v29 = vld [vmem:[%s399_s0 + $0x2] sm:$0x1]   ;;  %v227_v30 = vld [vmem:[%s399_s0 + $0x1] sm:$0x1]   ;;  %s289_s11 = smov 4   ;;  %vm27_vm4 = vcmask 950144  }
  0x10   :  { %v2_v31 = vld [vmem:[%s399_s0] sm:$0x1]   ;;  %vm33_vm5 = vcmask 917344   ;;  %vm39_vm6 = vcmask 884544   ;;  %vm45_vm7 = vcmask 851744   ;;  %vm51_vm8 = vcmask 818944  }
  0x11   :  { %4 = vst.msk [vmem:[#allocation0] sm:$0x1] %vm3_vm0, %v2_v31   ;;  %vm57_vm9 = vcmask 786144   ;;  %vm63_vm10 = vcmask 753344   ;;  %vm69_vm11 = vcmask 720544   ;;  %vm75_vm12 = vcmask 687744  }
  0x12   :  { %43 = vrot.lane.b32.xlu0 %v203_v6, %s265_s28  ;;  %49 = vrot.lane.b32.xlu1 %v204_v7, %s266_s29  ;;  %s285_s28 = smov 20   ;;  %vm81_vm13 = vcmask 654944   ;;  %vm87_vm14 = vcmask 622144   ;;  %vm93_vm15 = vcmask 589344   ;;  %vm99_vm0 = vcmask 556544  }
  0x13   :  { %55 = vrot.lane.b32.xlu2 %v205_v8, %s267_s3 }
  0x1a   :  { %61 = vrot.lane.b32.xlu0 %v206_v9, %s268_s8  ;;  %67 = vrot.lane.b32.xlu1 %v207_v10, %s269_s9  ;;  %s288_s8 = smov 8  }
  0x1b   :  { %73 = vrot.lane.b32.xlu2 %v208_v11, %s270_s12 }
  0x22   :  { %79 = vrot.lane.b32.xlu0 %v209_v12, %s271_s17  ;;  %85 = vrot.lane.b32.xlu1 %v210_v13, %s272_s18 }
  0x23   :  { %91 = vrot.lane.b32.xlu2 %v211_v14, %s273_s21 }
  0x2a   :  { %97 = vrot.lane.b32.xlu0 %v212_v15, %s274_s26  ;;  %103 = vrot.lane.b32.xlu1 %v213_v16, %s275_s27 }
  0x2b   :  { %109 = vrot.lane.b32.xlu2 %v214_v17, %s276_s30 }
  0x32   :  { %115 = vrot.lane.b32.xlu0 %v215_v18, %s277_s6  ;;  %121 = vrot.lane.b32.xlu1 %v216_v19, %s278_s7 }
  0x33   :  { %127 = vrot.lane.b32.xlu2 %v217_v20, %s279_s10 }
  0x3a   :  { %133 = vrot.lane.b32.xlu0 %v218_v21, %s280_s15  ;;  %139 = vrot.lane.b32.xlu1 %v219_v22, %s281_s16 }
  0x3b   :  { %145 = vrot.lane.b32.xlu2 %v220_v23, %s282_s19 }
  0x42   :  { %151 = vrot.lane.b32.xlu0 %v221_v24, %s283_s24  ;;  %157 = vrot.lane.b32.xlu1 %v222_v25, %s284_s25 }
  0x43   :  { %163 = vrot.lane.b32.xlu2 %v223_v26, %s285_s28 }
  0x4a   :  { %169 = vrot.lane.b32.xlu0 %v224_v27, %s286_s4  ;;  %175 = vrot.lane.b32.xlu1 %v225_v28, %s287_s5 }
  0x4b   :  { %181 = vrot.lane.b32.xlu2 %v226_v29, %s288_s8 }
  0x52   :  { %187 = vrot.lane.b32.xlu0 %v227_v30, %s289_s11 }
  0x5d   :  { %v32_v32 = vpop.permute.xlu2 %31  }
  0x65   :  { %v38_v33 = vpop.permute.xlu2 %37  }
  0x6d   :  { %v56_v34 = vpop.permute.xlu2 %55  }
  0x74   :  { %v8_v35 = vpop.permute.xlu0 %7   ;;  %v20_v36 = vpop.permute.xlu1 %19  }
  0x75   :  { %10 = vst.msk [vmem:[#allocation0] sm:$0x1] %vm9_vm1, %v8_v35   ;;  %v74_v37 = vpop.permute.xlu2 %73   ;;  %vm105_vm1 = vcmask 523744  }
  0x7c   :  { %v14_v38 = vpop.permute.xlu0 %13   ;;  %v26_v39 = vpop.permute.xlu1 %25  }
  0x7d   :  { %16 = vst.msk [vmem:[#allocation0] sm:$0x1] %vm15_vm2, %v14_v38   ;;  %v92_v40 = vpop.permute.xlu2 %91   ;;  %vm111_vm2 = vcmask 490944  }
  0x7e   :  { %22 = vst.msk [vmem:[#allocation0] sm:$0x1] %vm21_vm3, %v20_v36   ;;  %vm117_vm3 = vcmask 458144  }
  0x7f   :  { %28 = vst.msk [vmem:[#allocation0] sm:$0x1] %vm27_vm4, %v26_v39   ;;  %vm123_vm4 = vcmask 425344  }
  0x80   :  { %34 = vst.msk [vmem:[#allocation0] sm:$0x1] %vm33_vm5, %v32_v32   ;;  %vm129_vm5 = vcmask 392544  }
  0x81   :  { %40 = vst.msk [vmem:[#allocation0] sm:$0x1] %vm39_vm6, %v38_v33   ;;  %vm135_vm6 = vcmask 359744  }
  0x84   :  { %v44_v41 = vpop.permute.xlu0 %43   ;;  %v50_v42 = vpop.permute.xlu1 %49  }
  0x85   :  { %46 = vst.msk [vmem:[#allocation0] sm:$0x1] %vm45_vm7, %v44_v41   ;;  %v110_v43 = vpop.permute.xlu2 %109   ;;  %vm141_vm7 = vcmask 326944  }
  0x86   :  { %52 = vst.msk [vmem:[#allocation0] sm:$0x1] %vm51_vm8, %v50_v42   ;;  %vm147_vm8 = vcmask 294144  }
  0x87   :  { %58 = vst.msk [vmem:[#allocation0] sm:$0x1] %vm57_vm9, %v56_v34   ;;  %vm153_vm9 = vcmask 261344  }
  0x8c   :  { %v62_v44 = vpop.permute.xlu0 %61   ;;  %v68_v45 = vpop.permute.xlu1 %67  }
  0x8d   :  { %64 = vst.msk [vmem:[#allocation0] sm:$0x1] %vm63_vm10, %v62_v44   ;;  %v128_v46 = vpop.permute.xlu2 %127   ;;  %vm159_vm10 = vcmask 228544  }
  0x8e   :  { %70 = vst.msk [vmem:[#allocation0] sm:$0x1] %vm69_vm11, %v68_v45   ;;  %vm165_vm11 = vcmask 195744  }
  0x8f   :  { %76 = vst.msk [vmem:[#allocation0] sm:$0x1] %vm75_vm12, %v74_v37   ;;  %vm171_vm12 = vcmask 162944  }
  0x94   :  { %v80_v47 = vpop.permute.xlu0 %79   ;;  %v86_v48 = vpop.permute.xlu1 %85  }
  0x95   :  { %82 = vst.msk [vmem:[#allocation0] sm:$0x1] %vm81_vm13, %v80_v47   ;;  %v146_v49 = vpop.permute.xlu2 %145   ;;  %vm177_vm13 = vcmask 130144  }
  0x96   :  { %88 = vst.msk [vmem:[#allocation0] sm:$0x1] %vm87_vm14, %v86_v48   ;;  %vm183_vm14 = vcmask 97344  }
  0x97   :  { %94 = vst.msk [vmem:[#allocation0] sm:$0x1] %vm93_vm15, %v92_v40   ;;  %vm189_vm15 = vcmask 64544  }
  0x9c   :  { %v98_v50 = vpop.permute.xlu0 %97   ;;  %v104_v51 = vpop.permute.xlu1 %103  }
  0x9d   :  { %100 = vst.msk [vmem:[#allocation0] sm:$0x1] %vm99_vm0, %v98_v50   ;;  %v164_v52 = vpop.permute.xlu2 %163  }
  0x9e   :  { %106 = vst.msk [vmem:[#allocation0] sm:$0x1] %vm105_vm1, %v104_v51  }
  0x9f   :  { %112 = vst.msk [vmem:[#allocation0] sm:$0x1] %vm111_vm2, %v110_v43  }
  0xa4   :  { %v116_v53 = vpop.permute.xlu0 %115   ;;  %v122_v54 = vpop.permute.xlu1 %121  }
  0xa5   :  { %118 = vst.msk [vmem:[#allocation0] sm:$0x1] %vm117_vm3, %v116_v53   ;;  %v182_v55 = vpop.permute.xlu2 %181  }
  0xa6   :  { %124 = vst.msk [vmem:[#allocation0] sm:$0x1] %vm123_vm4, %v122_v54  }
  0xa7   :  { %130 = vst.msk [vmem:[#allocation0] sm:$0x1] %vm129_vm5, %v128_v46  }
  0xac   :  { %v134_v56 = vpop.permute.xlu0 %133   ;;  %v140_v57 = vpop.permute.xlu1 %139  }
  0xad   :  { %136 = vst.msk [vmem:[#allocation0] sm:$0x1] %vm135_vm6, %v134_v56  }
  0xae   :  { %142 = vst.msk [vmem:[#allocation0] sm:$0x1] %vm141_vm7, %v140_v57  }
  0xaf   :  { %148 = vst.msk [vmem:[#allocation0] sm:$0x1] %vm147_vm8, %v146_v49  }
  0xb4   :  { %v152_v58 = vpop.permute.xlu0 %151   ;;  %v158_v59 = vpop.permute.xlu1 %157  }
  0xb5   :  { %154 = vst.msk [vmem:[#allocation0] sm:$0x1] %vm153_vm9, %v152_v58  }
  0xb6   :  { %160 = vst.msk [vmem:[#allocation0] sm:$0x1] %vm159_vm10, %v158_v59  }
  0xb7   :  { %166 = vst.msk [vmem:[#allocation0] sm:$0x1] %vm165_vm11, %v164_v52  }
  0xbc   :  { %v170_v60 = vpop.permute.xlu0 %169   ;;  %v176_v61 = vpop.permute.xlu1 %175  }
  0xbd   :  { %172 = vst.msk [vmem:[#allocation0] sm:$0x1] %vm171_vm12, %v170_v60  }
  0xbe   :  { %178 = vst.msk [vmem:[#allocation0] sm:$0x1] %vm177_vm13, %v176_v61  }
  0xbf   :  { %184 = vst.msk [vmem:[#allocation0] sm:$0x1] %vm183_vm14, %v182_v55  }
  0xc4   :  { %v188_v62 = vpop.permute.xlu0 %187  }
  0xc5   :  { %190 = vst.msk [vmem:[#allocation0] sm:$0x1] %vm189_vm15, %v188_v62  }
  0xcc   :  { %v193_v63 = vld [vmem:[#allocation0] sm:$0x1] }
  0xcd   :  { %196 = vst [vmem:[%s400_s1] sm:$0x1] %v193_v63 }

// kernel: decoder_block_forward.5
= control target key start
LH: loop header
LB: loop body
LE: loop exit
PB: predicated region body
PF: predicated region fallthrough
CT: control target
= control target key end

     0   :  { %s714_s12 = smov 0   ;;  %s934_s0 = inlined_call_operand.vmem [shape: bf16[2,16,128], index: 0, kind: input, shape index: {}]   ;;  %s935_s1 = inlined_call_operand.vmem [shape: bf16[128,512], index: 1, kind: input, shape index: {}]   ;;  %s936_s2 = inlined_call_operand.vmem [shape: f32[1,512], index: 2, kind: input, shape index: {}]   ;;  %s937_s3 = inlined_call_operand.vmem [shape: bf16[2,16,512], index: 3, kind: output, shape index: {}]  }
   0x1 LB: > { %s500_s13 = sadd.s32 4294967295, %s692_s12   ;;  %p504_p0 = scmp.ge.s32.totalorder %s692_s12, 1  ;;  %s692_s12 = sphi %s714_s12, %s13_s12  }
   0x2   : > { %p137_p1 = scmp.lt.s32.totalorder %s692_s12, 3 }
   0x4   : > { %p138_p2 = pnand %p504_p0, %p137_p1 }
   0x5   : > { %p161_p3 = scmp.lt.s32.totalorder (!%p138_p2), %s500_s13, 1 }
   0x6   : > { %141 = sbr.rel (%p138_p2) target bundleno = 192 (0xc0), region = 32 }
   0xb   : > { %v627_v0 = vld [vmem:[%s935_s1 + $0xe0] sm:$0xf]  ;;  %v676_v1 = vld [vmem:[%s935_s1 + $0xec] sm:$0xf0]  ;;  %v674_v2 = vld [vmem:[%s935_s1 + $0xe4] sm:$0xf] }
   0xc   : > { %v628_v3 = vor.u32 %v676_v1, %v627_v0  ;;  %v629_v4 = vld [vmem:[%s935_s1 + $0xf0] sm:$0xf0]  ;;  %v635_v5 = vld [vmem:[%s935_s1 + $0xe8] sm:$0xf]  ;;  %v677_v6 = vld [vmem:[%s935_s1 + $0xf4] sm:$0xf0] }
   0xd   : > { %v632_v7 = vor.u32 %v674_v2, %v629_v4  ;;  %v636_v8 = vor.u32 %v677_v6, %v635_v5  ;;  %v675_v9 = vld [vmem:[%s935_s1 + $0xec] sm:$0xf]  ;;  %v637_v10 = vld [vmem:[%s935_s1 + $0xf8] sm:$0xf0]  ;;  %v611_v11 = vld [vmem:[%s935_s1 + $0xc0] sm:$0xf] }
   0xe   : > { %381 = vmatpush.bf16.msra.mxu0 %v628_v3  ;;  %v640_v12 = vor.u32 %v675_v9, %v637_v10  ;;  %v672_v13 = vld [vmem:[%s935_s1 + $0xcc] sm:$0xf0]  ;;  %v670_v14 = vld [vmem:[%s935_s1 + $0xc4] sm:$0xf]  ;;  %v613_v15 = vld [vmem:[%s935_s1 + $0xd0] sm:$0xf0] }
   0xf   : > { %395 = vmatpush.bf16.msra.mxu1 %v632_v7  ;;  %409 = vmatpush.bf16.msra.mxu2 %v636_v8  ;;  %v612_v16 = vor.u32 %v672_v13, %v611_v11  ;;  %v616_v17 = vor.u32 %v670_v14, %v613_v15  ;;  %v619_v18 = vld [vmem:[%s935_s1 + $0xc8] sm:$0xf]  ;;  %v673_v19 = vld [vmem:[%s935_s1 + $0xd4] sm:$0xf0]  ;;  %v671_v20 = vld [vmem:[%s935_s1 + $0xcc] sm:$0xf] }
  0x10   : > { %423 = vmatpush.bf16.msra.mxu3 %v640_v12  ;;  %v620_v21 = vor.u32 %v673_v19, %v619_v18  ;;  %v621_v22 = vld [vmem:[%s935_s1 + $0xd8] sm:$0xf0]  ;;  %v595_v23 = vld [vmem:[%s935_s1 + $0xa0] sm:$0xf]  ;;  %v668_v24 = vld [vmem:[%s935_s1 + $0xac] sm:$0xf0] }
  0x11   : > { %v624_v25 = vor.u32 %v671_v20, %v621_v22  ;;  %v666_v26 = vld [vmem:[%s935_s1 + $0xa4] sm:$0xf]  ;;  %v597_v27 = vld [vmem:[%s935_s1 + $0xb0] sm:$0xf0]  ;;  %v603_v28 = vld [vmem:[%s935_s1 + $0xa8] sm:$0xf]  ;;  %v596_v29 = vor.u32 %v668_v24, %v595_v23 }
  0x12   : > { %382 = vmatpush.bf16.msra.mxu0 %v612_v16  ;;  %v669_v30 = vld [vmem:[%s935_s1 + $0xb4] sm:$0xf0]  ;;  %v667_v31 = vld [vmem:[%s935_s1 + $0xac] sm:$0xf]  ;;  %v605_v32 = vld [vmem:[%s935_s1 + $0xb8] sm:$0xf0]  ;;  %v600_v33 = vor.u32 %v666_v26, %v597_v27 }
  0x13   : > { %396 = vmatpush.bf16.msra.mxu1 %v616_v17  ;;  %410 = vmatpush.bf16.msra.mxu2 %v620_v21  ;;  %v604_v34 = vor.u32 %v669_v30, %v603_v28  ;;  %v579_v35 = vld [vmem:[%s935_s1 + $0x80] sm:$0xf]  ;;  %v664_v36 = vld [vmem:[%s935_s1 + $0x8c] sm:$0xf0]  ;;  %v662_v37 = vld [vmem:[%s935_s1 + $0x84] sm:$0xf]  ;;  %v608_v38 = vor.u32 %v667_v31, %v605_v32 }
  0x14   : > { %424 = vmatpush.bf16.msra.mxu3 %v624_v25  ;;  %v581_v39 = vld [vmem:[%s935_s1 + $0x90] sm:$0xf0]  ;;  %v587_v40 = vld [vmem:[%s935_s1 + $0x88] sm:$0xf]  ;;  %v665_v41 = vld [vmem:[%s935_s1 + $0x94] sm:$0xf0]  ;;  %v580_v44 = vor.u32 %v664_v36, %v579_v35 }
  0x15   : > { %v663_v42 = vld [vmem:[%s935_s1 + $0x8c] sm:$0xf]  ;;  %v589_v43 = vld [vmem:[%s935_s1 + $0x98] sm:$0xf0]  ;;  %v584_v45 = vor.u32 %v662_v37, %v581_v39  ;;  %v588_v46 = vor.u32 %v665_v41, %v587_v40  ;;  %v563_v47 = vld [vmem:[%s935_s1 + $0x60] sm:$0xf] }
  0x16   : > { %383 = vmatpush.bf16.msra.mxu0 %v596_v29  ;;  %v660_v48 = vld [vmem:[%s935_s1 + $0x6c] sm:$0xf0]  ;;  %v658_v49 = vld [vmem:[%s935_s1 + $0x64] sm:$0xf]  ;;  %v592_v50 = vor.u32 %v663_v42, %v589_v43  ;;  %v565_v51 = vld [vmem:[%s935_s1 + $0x70] sm:$0xf0] }
  0x17   : > { %397 = vmatpush.bf16.msra.mxu1 %v600_v33  ;;  %411 = vmatpush.bf16.msra.mxu2 %v604_v34  ;;  %v571_v52 = vld [vmem:[%s935_s1 + $0x68] sm:$0xf]  ;;  %v661_v53 = vld [vmem:[%s935_s1 + $0x74] sm:$0xf0]  ;;  %v659_v54 = vld [vmem:[%s935_s1 + $0x6c] sm:$0xf]  ;;  %v564_v56 = vor.u32 %v660_v48, %v563_v47  ;;  %v568_v57 = vor.u32 %v658_v49, %v565_v51 }
  0x18   : > { %425 = vmatpush.bf16.msra.mxu3 %v608_v38  ;;  %v573_v55 = vld [vmem:[%s935_s1 + $0x78] sm:$0xf0]  ;;  %v572_v58 = vor.u32 %v661_v53, %v571_v52  ;;  %v547_v59 = vld [vmem:[%s935_s1 + $0x40] sm:$0xf]  ;;  %v656_v60 = vld [vmem:[%s935_s1 + $0x4c] sm:$0xf0] }
  0x19   : > { %v654_v61 = vld [vmem:[%s935_s1 + $0x44] sm:$0xf]  ;;  %v576_v62 = vor.u32 %v659_v54, %v573_v55  ;;  %v549_v63 = vld [vmem:[%s935_s1 + $0x50] sm:$0xf0]  ;;  %v555_v0 = vld [vmem:[%s935_s1 + $0x48] sm:$0xf]  ;;  %v548_v4 = vor.u32 %v656_v60, %v547_v59 }
  0x1a   : > { %384 = vmatpush.bf16.msra.mxu0 %v580_v44  ;;  %v657_v1 = vld [vmem:[%s935_s1 + $0x54] sm:$0xf0]  ;;  %v655_v2 = vld [vmem:[%s935_s1 + $0x4c] sm:$0xf]  ;;  %v557_v3 = vld [vmem:[%s935_s1 + $0x58] sm:$0xf0]  ;;  %v552_v6 = vor.u32 %v654_v61, %v549_v63 }
  0x1b   : > { %398 = vmatpush.bf16.msra.mxu1 %v584_v45  ;;  %412 = vmatpush.bf16.msra.mxu2 %v588_v46  ;;  %v531_v5 = vld [vmem:[%s935_s1 + $0x20] sm:$0xf]  ;;  %v556_v7 = vor.u32 %v657_v1, %v555_v0  ;;  %v652_v8 = vld [vmem:[%s935_s1 + $0x2c] sm:$0xf0]  ;;  %v650_v9 = vld [vmem:[%s935_s1 + $0x24] sm:$0xf]  ;;  %v560_v11 = vor.u32 %v655_v2, %v557_v3 }
  0x1c   : > { %426 = vmatpush.bf16.msra.mxu3 %v592_v50  ;;  %v533_v10 = vld [vmem:[%s935_s1 + $0x30] sm:$0xf0]  ;;  %v539_v12 = vld [vmem:[%s935_s1 + $0x28] sm:$0xf]  ;;  %v653_v13 = vld [vmem:[%s935_s1 + $0x34] sm:$0xf0]  ;;  %v532_v16 = vor.u32 %v652_v8, %v531_v5 }
  0x1d   : > { %v651_v14 = vld [vmem:[%s935_s1 + $0x2c] sm:$0xf]  ;;  %v541_v15 = vld [vmem:[%s935_s1 + $0x38] sm:$0xf0]  ;;  %v515_v17 = vld [vmem:[%s935_s1] sm:$0xf]  ;;  %v536_v18 = vor.u32 %v650_v9, %v533_v10  ;;  %v540_v19 = vor.u32 %v653_v13, %v539_v12 }
  0x1e   : > { %385 = vmatpush.bf16.msra.mxu0 %v564_v56  ;;  %s939_s13 = smov (!%p161_p3, %s500_s13), 1  ;;  %v648_v20 = vld [vmem:[%s935_s1 + $0xc] sm:$0xf0]  ;;  %v646_v21 = vld [vmem:[%s935_s1 + $0x4] sm:$0xf]  ;;  %v544_v23 = vor.u32 %v651_v14, %v541_v15 }
  0x1f   : > { %399 = vmatpush.bf16.msra.mxu1 %v568_v57  ;;  %413 = vmatpush.bf16.msra.mxu2 %v572_v58  ;;  %v517_v22 = vld [vmem:[%s935_s1 + $0x10] sm:$0xf0]  ;;  %v523_v24 = vld [vmem:[%s935_s1 + $0x8] sm:$0xf]  ;;  %v649_v25 = vld [vmem:[%s935_s1 + $0x14] sm:$0xf0]  ;;  %v516_v28 = vor.u32 %v648_v20, %v515_v17 }
  0x20   : > { %427 = vmatpush.bf16.msra.mxu3 %v576_v62  ;;  %s643_s11 = sshll.u32 %s939_s13, 3  ;;  %v647_v26 = vld [vmem:[%s935_s1 + $0xc] sm:$0xf]  ;;  %v525_v27 = vld [vmem:[%s935_s1 + $0x18] sm:$0xf0]  ;;  %v520_v29 = vor.u32 %v646_v21, %v517_v22  ;;  %v524_v30 = vor.u32 %v649_v25, %v523_v24  ;;  %s644_s23 = sshll.u32 %s939_s13, 5 }
  0x21   : > { %s165_s20 = scalar_lea.vmem %s934_s0, %s643_s11  ;;  %v528_v31 = vor.u32 %v647_v26, %v525_v27  ;;  %v205_v33 = vld [vmem:[%s936_s2] sm:$0xf]  ;;  %s170_s26 = scalar_lea.vmem %s937_s3, %s644_s23 }
  0x22   : > { %386 = vmatpush.bf16.msra.mxu0 %v548_v4  ;;  %v645_v32 = vld [vmem:[%s165_s20] sm:$0xff]  ;;  %v207_v34 = vperm.slane %v205_v33, 0  ;;  %v208_v35 = vperm.slane %v205_v33, 1  ;;  %v209_v41 = vperm.slane %v205_v33, 2  ;;  %v210_v42 = vperm.slane %v205_v33, 3 }
  0x23   : > { %400 = vmatpush.bf16.msra.mxu1 %v552_v6  ;;  %414 = vmatpush.bf16.msra.mxu2 %v556_v7 }
  0x24   : > { %428 = vmatpush.bf16.msra.mxu3 %v560_v11 }
  0x26   : > { %387 = vmatpush.bf16.msra.mxu0 %v532_v16 }
  0x27   : > { %401 = vmatpush.bf16.msra.mxu1 %v536_v18  ;;  %415 = vmatpush.bf16.msra.mxu2 %v540_v19 }
  0x28   : > { %429 = vmatpush.bf16.msra.mxu3 %v544_v23 }
  0x2a   : > { %388 = vmatpush.bf16.msra.mxu0 %v516_v28 }
  0x2b   : > { %402 = vmatpush.bf16.msra.mxu1 %v520_v29  ;;  %416 = vmatpush.bf16.msra.mxu2 %v524_v30 }
  0x2c   : > { %430 = vmatpush.bf16.msra.mxu3 %v528_v31 }
  0x2d   : > { %389 = vmatmul.bf16.vlgmr.msra.gmra.mxu0 %v645_v32 }
  0x2e   : > { %403 = vmatmul.bf16.vlgmr.msra.gmra.mxu1 %v645_v32  ;;  %417 = vmatmul.bf16.vlgmr.msra.gmra.mxu2 %v645_v32 }
  0x2f   : > { %431 = vmatmul.bf16.vlgmr.msra.gmra.mxu3 %v645_v32 }
  0xaa   : > { %v390_v36 = vpop.f32.mrf.mxu0 }
  0xab   : > { %v391_v37 = vadd.f32 %v390_v36, %v207_v34  ;;  %v404_v38 = vpop.f32.mrf.mxu1 }
  0xac   : > { %v405_v39 = vadd.f32 %v404_v38, %v208_v35 }
  0xae   : > { %v437_v40 = vpack.c.bf16 %v405_v39, %v391_v37 }
  0xb0   : > { %441 = vst [vmem:[%s170_s26] sm:$0xff] %v437_v40 }
  0xb1   : > { %v418_v43 = vpop.f32.mrf.mxu2 }
  0xb2   : > { %v419_v44 = vadd.f32 %v418_v43, %v209_v41  ;;  %v432_v45 = vpop.f32.mrf.mxu3  ;;  %v392_v46 = vpop.f32.mrf.mxu0 }
  0xb3   : > { %v433_v47 = vadd.f32 %v432_v45, %v210_v42  ;;  %v393_v48 = vadd.f32 %v392_v46, %v207_v34  ;;  %v406_v49 = vpop.f32.mrf.mxu1 }
  0xb4   : > { %v407_v50 = vadd.f32 %v406_v49, %v208_v35 }
  0xb5   : > { %v438_v51 = vpack.c.bf16 %v433_v47, %v419_v44 }
  0xb6   : > { %v439_v52 = vpack.c.bf16 %v407_v50, %v393_v48 }
  0xb7   : > { %442 = vst [vmem:[%s170_s26 + $0x8] sm:$0xff] %v438_v51 }
  0xb8   : > { %443 = vst [vmem:[%s170_s26 + $0x10] sm:$0xff] %v439_v52 }
  0xb9   : > { %v420_v53 = vpop.f32.mrf.mxu2 }
  0xba   : > { %v421_v54 = vadd.f32 %v420_v53, %v209_v41  ;;  %v434_v55 = vpop.f32.mrf.mxu3 }
  0xbb   : > { %v435_v56 = vadd.f32 %v434_v55, %v210_v42 }
  0xbd   : > { %v440_v57 = vpack.c.bf16 %v435_v56, %v421_v54 }
  0xbf   : > { %444 = vst [vmem:[%s170_s26 + $0x18] sm:$0xff] %v440_v57 }
  0xc0 PF: > { %s13_s12 = sadd.s32 1, %s692_s12  }
  0xc1   : > { %p10_p4 = scmp.ge.s32.totalorder %s13_s12, 4  }
  0xc3   :  { %12 = sbr.rel (!%p10_p4) target bundleno = 1 (0x1), region = 62 }

// kernel: decoder_block_forward.6
= control target key start
LH: loop header
LB: loop body
LE: loop exit
PB: predicated region body
PF: predicated region fallthrough
CT: control target
= control target key end

     0   :  { %s1740_s24 = smov 0   ;;  %s2053_s0 = inlined_call_operand.vmem [shape: bf16[2,32,256], index: 0, kind: input, shape index: {}]   ;;  %s2054_s1 = inlined_call_operand.vmem [shape: f32[1,256], index: 1, kind: input, shape index: {}]   ;;  %s2055_s2 = inlined_call_operand.vmem [shape: f32[1,256], index: 2, kind: input, shape index: {}]   ;;  %s2056_s3 = inlined_call_operand.vmem [shape: bf16[3,272,128], index: 3, kind: input, shape index: {}]   ;;  %s2057_s4 = inlined_call_operand.vmem [shape: f32[1,128], index: 4, kind: input, shape index: {}]   ;;  %s2058_s5 = inlined_call_operand.vmem [shape: bf16[2,32,128], index: 5, kind: output, shape index: {0}]   ;;  %s2059_s6 = inlined_call_operand.vmem [shape: f32[2,1,128], index: 6, kind: output, shape index: {1}]   ;;  %s2060_s7 = inlined_call_operand.vmem [shape: f32[2,1,128], index: 7, kind: output, shape index: {2}]  }
   0x1 LB: > { %s1311_s1 = sadd.s32 4294967295, %s1696_s24   ;;  %p1315_p0 = scmp.ge.s32.totalorder %s1696_s24, 1  ;;  %s1696_s24 = sphi %s1740_s24, %s18_s24  }
   0x2   : > { %p242_p1 = scmp.lt.s32.totalorder %s1696_s24, 3 }
   0x4   : > { %p243_p2 = pnand %p1315_p0, %p242_p1 }
   0x5   : > { %p280_p3 = scmp.lt.s32.totalorder (!%p243_p2), %s1311_s1, 1  ;;  %s1699_s13 = smov (!%p243_p2), 8  }
   0x6   : > { %246 = sbr.rel (%p243_p2) target bundleno = 408 (0x198), region = 40 }
   0xb   : > { %v1624_v0 = vld [vmem:[%s2056_s3 + $0x38] sm:$0xff]  ;;  %vm302_vm0 = vcmask 125952   ;;  %s2072_s1 = smov (!%p280_p3, %s1311_s1), 1  ;;  %v1641_v1 = vld [vmem:[%s2056_s3 + $0xc0] sm:$0xff]  ;;  %v1698_v3 = vmov 0   ;;  %v1623_v4 = vld [vmem:[%s2056_s3 + $0x30] sm:$0xff] }
   0xc   : > { %v1649_v2 = vld [vmem:[%s2056_s3 + $0x100] sm:$0xff]  ;;  %303 = vst.msk [vmem:[#allocation2 + $0x8] sm:$0xf] %vm302_vm0, %v1698_v3  ;;  %875 = vmatpush.bf16.msra.mxu3 %v1624_v0  ;;  %s1612_s9 = sshll.u32 %s2072_s1, 5  ;;  %708 = vmatpush.bf16.msra.mxu0 %v1641_v1  ;;  %vm313_vm1 = vsmask.f32 256  ;;  %s292_s2 = scalar_lea.vmem %s2059_s6, %s2072_s1 }
   0xd   : > { %304 = vst [vmem:[#allocation2 + $0xc] sm:$0xff] %v1698_v3  ;;  %727 = vmatpush.bf16.msra.mxu1 %v1649_v2  ;;  %s284_s12 = scalar_lea.vmem %s2053_s0, %s1612_s9  ;;  %vm314_vm2 = vsmask.f32 4368  ;;  %v1622_v33 = vld [vmem:[%s2056_s3 + $0x28] sm:$0xff]  ;;  %vm311_vm4 = vcmask 122880   ;;  %v1640_v34 = vld [vmem:[%s2056_s3 + $0xb8] sm:$0xff]  ;;  %s295_s27 = scalar_lea.vmem %s2060_s7, %s2072_s1 }
   0xe   : > { %305 = vst.msk [vmem:[#allocation2 + $0x14] sm:$0xf] %vm302_vm0, %v1698_v3  ;;  %v297_v5 = vld [vmem:[%s284_s12] sm:$0xff]  ;;  %v298_v6 = vld [vmem:[%s284_s12 + $0x8] sm:$0xff]  ;;  %v299_v7 = vld [vmem:[%s284_s12 + $0x10] sm:$0xff]  ;;  %vm407_vm5 = vcmask 1040448  }
   0xf   : > { %306 = vst [vmem:[#allocation2 + $0x18] sm:$0xff] %v1698_v3  ;;  %v317_v8 = vshrl.u32 %v297_v5, 16  ;;  %v320_v9 = vshll.u32 %v297_v5, 16  ;;  %v325_v10 = vshrl.u32 %v298_v6, 16  ;;  %v334_v11 = vshrl.u32 %v299_v7, 16  ;;  %v300_v12 = vld [vmem:[%s284_s12 + $0x18] sm:$0xff]  ;;  %vm1772_vm3 = vmor %vm313_vm1, %vm314_vm2 }
  0x10   : > { %307 = vst.msk [vmem:[#allocation2 + $0x20] sm:$0xf] %vm302_vm0, %v1698_v3  ;;  %876 = vmatpush.bf16.msra.mxu3 %v1623_v4  ;;  %v337_v13 = vshll.u32 %v299_v7, 16  ;;  %v343_v14 = vshrl.u32 %v300_v12, 16  ;;  %v328_v19 = vshll.u32 %v298_v6, 16  ;;  %v346_v24 = vshll.u32 %v300_v12, 16  ;;  %709 = vmatpush.bf16.msra.mxu0 %v1640_v34  ;;  %vm1801_vm8 = vmand %vm407_vm5, %vm313_vm1 }
  0x11   : > { %308 = vst [vmem:[#allocation2 + $0x24] sm:$0xff] %v1698_v3  ;;  %v319_v15 = vrot.slane %v317_v8, 7  ;;  %v327_v16 = vrot.slane %v325_v10, 7  ;;  %v336_v17 = vrot.slane %v334_v11, 7  ;;  %v1648_v35 = vld [vmem:[%s2056_s3 + $0xf8] sm:$0xff]  ;;  %v1621_v36 = vld [vmem:[%s2056_s3 + $0x20] sm:$0xff] }
  0x12   : > { %309 = vst.msk [vmem:[#allocation2 + $0x2c] sm:$0xf] %vm302_vm0, %v1698_v3  ;;  %v345_v20 = vrot.slane %v343_v14, 7  ;;  %728 = vmatpush.bf16.msra.mxu1 %v1648_v35  ;;  %v1639_v37 = vld [vmem:[%s2056_s3 + $0xb0] sm:$0xff]  ;;  %vm409_vm6 = vcmask 1044484   ;;  %vm416_vm9 = vcmask 57344  }
  0x13   : > { %310 = vst [vmem:[#allocation2 + $0x30] sm:$0x11] %v1698_v3  ;;  %v322_v21 = vor.u32 %v320_v9, %v319_v15  ;;  %v332_v22 = vrot.slane %v327_v16, 4  ;;  %v339_v23 = vor.u32 %v337_v13, %v336_v17  ;;  %v323_v27 = vrot.slane %v319_v15, 4  ;;  %v1647_v38 = vld [vmem:[%s2056_s3 + $0xf0] sm:$0xff]  ;;  %v1620_v40 = vld [vmem:[%s2056_s3 + $0x18] sm:$0xff]  ;;  %vm417_vm13 = vmand %vm416_vm9, %vm313_vm1 }
  0x14   : > { %v350_v25 = vrot.slane %v345_v20, 4  ;;  %v330_v28 = vor.u32 %v328_v19, %v327_v16  ;;  %v341_v29 = vrot.slane %v336_v17, 4  ;;  %v348_v30 = vor.u32 %v346_v24, %v345_v20  ;;  %877 = vmatpush.bf16.msra.mxu3 %v1622_v33  ;;  %312 = vst.msk [vmem:[#allocation2 + $0x38] sm:$0x1] %vm311_vm4, %v1698_v3  ;;  %710 = vmatpush.bf16.msra.mxu0 %v1639_v37  ;;  %v1638_v47 = vld [vmem:[%s2056_s3 + $0xa8] sm:$0xff]  ;;  %v1619_v50 = vld [vmem:[%s2056_s3 + $0x10] sm:$0xff] }
  0x15   : > { %351 = vrot.lane.b32.xlu0 %v322_v21, %s1699_s13  ;;  %v340_v26 = vsel %vm1772_vm3, %v332_v22, %v339_v23  ;;  %vm410_vm7 = vsmask.f32 4352  ;;  %vm366_vm12 = vcmask 64512   ;;  %v1646_v48 = vld [vmem:[%s2056_s3 + $0xe8] sm:$0xff]  ;;  %v1637_v51 = vld [vmem:[%s2056_s3 + $0xa0] sm:$0xff]  ;;  %v1636_v54 = vld [vmem:[%s2056_s3 + $0x98] sm:$0xff] }
  0x16   : > { %355 = vrot.lane.b32.xlu1 %v340_v26, %s1699_s13  ;;  %359 = vrot.lane.b32.xlu2 %v350_v25, %s1699_s13  ;;  %v331_v31 = vsel %vm1772_vm3, %v323_v27, %v330_v28  ;;  %v349_v32 = vsel %vm1772_vm3, %v341_v29, %v348_v30  ;;  %vm411_vm10 = vmand %vm409_vm6, %vm410_vm7  ;;  %v1645_v52 = vld [vmem:[%s2056_s3 + $0xe0] sm:$0xff]  ;;  %v1618_v53 = vld [vmem:[%s2056_s3 + $0x8] sm:$0xff]  ;;  %vm382_vm14 = vcmask 1043520   ;;  %vm383_vm15 = vsmask.f32 7938  ;;  %s1613_s18 = sshll.u32 %s2072_s1, 4 }
  0x17   : > { %729 = vmatpush.bf16.msra.mxu1 %v1647_v38  ;;  %vm412_vm11 = vmor %vm411_vm10, %vm1801_vm8  ;;  %v1644_v55 = vld [vmem:[%s2056_s3 + $0xd8] sm:$0xff]  ;;  %v1617_v56 = vld [vmem:[%s2056_s3] sm:$0xff]  ;;  %vm385_vm0 = vcmask 1047556   ;;  %vm386_vm1 = vsmask.f32 7954  ;;  %vm392_vm2 = vcmask 60416   ;;  %s2038_s21 = scalar_lea.vmem %s2058_s5, %s1613_s18 }
  0x18   : > { %878 = vmatpush.bf16.msra.mxu3 %v1621_v36  ;;  %711 = vmatpush.bf16.msra.mxu0 %v1638_v47  ;;  %v1635_v57 = vld [vmem:[%s2056_s3 + $0x90] sm:$0xff]  ;;  %v1666_v59 = vld [vmem:[%s2056_s3 + $0x188] sm:$0xff]  ;;  %v1665_v63 = vld [vmem:[%s2056_s3 + $0x180] sm:$0xff]  ;;  %vm534_vm8 = vsmask.f32 7424  ;;  %vm701_vm9 = vcmask 130048  }
  0x19   : > { %v1643_v58 = vld [vmem:[%s2056_s3 + $0xd0] sm:$0xff]  ;;  %v1650_v60 = vld [vmem:[%s2056_s3 + $0x108] sm:$0xff]  ;;  %vm1862_vm3 = vmand %vm382_vm14, %vm383_vm15  ;;  %vm977_vm10 = vcmask 1046528  }
  0x1a   : > { %v413_v43 = vld [vmem:[#allocation2 + $0x30] sm:$0x11]  ;;  %v1634_v61 = vld [vmem:[%s2056_s3 + $0x88] sm:$0xff]  ;;  %753 = vmatpush.bf16.msra.mxu2 %v1650_v60  ;;  %vm1867_vm4 = vmand %vm385_vm0, %vm386_vm1 }
  0x1b   : > { %v418_v41 = vld [vmem:[#allocation2 + $0x38] sm:$0x1]  ;;  %730 = vmatpush.bf16.msra.mxu1 %v1646_v48  ;;  %v1642_v62 = vld [vmem:[%s2056_s3 + $0xc8] sm:$0xff]  ;;  %vm393_vm5 = vmand %vm392_vm2, %vm383_vm15 }
  0x1c   : > { %879 = vmatpush.bf16.msra.mxu3 %v1620_v40  ;;  %712 = vmatpush.bf16.msra.mxu0 %v1637_v51  ;;  %v1632_v2 = vld [vmem:[%s2056_s3 + $0x78] sm:$0xff]  ;;  %v394_v3 = vld [vmem:[#allocation2 + $0x8] sm:$0xf]  ;;  %v1631_v7 = vld [vmem:[%s2056_s3 + $0x70] sm:$0xff] }
  0x1d   : > { %353 = vrot.lane.b32.xlu0 %v331_v31, %s1699_s13  ;;  %v1658_v5 = vld [vmem:[%s2056_s3 + $0x148] sm:$0xff]  ;;  %v1664_v6 = vld [vmem:[%s2056_s3 + $0x178] sm:$0xff]  ;;  %vm388_vm6 = vmor %vm1867_vm4, %vm1862_vm3 }
  0x1e   : > { %357 = vrot.lane.b32.xlu1 %v349_v32, %s1699_s13  ;;  %894 = vmatpush.bf16.msrb.mxu2 %v1632_v2  ;;  %v1657_v11 = vld [vmem:[%s2056_s3 + $0x140] sm:$0xff]  ;;  %vm1895_vm7 = vmor %vm385_vm0, %vm382_vm14  ;;  %v1663_v15 = vld [vmem:[%s2056_s3 + $0x170] sm:$0xff] }
  0x1f   : > { %731 = vmatpush.bf16.msra.mxu1 %v1645_v52  ;;  %v1630_v18 = vld [vmem:[%s2056_s3 + $0x68] sm:$0xff]  ;;  %v1656_v20 = vld [vmem:[%s2056_s3 + $0x138] sm:$0xff]  ;;  %v1629_v22 = vld [vmem:[%s2056_s3 + $0x60] sm:$0xff] }
  0x20   : > { %880 = vmatpush.bf16.msra.mxu3 %v1619_v50  ;;  %713 = vmatpush.bf16.msra.mxu0 %v1636_v54  ;;  %v1662_v21 = vld [vmem:[%s2056_s3 + $0x168] sm:$0xff]  ;;  %v1655_v26 = vld [vmem:[%s2056_s3 + $0x130] sm:$0xff]  ;;  %v1661_v28 = vld [vmem:[%s2056_s3 + $0x160] sm:$0xff] }
  0x21   : > { %v1628_v30 = vld [vmem:[%s2056_s3 + $0x58] sm:$0xff]  ;;  %v1654_v33 = vld [vmem:[%s2056_s3 + $0x128] sm:$0xff]  ;;  %v1627_v35 = vld [vmem:[%s2056_s3 + $0x50] sm:$0xff] }
  0x22   : > { %895 = vmatpush.bf16.msrb.mxu2 %v1631_v7  ;;  %v1660_v34 = vld [vmem:[%s2056_s3 + $0x158] sm:$0xff]  ;;  %v1653_v38 = vld [vmem:[%s2056_s3 + $0x120] sm:$0xff]  ;;  %v1626_v51 = vld [vmem:[%s2056_s3 + $0x48] sm:$0xff] }
  0x23   : > { %732 = vmatpush.bf16.msra.mxu1 %v1644_v55  ;;  %v1652_v60 = vld [vmem:[%s2056_s3 + $0x118] sm:$0xff] }
  0x24   : > { %881 = vmatpush.bf16.msra.mxu3 %v1618_v53  ;;  %714 = vmatpush.bf16.msra.mxu0 %v1635_v57 }
  0x26   : > { %896 = vmatpush.bf16.msrb.mxu2 %v1630_v18 }
  0x27   : > { %733 = vmatpush.bf16.msra.mxu1 %v1643_v58 }
  0x28   : > { %882 = vmatpush.bf16.msra.mxu3 %v1617_v56  ;;  %715 = vmatpush.bf16.msra.mxu0 %v1634_v61 }
  0x2a   : > { %897 = vmatpush.bf16.msrb.mxu2 %v1629_v22 }
  0x2b   : > { %734 = vmatpush.bf16.msra.mxu1 %v1642_v62 }
  0x2c   : > { %1124 = vmatpush.bf16.msrb.mxu3 %v1666_v59 }
  0x2e   : > { %898 = vmatpush.bf16.msrb.mxu2 %v1628_v30 }
  0x2f   : > { %1105 = vmatpush.bf16.msrb.mxu1 %v1658_v5 }
  0x30   : > { %1125 = vmatpush.bf16.msrb.mxu3 %v1665_v63 }
  0x32   : > { %899 = vmatpush.bf16.msrb.mxu2 %v1627_v35 }
  0x33   : > { %1106 = vmatpush.bf16.msrb.mxu1 %v1657_v11 }
  0x34   : > { %1126 = vmatpush.bf16.msrb.mxu3 %v1664_v6 }
  0x36   : > { %900 = vmatpush.bf16.msrb.mxu2 %v1626_v51 }
  0x37   : > { %1107 = vmatpush.bf16.msrb.mxu1 %v1656_v20 }
  0x38   : > { %1127 = vmatpush.bf16.msrb.mxu3 %v1663_v15 }
  0x3b   : > { %1108 = vmatpush.bf16.msrb.mxu1 %v1655_v26 }
  0x3c   : > { %1128 = vmatpush.bf16.msrb.mxu3 %v1662_v21 }
  0x3f   : > { %1109 = vmatpush.bf16.msrb.mxu1 %v1654_v33 }
  0x40   : > { %1129 = vmatpush.bf16.msrb.mxu3 %v1661_v28 }
  0x43   : > { %1110 = vmatpush.bf16.msrb.mxu1 %v1653_v38 }
  0x44   : > { %1130 = vmatpush.bf16.msrb.mxu3 %v1660_v34 }
  0x47   : > { %1111 = vmatpush.bf16.msrb.mxu1 %v1652_v60 }
  0x70   : > { %v360_v42 = vpop.permute.xlu2 %359 }
  0x71   : > { %v365_v44 = vrot.slane %v360_v42, 4 }
  0x73   : > { %v371_v45 = vsel %vm366_vm12, %v365_v44, %v360_v42  ;;  %v419_v46 = vsel %vm417_vm13, %v365_v44, %v418_v41  ;;  %v1659_v44 = vld [vmem:[%s2056_s3 + $0x150] sm:$0xff] }
  0x74   : > { %v414_v49 = vsel %vm412_vm11, %v371_v45, %v413_v43  ;;  %420 = vst [vmem:[#allocation2 + $0x38] sm:$0x1] %v419_v46  ;;  %1131 = vmatpush.bf16.msrb.mxu3 %v1659_v44 }
  0x75   : > { %415 = vst [vmem:[#allocation2 + $0x30] sm:$0x11] %v414_v49 }
  0x7b   : > { %v464_v32 = vld [vmem:[#allocation2 + $0x38] sm:$0x1] }
  0x7c   : > { %v524_v43 = vunpack.c.l.b16 %v464_v32 }
  0x7e   : > { %v533_v2 = vpack.c.b16 %v524_v43, %v524_v43 }
  0x80   : > { %v991_v26 = vrot.slane %v533_v2, 1  ;;  %v591_v35 = vshll.u32 %v533_v2, 16 }
  0x82   : > { %v593_v43 = vrot.slane %v591_v35, 1 }
  0x87   : > { %v352_v4 = vpop.permute.xlu0 %351 }
  0x88   : > { %v361_v8 = vrot.slane %v352_v4, 4  ;;  %v356_v9 = vpop.permute.xlu1 %355 }
  0x89   : > { %v363_v10 = vrot.slane %v356_v9, 4 }
  0x8a   : > { %v367_v12 = vsel %vm366_vm12, %v361_v8, %v352_v4  ;;  %v395_v13 = vsel %vm393_vm5, %v361_v8, %v394_v3  ;;  %v1625_v3 = vld [vmem:[%s2056_s3 + $0x40] sm:$0xff] }
  0x8b   : > { %v1902_v16 = vsel %vm388_vm6, %v367_v12, 0  ;;  %396 = vst [vmem:[#allocation2 + $0x8] sm:$0xf] %v395_v13  ;;  %v369_v17 = vsel %vm366_vm12, %v363_v10, %v356_v9  ;;  %v1633_v4 = vld [vmem:[%s2056_s3 + $0x80] sm:$0xff]  ;;  %901 = vmatpush.bf16.msrb.mxu2 %v1625_v3 }
  0x8c   : > { %391 = vst [vmem:[#allocation2] sm:$0xff] %v1902_v16  ;;  %v510_v45 = vunpack.c.l.b16 %v1902_v16  ;;  %v511_v46 = vunpack.c.h.b16 %v1902_v16  ;;  %920 = vmatpush.bf16.msrb.mxu0 %v1633_v4  ;;  %v1651_v16 = vld [vmem:[%s2056_s3 + $0x110] sm:$0xff] }
  0x8d   : > { %403 = vst.msk [vmem:[#allocation2 + $0x18] sm:$0xff] %vm1895_vm7, %v369_v17  ;;  %1112 = vmatpush.bf16.msrb.mxu1 %v1651_v16 }
  0x8e   : > { %404 = vst.msk [vmem:[#allocation2 + $0x20] sm:$0xf] %vm392_vm2, %v363_v10 }
  0x8f   : > { %v354_v19 = vpop.permute.xlu0 %353 }
  0x90   : > { %v362_v23 = vrot.slane %v354_v19, 4  ;;  %v358_v24 = vpop.permute.xlu1 %357 }
  0x91   : > { %v364_v25 = vrot.slane %v358_v24, 4 }
  0x92   : > { %v368_v27 = vsel %vm366_vm12, %v362_v23, %v354_v19  ;;  %402 = vst.msk [vmem:[#allocation2 + $0x14] sm:$0xf] %vm392_vm2, %v362_v23  ;;  %v422_v31 = vld [vmem:[#allocation2 + $0x8] sm:$0xf]  ;;  %v463_v23 = vld [vmem:[#allocation2 + $0x30] sm:$0x11] }
  0x93   : > { %400 = vst.msk [vmem:[#allocation2 + $0xc] sm:$0xff] %vm1895_vm7, %v368_v27  ;;  %v370_v29 = vsel %vm366_vm12, %v364_v25, %v358_v24  ;;  %v512_v40 = vunpack.c.l.b16 %v422_v31  ;;  %v933_v62 = vld [vmem:[#allocation2 + $0x8] sm:$0xe]  ;;  %v522_v28 = vunpack.c.l.b16 %v463_v23  ;;  %v523_v31 = vunpack.c.h.b16 %v463_v23 }
  0x94   : > { %405 = vst.msk [vmem:[#allocation2 + $0x24] sm:$0xff] %vm1895_vm7, %v370_v29  ;;  %v1356_v37 = vld [vmem:[#allocation2 + $0x18] sm:$0xf]  ;;  %v1614_v42 = vld [vmem:[#allocation2 + $0x1c] sm:$0xf]  ;;  %v973_v11 = vunpack.c.l.b16 %v933_v62 }
  0x95   : > { %406 = vst.msk [vmem:[#allocation2 + $0x2c] sm:$0xf] %vm392_vm2, %v364_v25  ;;  %v1364_v52 = vld [vmem:[#allocation2 + $0x20] sm:$0xf]  ;;  %v1667_v25 = vld [vmem:[%s2056_s3 + $0x190] sm:$0xff]  ;;  %v531_v34 = vpack.c.b16 %v522_v28, %v522_v28 }
  0x99   : > { %v424_v36 = vld [vmem:[#allocation2 + $0x14] sm:$0xf] }
  0x9a   : > { %v1950_v39 = vld [vmem:[#allocation2 + $0xc] sm:$0xff]  ;;  %v515_v41 = vunpack.c.l.b16 %v424_v36  ;;  %v532_v36 = vpack.c.b16 %v523_v31, %v523_v31 }
  0x9b   : > { %v513_v47 = vunpack.c.l.b16 %v1950_v39  ;;  %v514_v48 = vunpack.c.h.b16 %v1950_v39  ;;  %v1615_v49 = vld [vmem:[#allocation2 + $0x20] sm:$0xf0]  ;;  %v1358_v50 = vld [vmem:[#allocation2 + $0x24] sm:$0xf0] }
  0x9c   : > { %v1616_v53 = vld [vmem:[#allocation2 + $0x28] sm:$0xf0]  ;;  %v1962_v54 = vpack.c.b16 %v515_v41, %v512_v40  ;;  %v1964_v55 = vor.u32 %v1615_v49, %v1356_v37  ;;  %v1966_v56 = vor.u32 %v1614_v42, %v1358_v50  ;;  %v976_v19 = vpack.c.b16 %v515_v41, %v973_v11  ;;  %v932_v49 = vld [vmem:[#allocation2] sm:$0xee] }
  0x9d   : > { %v525_v57 = vpack.c.b16 %v513_v47, %v510_v45  ;;  %v1972_v58 = vpack.c.b16 %v514_v48, %v511_v46  ;;  %v1974_v59 = vor.u32 %v1616_v53, %v1364_v52  ;;  %v575_v37 = vshll.u32 %v531_v34, 16 }
  0x9e   : > { %v562_v61 = vshll.u32 %v1962_v54, 16  ;;  %v543_v1 = vshll.u32 %v1964_v55, 16  ;;  %v560_v5 = vshrl.u32 %v1962_v54, 16  ;;  %v555_v8 = vshll.u32 %v1966_v56, 16 }
  0x9f   : > { %883 = vmatmul.bf16.vlgmr.msra.gmra.mxu3 %v525_v57  ;;  %v567_v63 = vshll.u32 %v1974_v59, 16  ;;  %v538_v0 = vshll.u32 %v525_v57, 16  ;;  %v550_v7 = vshll.u32 %v1972_v58, 16  ;;  %v536_v9 = vshrl.u32 %v525_v57, 16 }
  0xa0   : > { %v564_v6 = vrot.slane %v562_v61, 1  ;;  %v548_v14 = vshrl.u32 %v1972_v58, 16  ;;  %v545_v18 = vrot.slane %v543_v1, 1  ;;  %v557_v22 = vrot.slane %v555_v8, 1 }
  0xa1   : > { %v540_v10 = vrot.slane %v538_v0, 1  ;;  %v569_v13 = vrot.slane %v567_v63, 1  ;;  %v552_v15 = vrot.slane %v550_v7, 1  ;;  %v984_v29 = vrot.slane %v976_v19, 1 }
  0xa2   : > { %v565_v12 = vor.u32 %v564_v6, %v560_v5  ;;  %v985_v30 = vrot.slane %v1974_v59, 1  ;;  %v587_v38 = vshrl.u32 %v1974_v59, 16  ;;  %v583_v40 = vshll.u32 %v532_v36, 16 }
  0xa3   : > { %v541_v17 = vor.u32 %v540_v10, %v536_v9  ;;  %v553_v21 = vor.u32 %v552_v15, %v548_v14  ;;  %v571_v41 = vshrl.u32 %v1964_v55, 16  ;;  %v579_v44 = vshrl.u32 %v1966_v56, 16 }
  0xa4   : > { %v570_v20 = vsel %vm534_vm8, %v565_v12, %v569_v13  ;;  %v986_v32 = vsel %vm977_vm10, %v984_v29, %v985_v30  ;;  %v992_v33 = vsel %vm977_vm10, %v985_v30, %v991_v26  ;;  %v589_v42 = vor.u32 %v587_v38, %v569_v13 }
  0xa5   : > { %1434 = vmatmul.msk.bf16.vlgmr.msra.gmra.mxu2 %vm701_vm9, %v570_v20  ;;  %v546_v24 = vsel %vm534_vm8, %v541_v17, %v545_v18  ;;  %v558_v27 = vsel %vm534_vm8, %v553_v21, %v557_v22  ;;  %v573_v45 = vor.u32 %v571_v41, %v545_v18  ;;  %v577_v46 = vrot.slane %v575_v37, 1 }
  0xa6   : > { %716 = vmatmul.bf16.vlgmr.msra.gmra.mxu0 %v546_v24  ;;  %735 = vmatmul.bf16.vlgmr.msra.gmra.mxu1 %v558_v27  ;;  %v581_v50 = vor.u32 %v579_v44, %v557_v22  ;;  %v585_v51 = vrot.slane %v583_v40, 1  ;;  %v594_v52 = vsel %vm534_vm8, %v589_v42, %v593_v43  ;;  %v972_v53 = vunpack.c.h.b16 %v932_v49 }
  0xa7   : > { %1150 = vmatpush.bf16.msra.mxu2 %v1667_v25  ;;  %v578_v57 = vsel %vm534_vm8, %v573_v45, %v577_v46  ;;  %v982_v63 = vrot.slane %v1966_v56, 1  ;;  %v971_v0 = vunpack.c.l.b16 %v932_v49  ;;  %v979_v4 = vrot.slane %v1964_v55, 1  ;;  %v1689_v49 = vld [vmem:[%s2057_s4] ss:$0 sm:$0xff] }
  0xa8   : > { %v586_v60 = vsel %vm534_vm8, %v581_v50, %v585_v51  ;;  %v975_v61 = vpack.c.b16 %v514_v48, %v972_v53  ;;  %v989_v5 = vrot.slane %v532_v36, 1  ;;  %v987_v7 = vrot.slane %v531_v34, 1 }
  0xa9   : > { %v974_v2 = vpack.c.b16 %v513_v47, %v971_v0 }
  0xaa   : > { %v981_v62 = vrot.slane %v975_v61, 1  ;;  %v990_v6 = vsel %vm977_vm10, %v982_v63, %v989_v5  ;;  %v988_v39 = vsel %vm977_vm10, %v979_v4, %v987_v7 }
  0xab   : > { %v978_v3 = vrot.slane %v974_v2, 1 }
  0xac   : > { %v983_v1 = vsel %vm977_vm10, %v981_v62, %v982_v63 }
  0xad   : > { %v980_v48 = vsel %vm977_vm10, %v978_v3, %v979_v4 }
  0xaf   : > { %888 = vmatmul.bf16.gmra.mxu3 %v1964_v55 }
  0xb5   : > { %1435 = vmatmul.msk.bf16.gmra.mxu2 %vm701_vm9, %v594_v52 }
  0xb6   : > { %721 = vmatmul.bf16.gmra.mxu0 %v578_v57  ;;  %740 = vmatmul.bf16.gmra.mxu1 %v586_v60 }
  0xbf   : > { %1132 = vmatmul.bf16.vlgmr.msrb.gmra.mxu3 %v983_v1 }
  0xc5   : > { %902 = vmatmul.bf16.vlgmr.msrb.gmra.mxu2 %v1972_v58 }
  0xc6   : > { %1504 = vmatmul.msk.bf16.vlgmr.msrb.gmra.mxu0 %vm701_vm9, %v1962_v54  ;;  %1113 = vmatmul.bf16.vlgmr.msrb.gmra.mxu1 %v980_v48 }
  0xcf   : > { %1137 = vmatmul.bf16.gmra.mxu3 %v990_v6 }
  0xd5   : > { %907 = vmatmul.bf16.gmra.mxu2 %v1966_v56 }
  0xd6   : > { %1505 = vmatmul.msk.bf16.gmra.mxu0 %vm701_vm9, %v1974_v59  ;;  %1118 = vmatmul.bf16.gmra.mxu1 %v988_v39 }
  0xe5   : > { %1608 = vmatmul.msk.bf16.vlgmr.msra.gmra.mxu2 %vm701_vm9, %v986_v32 }
  0xf5   : > { %1609 = vmatmul.msk.bf16.gmra.mxu2 %vm701_vm9, %v992_v33 }
 0x122   : > { %v884_v55 = vpop.f32.mrf.mxu3 }
 0x123   : > { %v736_v58 = vpop.f32.mrf.mxu1  ;;  %v717_v9 = vpop.f32.mrf.mxu0 }
 0x124   : > { %v737_v25 = vadd.f32 %v736_v58, %v717_v9 }
 0x128   : > { %v755_v47 = vpop.f32.mrf.mxu2 }
 0x129   : > { %v756_v26 = vadd.f32 %v755_v47, %v737_v25 }
 0x12a   : > { %v886_v10 = vpop.f32.mrf.mxu3 }
 0x12b   : > { %v738_v11 = vpop.f32.mrf.mxu1  ;;  %v719_v56 = vpop.f32.mrf.mxu0  ;;  %v885_v32 = vadd.f32 %v884_v55, %v756_v26 }
 0x12c   : > { %v739_v27 = vadd.f32 %v738_v11, %v719_v56 }
 0x130   : > { %v757_v54 = vpop.f32.mrf.mxu2 }
 0x131   : > { %v758_v28 = vadd.f32 %v757_v54, %v739_v27 }
 0x132   : > { %v889_v14 = vpop.f32.mrf.mxu3 }
 0x133   : > { %v741_v59 = vpop.f32.mrf.mxu1  ;;  %v722_v15 = vpop.f32.mrf.mxu0  ;;  %v887_v35 = vadd.f32 %v886_v10, %v758_v28 }
 0x134   : > { %v742_v37 = vadd.f32 %v741_v59, %v722_v15 }
 0x138   : > { %v760_v8 = vpop.f32.mrf.mxu2 }
 0x139   : > { %v761_v41 = vadd.f32 %v760_v8, %v742_v37 }
 0x13a   : > { %v891_v17 = vpop.f32.mrf.mxu3 }
 0x13b   : > { %v743_v18 = vpop.f32.mrf.mxu1  ;;  %v724_v19 = vpop.f32.mrf.mxu0  ;;  %v890_v53 = vadd.f32 %v889_v14, %v761_v41 }
 0x13c   : > { %v744_v60 = vadd.f32 %v743_v18, %v724_v19 }
 0x140   : > { %v762_v12 = vpop.f32.mrf.mxu2 }
 0x141   : > { %v763_v1 = vadd.f32 %v762_v12, %v744_v60 }
 0x142   : > { %v1133_v21 = vpop.f32.mrf.mxu3 }
 0x143   : > { %v1114_v22 = vpop.f32.mrf.mxu1  ;;  %v922_v24 = vpop.f32.mrf.mxu0  ;;  %v892_v6 = vadd.f32 %v891_v17, %v763_v1 }
 0x144   : > { %v1134_v33 = vadd.f32 %v1133_v21, %v1114_v22 }
 0x148   : > { %v903_v13 = vpop.f32.mrf.mxu2 }
 0x149   : > { %v904_v34 = vadd.f32 %v903_v13, %v885_v32 }
 0x14a   : > { %v1135_v29 = vpop.f32.mrf.mxu3 }
 0x14b   : > { %v1116_v30 = vpop.f32.mrf.mxu1  ;;  %v924_v36 = vpop.f32.mrf.mxu0  ;;  %v923_v42 = vadd.f32 %v922_v24, %v904_v34 }
 0x14c   : > { %v1136_v43 = vadd.f32 %v1135_v29, %v1116_v30 }
 0x150   : > { %v905_v16 = vpop.f32.mrf.mxu2 }
 0x151   : > { %v906_v38 = vadd.f32 %v905_v16, %v887_v35 }
 0x152   : > { %v1138_v51 = vpop.f32.mrf.mxu3 }
 0x153   : > { %v925_v45 = vadd.f32 %v924_v36, %v906_v38  ;;  %v1119_v52 = vpop.f32.mrf.mxu1  ;;  %v927_v0 = vpop.f32.mrf.mxu0 }
 0x154   : > { %v1139_v2 = vadd.f32 %v1138_v51, %v1119_v52 }
 0x158   : > { %v908_v20 = vpop.f32.mrf.mxu2 }
 0x159   : > { %v909_v61 = vadd.f32 %v908_v20, %v890_v53 }
 0x15a   : > { %v1140_v47 = vpop.f32.mrf.mxu3 }
 0x15b   : > { %v928_v48 = vadd.f32 %v927_v0, %v909_v61  ;;  %v1121_v54 = vpop.f32.mrf.mxu1  ;;  %v929_v13 = vpop.f32.mrf.mxu0 }
 0x15c   : > { %v1141_v10 = vadd.f32 %v1140_v47, %v1121_v54 }
 0x160   : > { %v910_v23 = vpop.f32.mrf.mxu2 }
 0x161   : > { %v911_v55 = vadd.f32 %v910_v23, %v892_v6 }
 0x163   : > { %v930_v59 = vadd.f32 %v929_v13, %v911_v55 }
 0x168   : > { %v1152_v31 = vpop.f32.mrf.mxu2 }
 0x169   : > { %v1153_v40 = vadd.f32 %v1152_v31, %v1134_v33 }
 0x16b   : > { %v1162_v46 = vadd.f32 %v1153_v40, %v923_v42 }
 0x16d   : > { %v1170_v62 = vadd.f32 %v1689_v49, %v1162_v46 }
 0x16f   : > { %v1192_v58 = vmul.f32 %v1170_v62, %v1170_v62 }
 0x170   : > { %v1154_v44 = vpop.f32.mrf.mxu2 }
 0x171   : > { %v1155_v50 = vadd.f32 %v1154_v44, %v1136_v43 }
 0x173   : > { %v1163_v57 = vadd.f32 %v1155_v50, %v925_v45 }
 0x175   : > { %v1171_v63 = vadd.f32 %v1689_v49, %v1163_v57 }
 0x177   : > { %v1671_v3 = vpack.c.bf16 %v1171_v63, %v1170_v62  ;;  %v1193_v7 = vmul.f32 %v1171_v63, %v1171_v63  ;;  %v1182_v8 = vadd.f32 %v1171_v63, %v1170_v62 }
 0x178   : > { %v1157_v4 = vpop.f32.mrf.mxu2 }
 0x179   : > { %1672 = vst [vmem:[%s2038_s21] sm:$0xff] %v1671_v3   ;;  %v1158_v5 = vadd.f32 %v1157_v4, %v1139_v2  ;;  %v1196_v11 = vadd.f32 %v1193_v7, %v1192_v58 }
 0x17b   : > { %v1164_v39 = vadd.f32 %v1158_v5, %v928_v48 }
 0x17d   : > { %v1172_v9 = vadd.f32 %v1689_v49, %v1164_v39 }
 0x17f   : > { %v1183_v56 = vadd.f32 %v1182_v8, %v1172_v9  ;;  %v1194_v12 = vmul.f32 %v1172_v9, %v1172_v9 }
 0x180   : > { %v1159_v14 = vpop.f32.mrf.mxu2 }
 0x181   : > { %v1197_v15 = vadd.f32 %v1196_v11, %v1194_v12  ;;  %v1160_v16 = vadd.f32 %v1159_v14, %v1141_v10 }
 0x183   : > { %v1165_v18 = vadd.f32 %v1160_v16, %v930_v59 }
 0x185   : > { %v1173_v17 = vadd.f32 %v1689_v49, %v1165_v18 }
 0x187   : > { %v1676_v19 = vpack.c.bf16 %v1173_v17, %v1172_v9  ;;  %v1184_v20 = vadd.f32 %v1183_v56, %v1173_v17  ;;  %v1195_v21 = vmul.f32 %v1173_v17, %v1173_v17 }
 0x189   : > { %1678 = vst [vmem:[%s2038_s21 + $0x8] sm:$0xff] %v1676_v19   ;;  %v1185_v22 = vrot.slane %v1184_v20, 4  ;;  %v1198_v23 = vadd.f32 %v1197_v15, %v1195_v21 }
 0x18b   : > { %v1186_v24 = vadd.f32 %v1185_v22, %v1184_v20  ;;  %v1199_v25 = vrot.slane %v1198_v23, 4 }
 0x18d   : > { %v1187_v26 = vrot.slane %v1186_v24, 2  ;;  %v1200_v27 = vadd.f32 %v1199_v25, %v1198_v23 }
 0x18f   : > { %v1188_v28 = vadd.f32 %v1187_v26, %v1186_v24  ;;  %v1201_v29 = vrot.slane %v1200_v27, 2 }
 0x191   : > { %v1189_v30 = vrot.slane %v1188_v28, 1  ;;  %v1202_v31 = vadd.f32 %v1201_v29, %v1200_v27 }
 0x193   : > { %v1190_v32 = vadd.f32 %v1189_v30, %v1188_v28  ;;  %v1203_v33 = vrot.slane %v1202_v31, 1 }
 0x195   : > { %1191 = vst [vmem:[%s292_s2] sm:$0x1] %v1190_v32  ;;  %v1204_v34 = vadd.f32 %v1203_v33, %v1202_v31 }
 0x197   : > { %1205 = vst [vmem:[%s295_s27] sm:$0x1] %v1204_v34 }
 0x198 PF: > { %s18_s24 = sadd.s32 1, %s1696_s24  }
 0x199   : > { %p15_p4 = scmp.ge.s32.totalorder %s18_s24, 4  }
 0x19b   :  { %17 = sbr.rel (!%p15_p4) target bundleno = 1 (0x1), region = 96 }

// kernel: decoder_block_forward.7
= control target key start
LH: loop header
LB: loop body
LE: loop exit
PB: predicated region body
PF: predicated region fallthrough
CT: control target
= control target key end

     0   :  { %s1280_s24 = smov 0   ;;  %s1475_s0 = inlined_call_operand.vmem [shape: bf16[2,32,128], index: 0, kind: input, shape index: {}]   ;;  %s1476_s1 = inlined_call_operand.vmem [shape: f32[1,128], index: 1, kind: input, shape index: {}]   ;;  %s1477_s2 = inlined_call_operand.vmem [shape: f32[1,128], index: 2, kind: input, shape index: {}]   ;;  %s1478_s3 = inlined_call_operand.vmem [shape: bf16[3,136,128], index: 3, kind: input, shape index: {}]   ;;  %s1479_s4 = inlined_call_operand.vmem [shape: f32[1,128], index: 4, kind: input, shape index: {}]   ;;  %s1480_s5 = inlined_call_operand.vmem [shape: bf16[2,32,128], index: 5, kind: output, shape index: {0}]   ;;  %s1481_s6 = inlined_call_operand.vmem [shape: f32[2,1,128], index: 6, kind: output, shape index: {1}]   ;;  %s1482_s7 = inlined_call_operand.vmem [shape: f32[2,1,128], index: 7, kind: output, shape index: {2}]  }
   0x1 LB: > { %s1014_s25 = sadd.s32 4294967295, %s1236_s24   ;;  %p1018_p0 = scmp.ge.s32.totalorder %s1236_s24, 1  ;;  %s1236_s24 = sphi %s1280_s24, %s18_s24  }
   0x2   : > { %p242_p1 = scmp.lt.s32.totalorder %s1236_s24, 3 }
   0x4   : > { %p243_p2 = pnand %p1018_p0, %p242_p1 }
   0x5   : > { %p280_p3 = scmp.lt.s32.totalorder (!%p243_p2), %s1014_s25, 1  ;;  %s1238_s17 = smov (!%p243_p2), 4  }
   0x6   : > { %246 = sbr.rel (%p243_p2) target bundleno = 381 (0x17d), region = 40 }
   0xb   : > { %s1492_s25 = smov (!%p280_p3, %s1014_s25), 1  ;;  %v1180_v0 = vld [vmem:[%s1478_s3 + $0x38] sm:$0xff]  ;;  %v1179_v2 = vld [vmem:[%s1478_s3 + $0x30] sm:$0xff]  ;;  %v1227_v3 = vld [vmem:[%s1476_s1] ss:$0 sm:$0xff]  ;;  %vm325_vm3 = vcmask 1043456  }
   0xc   : > { %v1188_v1 = vld [vmem:[%s1478_s3 + $0x7c] sm:$0xff]  ;;  %s1169_s30 = sshll.u32 %s1492_s25, 4  ;;  %692 = vmatpush.bf16.msra.mxu2 %v1180_v0  ;;  %vm340_vm0 = vsmask.f32 256  ;;  %vm341_vm1 = vsmask.f32 4368  ;;  %s295_s15 = scalar_lea.vmem %s1482_s7, %s1492_s25 }
   0xd   : > { %s284_s12 = scalar_lea.vmem %s1475_s0, %s1169_s30  ;;  %594 = vmatpush.bf16.msra.mxu0 %v1188_v1  ;;  %v1228_v9 = vld [vmem:[%s1477_s2] ss:$0 sm:$0xff]  ;;  %vm1312_vm2 = vmor %vm340_vm0, %vm341_vm1  ;;  %vm326_vm4 = vcmask 64516   ;;  %v1239_v51 = vmov 0   ;;  %v1178_v52 = vld [vmem:[%s1478_s3 + $0x28] sm:$0xff]  ;;  %vm332_vm6 = vcmask 1040384   ;;  %s289_s10 = scalar_lea.vmem %s1480_s5, %s1169_s30 }
   0xe   : > { %v1198_v4 = vld [vmem:[%s284_s12] sm:$0xff]   ;;  %v1215_v5 = vld [vmem:[%s284_s12 + $0x8] sm:$0xff]   ;;  %vm327_vm5 = vmor %vm326_vm4, %vm325_vm3  ;;  %vm333_vm7 = vcmask 61444   ;;  %vm420_vm9 = vcmask 1040416   ;;  %vm422_vm10 = vcmask 28676   ;;  %vm393_vm15 = vcmask 31744   ;;  %s292_s12 = scalar_lea.vmem %s1481_s6, %s1492_s25 }
   0xf   : > { %v1199_v6 = vunpack.c.l.bf16 %v1198_v4  ;;  %v1200_v7 = vunpack.c.h.bf16 %v1198_v4  ;;  %v1204_v8 = vunpack.c.h.bf16 %v1215_v5  ;;  %v1203_v10 = vunpack.c.l.bf16 %v1215_v5  ;;  %328 = vst.msk [vmem:[#allocation2] sm:$0xff] %vm327_vm5, %v1239_v51  ;;  %vm334_vm8 = vmor %vm333_vm7, %vm332_vm6  ;;  %v1187_v53 = vld [vmem:[%s1478_s3 + $0x74] sm:$0xff]  ;;  %v1177_v54 = vld [vmem:[%s1478_s3 + $0x20] sm:$0xff] }
  0x10   : > { %693 = vmatpush.bf16.msra.mxu2 %v1179_v2  ;;  %329 = vst.msk [vmem:[#allocation2 + $0x8] sm:$0xff] %vm327_vm5, %v1239_v51  ;;  %vm423_vm11 = vsmask.f32 4352  ;;  %v1186_v55 = vld [vmem:[%s1478_s3 + $0x6c] sm:$0xff]  ;;  %vm1336_vm12 = vmand %vm420_vm9, %vm340_vm0  ;;  %v1176_v57 = vld [vmem:[%s1478_s3 + $0x18] sm:$0xff]  ;;  %vm404_vm0 = vcmask 1043488  }
  0x11   : > { %v309_v11 = vmul.f32 %v1227_v3, %v1199_v6  ;;  %v310_v12 = vmul.f32 %v1227_v3, %v1200_v7  ;;  %v311_v13 = vmul.f32 %v1227_v3, %v1203_v10  ;;  %v312_v14 = vmul.f32 %v1227_v3, %v1204_v8  ;;  %330 = vst.msk [vmem:[#allocation2 + $0x10] sm:$0xff] %vm327_vm5, %v1239_v51  ;;  %vm424_vm13 = vmand %vm422_vm10, %vm423_vm11  ;;  %v1185_v61 = vld [vmem:[%s1478_s3 + $0x64] sm:$0xff]  ;;  %v1175_v62 = vld [vmem:[%s1478_s3 + $0x10] sm:$0xff] }
  0x12   : > { %331 = vst.msk [vmem:[#allocation2 + $0x18] sm:$0xff] %vm327_vm5, %v1239_v51  ;;  %595 = vmatpush.bf16.msra.mxu0 %v1187_v53  ;;  %vm425_vm14 = vmor %vm424_vm13, %vm1336_vm12  ;;  %v1184_v0 = vld [vmem:[%s1478_s3 + $0x5c] sm:$0xff]  ;;  %v1174_v2 = vld [vmem:[%s1478_s3 + $0x8] sm:$0xff]  ;;  %vm405_vm1 = vsmask.f32 7938  ;;  %vm754_vm10 = vcmask 1046528  }
  0x13   : > { %v317_v15 = vadd.f32 %v1228_v9, %v309_v11  ;;  %v318_v16 = vadd.f32 %v1228_v9, %v310_v12  ;;  %v319_v17 = vadd.f32 %v1228_v9, %v311_v13  ;;  %v320_v18 = vadd.f32 %v1228_v9, %v312_v14  ;;  %335 = vst.msk [vmem:[#allocation2 + $0x20] sm:$0x11] %vm334_vm8, %v1239_v51  ;;  %v449_v3 = vld [vmem:[%s1478_s3 + $0x40] sm:$0xf]  ;;  %v1183_v5 = vld [vmem:[%s1478_s3 + $0x54] sm:$0xff]  ;;  %v1182_v9 = vld [vmem:[%s1478_s3 + $0x4c] sm:$0xff] }
  0x14   : > { %694 = vmatpush.bf16.msra.mxu2 %v1178_v52  ;;  %v667_v4 = vunpack.c.l.b16 %v449_v3  ;;  %v1173_v7 = vld [vmem:[%s1478_s3] sm:$0xff]  ;;  %v1132_v11 = vld [vmem:[%s1478_s3 + $0xc8] sm:$0xf]  ;;  %vm408_vm4 = vsmask.f32 7954  ;;  %vm1382_vm5 = vmand %vm404_vm0, %vm405_vm1  ;;  %vm584_vm8 = vcmask 64512  }
  0x15   : > { %v321_v19 = vmax.f32 %v317_v15, 0.0  ;;  %v322_v20 = vmax.f32 %v318_v16, 0.0  ;;  %v323_v21 = vmax.f32 %v319_v17, 0.0  ;;  %v324_v22 = vmax.f32 %v320_v18, 0.0  ;;  %v1039_v10 = vld [vmem:[%s1478_s3 + $0x84] sm:$0xf] }
  0x16   : > { %596 = vmatpush.bf16.msra.mxu0 %v1186_v55  ;;  %v676_v6 = vpack.c.b16 %v667_v4, %v667_v4  ;;  %v1181_v12 = vld [vmem:[%s1478_s3 + $0x44] sm:$0xff]  ;;  %v566_v13 = vunpack.c.l.b16 %v1039_v10  ;;  %v800_v14 = vunpack.c.l.b16 %v1132_v11  ;;  %v1190_v52 = vld [vmem:[%s1478_s3 + $0x90] sm:$0xff]  ;;  %vm490_vm9 = vsmask.f32 7424 }
  0x17   : > { %v336_v23 = vpack.c.bf16 %v321_v19, %v321_v19  ;;  %v337_v24 = vpack.c.bf16 %v322_v20, %v322_v20  ;;  %v338_v25 = vpack.c.bf16 %v323_v21, %v323_v21  ;;  %v339_v26 = vpack.c.bf16 %v324_v22, %v324_v22  ;;  %v1196_v20 = vld [vmem:[%s1478_s3 + $0xc0] sm:$0xff] }
  0x18   : > { %695 = vmatpush.bf16.msra.mxu2 %v1177_v54  ;;  %v690_v8 = vsel %vm325_vm3, %v676_v6, 0  ;;  %v575_v15 = vpack.c.b16 %v566_v13, %v566_v13  ;;  %v809_v16 = vpack.c.b16 %v800_v14, %v800_v14 }
  0x19   : > { %v344_v27 = vshrl.u32 %v336_v23, 16  ;;  %v347_v28 = vshll.u32 %v336_v23, 16  ;;  %v352_v29 = vshrl.u32 %v337_v24, 16  ;;  %v361_v30 = vshrl.u32 %v338_v25, 16  ;;  %718 = vmatpush.bf16.msra.mxu3 %v690_v8 }
  0x1a   : > { %v364_v31 = vshll.u32 %v338_v25, 16  ;;  %v370_v32 = vshrl.u32 %v339_v26, 16  ;;  %v355_v37 = vshll.u32 %v337_v24, 16  ;;  %v373_v42 = vshll.u32 %v339_v26, 16  ;;  %v426_v59 = vld [vmem:[#allocation2 + $0x20] sm:$0x11]  ;;  %597 = vmatpush.bf16.msra.mxu0 %v1185_v61 }
  0x1b   : > { %v346_v33 = vrot.slane %v344_v27, 7  ;;  %v354_v34 = vrot.slane %v352_v29, 7  ;;  %v363_v35 = vrot.slane %v361_v30, 7  ;;  %v592_v17 = vsel %vm325_vm3, %v575_v15, 0  ;;  %v411_v24 = vld [vmem:[#allocation2] sm:$0xff]  ;;  %v1195_v25 = vld [vmem:[%s1478_s3 + $0xb8] sm:$0xff] }
  0x1c   : > { %v372_v38 = vrot.slane %v370_v32, 7  ;;  %696 = vmatpush.bf16.msra.mxu2 %v1176_v57  ;;  %v825_v19 = vsel %vm325_vm3, %v809_v16, 0  ;;  %620 = vmatpush.bf16.msra.mxu1 %v592_v17 }
  0x1d   : > { %v349_v39 = vor.u32 %v347_v28, %v346_v33  ;;  %v359_v40 = vrot.slane %v354_v34, 4  ;;  %v366_v41 = vor.u32 %v364_v31, %v363_v35  ;;  %v350_v45 = vrot.slane %v346_v33, 4  ;;  %853 = vmatpush.bf16.msrb.mxu3 %v825_v19  ;;  %v1194_v31 = vld [vmem:[%s1478_s3 + $0xb0] sm:$0xff] }
  0x1e   : > { %v377_v43 = vrot.slane %v372_v38, 4  ;;  %v357_v46 = vor.u32 %v355_v37, %v354_v34  ;;  %v368_v47 = vrot.slane %v363_v35, 4  ;;  %v375_v48 = vor.u32 %v373_v42, %v372_v38  ;;  %598 = vmatpush.bf16.msra.mxu0 %v1184_v0  ;;  %v1193_v35 = vld [vmem:[%s1478_s3 + $0xa8] sm:$0xff] }
  0x1f   : > { %378 = vrot.lane.b32.xlu0 %v349_v39, %s1238_s17  ;;  %v367_v44 = vsel %vm1312_vm2, %v359_v40, %v366_v41  ;;  %v1192_v39 = vld [vmem:[%s1478_s3 + $0xa0] sm:$0xff]  ;;  %v1191_v40 = vld [vmem:[%s1478_s3 + $0x98] sm:$0xff] }
  0x20   : > { %382 = vrot.lane.b32.xlu1 %v367_v44, %s1238_s17  ;;  %386 = vrot.lane.b32.xlu2 %v377_v43, %s1238_s17  ;;  %v358_v49 = vsel %vm1312_vm2, %v350_v45, %v357_v46  ;;  %v376_v50 = vsel %vm1312_vm2, %v368_v47, %v375_v48  ;;  %vm407_vm2 = vcmask 31748  }
  0x21   : > { %697 = vmatpush.bf16.msra.mxu2 %v1175_v62  ;;  %vm409_vm6 = vmand %vm407_vm2, %vm408_vm4  ;;  %827 = vmatpush.bf16.msrb.mxu1 %v1196_v20 }
  0x22   : > { %599 = vmatpush.bf16.msra.mxu0 %v1183_v5  ;;  %vm410_vm7 = vmor %vm409_vm6, %vm1382_vm5 }
  0x23   : > { %vm1398_vm3 = vmor %vm407_vm2, %vm404_vm0 }
  0x25   : > { %698 = vmatpush.bf16.msra.mxu2 %v1174_v2  ;;  %828 = vmatpush.bf16.msrb.mxu1 %v1195_v25 }
  0x26   : > { %600 = vmatpush.bf16.msra.mxu0 %v1182_v9 }
  0x27   : > { %380 = vrot.lane.b32.xlu0 %v358_v49, %s1238_s17 }
  0x28   : > { %384 = vrot.lane.b32.xlu1 %v376_v50, %s1238_s17 }
  0x29   : > { %699 = vmatpush.bf16.msra.mxu2 %v1173_v7  ;;  %829 = vmatpush.bf16.msrb.mxu1 %v1194_v31 }
  0x2a   : > { %601 = vmatpush.bf16.msra.mxu0 %v1181_v12 }
  0x2d   : > { %830 = vmatpush.bf16.msrb.mxu1 %v1193_v35 }
  0x31   : > { %831 = vmatpush.bf16.msrb.mxu1 %v1192_v39 }
  0x35   : > { %832 = vmatpush.bf16.msrb.mxu1 %v1191_v40 }
  0x39   : > { %833 = vmatpush.bf16.msrb.mxu1 %v1190_v52 }
  0x7a   : > { %v387_v58 = vpop.permute.xlu2 %386 }
  0x7b   : > { %v392_v60 = vrot.slane %v387_v58, 4 }
  0x7d   : > { %v398_v63 = vsel %vm393_vm15, %v392_v60, %v387_v58 }
  0x7e   : > { %v427_v1 = vsel %vm425_vm14, %v398_v63, %v426_v59  ;;  %v1189_v59 = vld [vmem:[%s1478_s3 + $0x88] sm:$0xff] }
  0x7f   : > { %428 = vst [vmem:[#allocation2 + $0x20] sm:$0x11] %v427_v1  ;;  %834 = vmatpush.bf16.msrb.mxu1 %v1189_v59 }
  0x86   : > { %v450_v4 = vld [vmem:[#allocation2 + $0x20] sm:$0x11] }
  0x87   : > { %v482_v7 = vunpack.c.l.b16 %v450_v4  ;;  %v483_v8 = vunpack.c.h.b16 %v450_v4 }
  0x89   : > { %v488_v9 = vpack.c.b16 %v482_v7, %v482_v7  ;;  %v489_v10 = vpack.c.b16 %v483_v8, %v483_v8 }
  0x8b   : > { %v519_v11 = vshll.u32 %v488_v9, 16  ;;  %v527_v12 = vshll.u32 %v489_v10, 16 }
  0x8d   : > { %v521_v17 = vrot.slane %v519_v11, 1  ;;  %v529_v19 = vrot.slane %v527_v12, 1 }
  0x91   : > { %v379_v21 = vpop.permute.xlu0 %378 }
  0x92   : > { %v388_v22 = vrot.slane %v379_v21, 4  ;;  %v383_v23 = vpop.permute.xlu1 %382 }
  0x93   : > { %v390_v26 = vrot.slane %v383_v23, 4 }
  0x94   : > { %v394_v28 = vsel %vm393_vm15, %v388_v22, %v379_v21 }
  0x95   : > { %v396_v29 = vsel %vm393_vm15, %v390_v26, %v383_v23  ;;  %v412_v30 = vsel %vm410_vm7, %v394_v28, %v411_v24 }
  0x96   : > { %418 = vst.msk [vmem:[#allocation2 + $0x10] sm:$0xff] %vm1398_vm3, %v396_v29  ;;  %v474_v43 = vunpack.c.l.b16 %v412_v30  ;;  %v475_v45 = vunpack.c.h.b16 %v412_v30 }
  0x97   : > { %413 = vst [vmem:[#allocation2] sm:$0xff] %v412_v30 }
  0x99   : > { %v381_v32 = vpop.permute.xlu0 %380 }
  0x9a   : > { %v389_v33 = vrot.slane %v381_v32, 4  ;;  %v385_v34 = vpop.permute.xlu1 %384 }
  0x9b   : > { %v391_v36 = vrot.slane %v385_v34, 4 }
  0x9c   : > { %v395_v37 = vsel %vm393_vm15, %v389_v33, %v381_v32  ;;  %v763_v32 = vrot.slane %v489_v10, 1 }
  0x9d   : > { %v397_v38 = vsel %vm393_vm15, %v391_v36, %v385_v34  ;;  %417 = vst.msk [vmem:[#allocation2 + $0x8] sm:$0xff] %vm1398_vm3, %v395_v37  ;;  %v1042_v42 = vld [vmem:[#allocation2 + $0x10] sm:$0xf]  ;;  %v1171_v48 = vld [vmem:[#allocation2 + $0x14] sm:$0xf]  ;;  %v761_v34 = vrot.slane %v488_v9, 1 }
  0x9e   : > { %419 = vst.msk [vmem:[#allocation2 + $0x18] sm:$0xff] %vm1398_vm3, %v397_v38  ;;  %v730_v15 = vld [vmem:[#allocation2] sm:$0xee] }
  0x9f   : > { %v751_v20 = vunpack.c.h.b16 %v730_v15  ;;  %v750_v26 = vunpack.c.l.b16 %v730_v15 }
  0xa4   : > { %v1424_v41 = vld [vmem:[#allocation2 + $0x8] sm:$0xff] }
  0xa5   : > { %v476_v44 = vunpack.c.l.b16 %v1424_v41  ;;  %v477_v46 = vunpack.c.h.b16 %v1424_v41  ;;  %v1172_v47 = vld [vmem:[#allocation2 + $0x14] sm:$0xf0]  ;;  %v1044_v49 = vld [vmem:[#allocation2 + $0x18] sm:$0xf0] }
  0xa6   : > { %v1428_v50 = vor.u32 %v1172_v47, %v1042_v42  ;;  %v1430_v51 = vor.u32 %v1171_v48, %v1044_v49 }
  0xa7   : > { %v484_v53 = vpack.c.b16 %v476_v44, %v474_v43  ;;  %v485_v54 = vpack.c.b16 %v477_v46, %v475_v45  ;;  %v753_v23 = vpack.c.b16 %v477_v46, %v751_v20  ;;  %v752_v27 = vpack.c.b16 %v476_v44, %v750_v26 }
  0xa8   : > { %v499_v57 = vshll.u32 %v1428_v50, 16  ;;  %v511_v58 = vshll.u32 %v1430_v51, 16  ;;  %v515_v13 = vshrl.u32 %v1428_v50, 16  ;;  %v523_v14 = vshrl.u32 %v1430_v51, 16 }
  0xa9   : > { %700 = vmatmul.bf16.vlgmr.msra.gmra.mxu2 %v484_v53  ;;  %v506_v55 = vshll.u32 %v485_v54, 16  ;;  %1114 = vmatmul.msk.bf16.vlgmr.msra.gmra.mxu3 %vm584_vm8, %v485_v54  ;;  %v494_v56 = vshll.u32 %v484_v53, 16  ;;  %v492_v60 = vshrl.u32 %v484_v53, 16  ;;  %v504_v62 = vshrl.u32 %v485_v54, 16 }
  0xaa   : > { %v501_v1 = vrot.slane %v499_v57, 1  ;;  %v513_v3 = vrot.slane %v511_v58, 1  ;;  %v758_v24 = vrot.slane %v753_v23, 1  ;;  %v759_v25 = vrot.slane %v1430_v51, 1 }
  0xab   : > { %v496_v61 = vrot.slane %v494_v56, 1  ;;  %v508_v63 = vrot.slane %v506_v55, 1  ;;  %v755_v29 = vrot.slane %v752_v27, 1  ;;  %v756_v30 = vrot.slane %v1428_v50, 1 }
  0xac   : > { %v517_v16 = vor.u32 %v515_v13, %v501_v1  ;;  %v525_v18 = vor.u32 %v523_v14, %v513_v3  ;;  %v760_v28 = vsel %vm754_vm10, %v758_v24, %v759_v25  ;;  %v764_v33 = vsel %vm754_vm10, %v759_v25, %v763_v32 }
  0xad   : > { %v497_v0 = vor.u32 %v496_v61, %v492_v60  ;;  %v509_v2 = vor.u32 %v508_v63, %v504_v62  ;;  %v757_v31 = vsel %vm754_vm10, %v755_v29, %v756_v30  ;;  %v762_v35 = vsel %vm754_vm10, %v756_v30, %v761_v34  ;;  %v1229_v61 = vld [vmem:[%s1479_s4] ss:$0 sm:$0xff] }
  0xae   : > { %v522_v21 = vsel %vm490_vm9, %v517_v16, %v521_v17  ;;  %v530_v22 = vsel %vm490_vm9, %v525_v18, %v529_v19 }
  0xaf   : > { %v502_v5 = vsel %vm490_vm9, %v497_v0, %v501_v1  ;;  %v514_v6 = vsel %vm490_vm9, %v509_v2, %v513_v3 }
  0xb0   : > { %602 = vmatmul.bf16.vlgmr.msra.gmra.mxu0 %v502_v5  ;;  %1080 = vmatmul.msk.bf16.vlgmr.msra.gmra.mxu1 %vm584_vm8, %v514_v6 }
  0xb9   : > { %705 = vmatmul.bf16.gmra.mxu2 %v1428_v50  ;;  %1115 = vmatmul.msk.bf16.gmra.mxu3 %vm584_vm8, %v1430_v51 }
  0xc0   : > { %607 = vmatmul.bf16.gmra.mxu0 %v522_v21  ;;  %1081 = vmatmul.msk.bf16.gmra.mxu1 %vm584_vm8, %v530_v22 }
  0xc9   : > { %1165 = vmatmul.msk.bf16.vlgmr.msrb.gmra.mxu3 %vm584_vm8, %v760_v28 }
  0xd0   : > { %835 = vmatmul.bf16.vlgmr.msrb.gmra.mxu1 %v757_v31 }
  0xd9   : > { %1166 = vmatmul.msk.bf16.gmra.mxu3 %vm584_vm8, %v764_v33 }
  0xe0   : > { %840 = vmatmul.bf16.gmra.mxu1 %v762_v35 }
 0x12c   : > { %v720_v36 = vpop.f32.mrf.mxu3  ;;  %v701_v43 = vpop.f32.mrf.mxu2 }
 0x12d   : > { %v622_v37 = vpop.f32.mrf.mxu1  ;;  %v603_v41 = vpop.f32.mrf.mxu0 }
 0x12e   : > { %v623_v47 = vadd.f32 %v622_v37, %v603_v41 }
 0x130   : > { %v702_v52 = vadd.f32 %v701_v43, %v623_v47 }
 0x132   : > { %v721_v56 = vadd.f32 %v720_v36, %v702_v52 }
 0x134   : > { %v722_v38 = vpop.f32.mrf.mxu3  ;;  %v703_v49 = vpop.f32.mrf.mxu2 }
 0x135   : > { %v624_v39 = vpop.f32.mrf.mxu1  ;;  %v605_v46 = vpop.f32.mrf.mxu0 }
 0x136   : > { %v625_v51 = vadd.f32 %v624_v39, %v605_v46 }
 0x138   : > { %v704_v54 = vadd.f32 %v703_v49, %v625_v51 }
 0x13a   : > { %v723_v62 = vadd.f32 %v722_v38, %v704_v54 }
 0x13c   : > { %v725_v40 = vpop.f32.mrf.mxu3  ;;  %v706_v0 = vpop.f32.mrf.mxu2 }
 0x13d   : > { %v627_v42 = vpop.f32.mrf.mxu1  ;;  %v608_v53 = vpop.f32.mrf.mxu0 }
 0x13e   : > { %v628_v59 = vadd.f32 %v627_v42, %v608_v53 }
 0x140   : > { %v707_v2 = vadd.f32 %v706_v0, %v628_v59 }
 0x142   : > { %v726_v10 = vadd.f32 %v725_v40, %v707_v2 }
 0x144   : > { %v727_v44 = vpop.f32.mrf.mxu3  ;;  %v708_v13 = vpop.f32.mrf.mxu2 }
 0x145   : > { %v629_v45 = vpop.f32.mrf.mxu1  ;;  %v610_v5 = vpop.f32.mrf.mxu0 }
 0x146   : > { %v630_v9 = vadd.f32 %v629_v45, %v610_v5 }
 0x148   : > { %v709_v14 = vadd.f32 %v708_v13, %v630_v9 }
 0x14a   : > { %v728_v19 = vadd.f32 %v727_v44, %v709_v14 }
 0x14c   : > { %v855_v48 = vpop.f32.mrf.mxu3 }
 0x14d   : > { %v836_v50 = vpop.f32.mrf.mxu1 }
 0x14e   : > { %v856_v55 = vadd.f32 %v855_v48, %v836_v50 }
 0x150   : > { %v865_v60 = vadd.f32 %v856_v55, %v721_v56 }
 0x152   : > { %v873_v3 = vadd.f32 %v1229_v61, %v865_v60 }
 0x154   : > { %v857_v57 = vpop.f32.mrf.mxu3  ;;  %v895_v21 = vmul.f32 %v873_v3, %v873_v3 }
 0x155   : > { %v838_v58 = vpop.f32.mrf.mxu1 }
 0x156   : > { %v858_v63 = vadd.f32 %v857_v57, %v838_v58 }
 0x158   : > { %v866_v1 = vadd.f32 %v858_v63, %v723_v62 }
 0x15a   : > { %v874_v4 = vadd.f32 %v1229_v61, %v866_v1 }
 0x15c   : > { %v1208_v6 = vpack.c.bf16 %v874_v4, %v873_v3  ;;  %v860_v7 = vpop.f32.mrf.mxu3  ;;  %v896_v18 = vmul.f32 %v874_v4, %v874_v4  ;;  %v885_v22 = vadd.f32 %v874_v4, %v873_v3 }
 0x15d   : > { %v841_v8 = vpop.f32.mrf.mxu1 }
 0x15e   : > { %1209 = vst [vmem:[%s289_s10] sm:$0xff] %v1208_v6   ;;  %v861_v11 = vadd.f32 %v860_v7, %v841_v8  ;;  %v899_v25 = vadd.f32 %v896_v18, %v895_v21 }
 0x160   : > { %v867_v12 = vadd.f32 %v861_v11, %v726_v10 }
 0x162   : > { %v875_v15 = vadd.f32 %v1229_v61, %v867_v12 }
 0x164   : > { %v862_v16 = vpop.f32.mrf.mxu3  ;;  %v897_v23 = vmul.f32 %v875_v15, %v875_v15  ;;  %v886_v26 = vadd.f32 %v885_v22, %v875_v15 }
 0x165   : > { %v843_v17 = vpop.f32.mrf.mxu1 }
 0x166   : > { %v863_v20 = vadd.f32 %v862_v16, %v843_v17  ;;  %v900_v28 = vadd.f32 %v899_v25, %v897_v23 }
 0x168   : > { %v868_v24 = vadd.f32 %v863_v20, %v728_v19 }
 0x16a   : > { %v876_v27 = vadd.f32 %v1229_v61, %v868_v24 }
 0x16c   : > { %v1213_v29 = vpack.c.bf16 %v876_v27, %v875_v15  ;;  %v887_v30 = vadd.f32 %v886_v26, %v876_v27  ;;  %v898_v31 = vmul.f32 %v876_v27, %v876_v27 }
 0x16e   : > { %1216 = vst [vmem:[%s289_s10 + $0x8] sm:$0xff] %v1213_v29   ;;  %v888_v32 = vrot.slane %v887_v30, 4  ;;  %v901_v33 = vadd.f32 %v900_v28, %v898_v31 }
 0x170   : > { %v889_v34 = vadd.f32 %v888_v32, %v887_v30  ;;  %v902_v35 = vrot.slane %v901_v33, 4 }
 0x172   : > { %v890_v36 = vrot.slane %v889_v34, 2  ;;  %v903_v37 = vadd.f32 %v902_v35, %v901_v33 }
 0x174   : > { %v891_v38 = vadd.f32 %v890_v36, %v889_v34  ;;  %v904_v39 = vrot.slane %v903_v37, 2 }
 0x176   : > { %v892_v40 = vrot.slane %v891_v38, 1  ;;  %v905_v41 = vadd.f32 %v904_v39, %v903_v37 }
 0x178   : > { %v893_v42 = vadd.f32 %v892_v40, %v891_v38  ;;  %v906_v43 = vrot.slane %v905_v41, 1 }
 0x17a   : > { %894 = vst [vmem:[%s292_s12] sm:$0x1] %v893_v42  ;;  %v907_v44 = vadd.f32 %v906_v43, %v905_v41 }
 0x17c   : > { %908 = vst [vmem:[%s295_s15] sm:$0x1] %v907_v44 }
 0x17d PF: > { %s18_s24 = sadd.s32 1, %s1236_s24  }
 0x17e   : > { %p15_p4 = scmp.ge.s32.totalorder %s18_s24, 4  }
 0x180   :  { %17 = sbr.rel (!%p15_p4) target bundleno = 1 (0x1), region = 96 }

// kernel: tile.88
= control target key start
LH: loop header
LB: loop body
LE: loop exit
PB: predicated region body
PF: predicated region fallthrough
CT: control target
= control target key end

     0   :  { %s40_s0 = inlined_call_operand.vmem [shape: f32[8], index: 0, kind: input, shape index: {}]   ;;  %s41_s1 = inlined_call_operand.vmem [shape: f32[32,8], index: 1, kind: output, shape index: {}]  }
   0x1   :  { %v4_v0 = vld [vmem:[%s40_s0] ss:$0 sm:$0xff] }
   0x2   :  { %5 = vst [vmem:[%s41_s1] sm:$0xff] %v4_v0 }
   0x3   :  { %12 = vst [vmem:[%s41_s1 + $0x8] sm:$0xff] %v4_v0 }
   0x4   :  { %13 = vst [vmem:[%s41_s1 + $0x10] sm:$0xff] %v4_v0 }
   0x5   :  { %14 = vst [vmem:[%s41_s1 + $0x18] sm:$0xff] %v4_v0 }

// kernel: tile.89
= control target key start
LH: loop header
LB: loop body
LE: loop exit
PB: predicated region body
PF: predicated region fallthrough
CT: control target
= control target key end

     0   :  { %s7_s6 = smov 3  ;;  %s21_s9 = smov 3  ;;  %vm4_vm0 = vcmask 64512   ;;  %vm11_vm1 = vcmask 1048512   ;;  %vm18_vm2 = vcmask 982912   ;;  %vm25_vm3 = vcmask 917312   ;;  %s233_s0 = inlined_call_operand.vmem [shape: f32[32,8], index: 0, kind: input, shape index: {}]   ;;  %s234_s1 = inlined_call_operand.vmem [shape: f32[1,256], index: 1, kind: output, shape index: {}]  }
   0x1   :  { %v123_v0 = vld [vmem:[%s233_s0 + $0xf] ss:$16 sm:%s7_s6]   ;;  %s154_s10 = smov 120   ;;  %v125_v1 = vld [vmem:[%s233_s0 + $0xd] ss:$16 sm:%s21_s9]   ;;  %s155_s13 = smov 104  }
   0x2   :  { %9 = vrot.lane.b32.xlu0 %v123_v0, %s154_s10  ;;  %23 = vrot.lane.b32.xlu1 %v125_v1, %s155_s13  ;;  %s14_s14 = smov 3  ;;  %s28_s15 = smov 3  ;;  %vm32_vm4 = vcmask 851712   ;;  %vm39_vm5 = vcmask 786112   ;;  %vm46_vm6 = vcmask 720512   ;;  %vm53_vm7 = vcmask 654912  }
   0x3   :  { %v124_v2 = vld [vmem:[%s233_s0 + $0xe] ss:$16 sm:%s14_s14]   ;;  %v126_v3 = vld [vmem:[%s233_s0 + $0xc] ss:$16 sm:%s28_s15]   ;;  %s35_s20 = smov 3  ;;  %s156_s23 = smov 112  }
   0x4   :  { %v127_v4 = vld [vmem:[%s233_s0 + $0xb] ss:$16 sm:%s35_s20]   ;;  %s157_s24 = smov 88   ;;  %s158_s25 = smov 96   ;;  %vm60_vm8 = vcmask 589312   ;;  %vm67_vm9 = vcmask 523712  }
   0x5   :  { %37 = vrot.lane.b32.xlu2 %v127_v4, %s157_s24  ;;  %s49_s26 = smov 3  ;;  %s42_s27 = smov 3  ;;  %vm74_vm10 = vcmask 458112   ;;  %vm81_vm11 = vcmask 392512   ;;  %vm88_vm12 = vcmask 326912   ;;  %vm95_vm13 = vcmask 261312  }
   0x6   :  { %s56_s28 = smov 3  ;;  %v129_v5 = vld [vmem:[%s233_s0 + $0x9] ss:$16 sm:%s49_s26]   ;;  %v128_v6 = vld [vmem:[%s233_s0 + $0xa] ss:$16 sm:%s42_s27]   ;;  %s159_s6 = smov 72  }
   0x7   :  { %v130_v7 = vld [vmem:[%s233_s0 + $0x8] ss:$16 sm:%s56_s28]   ;;  %s160_s7 = smov 80   ;;  %s161_s8 = smov 64   ;;  %vm102_vm14 = vcmask 195712   ;;  %vm109_vm15 = vcmask 130112  }
   0x8   :  { %s70_s9 = smov 3  ;;  %s63_s10 = smov 3 }
   0x9   :  { %s77_s11 = smov 3  ;;  %v132_v8 = vld [vmem:[%s233_s0 + $0x6] ss:$16 sm:%s70_s9]   ;;  %v131_v9 = vld [vmem:[%s233_s0 + $0x7] ss:$16 sm:%s63_s10]   ;;  %s162_s18 = smov 48  }
   0xa   :  { %16 = vrot.lane.b32.xlu0 %v124_v2, %s156_s23  ;;  %30 = vrot.lane.b32.xlu1 %v126_v3, %s158_s25  ;;  %v133_v10 = vld [vmem:[%s233_s0 + $0x5] ss:$16 sm:%s77_s11]   ;;  %s163_s19 = smov 56   ;;  %s164_s20 = smov 40  }
   0xb   :  { %s91_s21 = smov 3  ;;  %s84_s22 = smov 3 }
   0xc   :  { %s98_s23 = smov 3  ;;  %v135_v11 = vld [vmem:[%s233_s0 + $0x3] ss:$16 sm:%s91_s21]   ;;  %v134_v12 = vld [vmem:[%s233_s0 + $0x4] ss:$16 sm:%s84_s22]   ;;  %s165_s30 = smov 24  }
   0xd   :  { %44 = vrot.lane.b32.xlu2 %v128_v6, %s160_s7  ;;  %v136_v13 = vld [vmem:[%s233_s0 + $0x2] ss:$16 sm:%s98_s23]   ;;  %s166_s2 = smov 32   ;;  %s167_s3 = smov 16  }
   0xe   :  { %s105_s4 = smov 3  ;;  %s168_s7 = smov 8  }
   0xf   :  { %v137_v14 = vld [vmem:[%s233_s0 + $0x1] ss:$16 sm:%s105_s4]  }
  0x12   :  { %51 = vrot.lane.b32.xlu0 %v129_v5, %s159_s6  ;;  %58 = vrot.lane.b32.xlu1 %v130_v7, %s161_s8  ;;  %s2_s8 = smov 3 }
  0x13   :  { %v3_v15 = vld [vmem:[%s233_s0] ss:$16 sm:%s2_s8]  }
  0x14   :  { %5 = vst.msk [vmem:[#allocation0] ss:$8 sm:$0x3] %vm4_vm0, %v3_v15  }
  0x15   :  { %65 = vrot.lane.b32.xlu2 %v131_v9, %s163_s19 }
  0x1a   :  { %72 = vrot.lane.b32.xlu0 %v132_v8, %s162_s18  ;;  %79 = vrot.lane.b32.xlu1 %v133_v10, %s164_s20 }
  0x1d   :  { %86 = vrot.lane.b32.xlu2 %v134_v12, %s166_s2 }
  0x22   :  { %93 = vrot.lane.b32.xlu0 %v135_v11, %s165_s30  ;;  %100 = vrot.lane.b32.xlu1 %v136_v13, %s167_s3 }
  0x25   :  { %107 = vrot.lane.b32.xlu2 %v137_v14, %s168_s7 }
  0x5f   :  { %v38_v16 = vpop.permute.xlu2 %37  }
  0x67   :  { %v45_v17 = vpop.permute.xlu2 %44  }
  0x6f   :  { %v66_v19 = vpop.permute.xlu2 %65  }
  0x74   :  { %v10_v18 = vpop.permute.xlu0 %9   ;;  %v24_v20 = vpop.permute.xlu1 %23  }
  0x75   :  { %12 = vst.msk [vmem:[#allocation0] ss:$8 sm:$0x3] %vm11_vm1, %v10_v18  }
  0x77   :  { %v87_v22 = vpop.permute.xlu2 %86  }
  0x7c   :  { %v17_v21 = vpop.permute.xlu0 %16   ;;  %v31_v23 = vpop.permute.xlu1 %30  }
  0x7d   :  { %19 = vst.msk [vmem:[#allocation0] ss:$8 sm:$0x3] %vm18_vm2, %v17_v21  }
  0x7e   :  { %26 = vst.msk [vmem:[#allocation0] ss:$8 sm:$0x3] %vm25_vm3, %v24_v20  }
  0x7f   :  { %33 = vst.msk [vmem:[#allocation0] ss:$8 sm:$0x3] %vm32_vm4, %v31_v23   ;;  %v108_v25 = vpop.permute.xlu2 %107  }
  0x80   :  { %40 = vst.msk [vmem:[#allocation0] ss:$8 sm:$0x3] %vm39_vm5, %v38_v16  }
  0x81   :  { %47 = vst.msk [vmem:[#allocation0] ss:$8 sm:$0x3] %vm46_vm6, %v45_v17  }
  0x84   :  { %v52_v24 = vpop.permute.xlu0 %51   ;;  %v59_v26 = vpop.permute.xlu1 %58  }
  0x85   :  { %54 = vst.msk [vmem:[#allocation0] ss:$8 sm:$0x3] %vm53_vm7, %v52_v24  }
  0x86   :  { %61 = vst.msk [vmem:[#allocation0] ss:$8 sm:$0x3] %vm60_vm8, %v59_v26  }
  0x87   :  { %68 = vst.msk [vmem:[#allocation0] ss:$8 sm:$0x3] %vm67_vm9, %v66_v19  }
  0x8c   :  { %v73_v27 = vpop.permute.xlu0 %72   ;;  %v80_v28 = vpop.permute.xlu1 %79  }
  0x8d   :  { %75 = vst.msk [vmem:[#allocation0] ss:$8 sm:$0x3] %vm74_vm10, %v73_v27  }
  0x8e   :  { %82 = vst.msk [vmem:[#allocation0] ss:$8 sm:$0x3] %vm81_vm11, %v80_v28  }
  0x8f   :  { %89 = vst.msk [vmem:[#allocation0] ss:$8 sm:$0x3] %vm88_vm12, %v87_v22  }
  0x94   :  { %v94_v29 = vpop.permute.xlu0 %93   ;;  %v101_v30 = vpop.permute.xlu1 %100  }
  0x95   :  { %96 = vst.msk [vmem:[#allocation0] ss:$8 sm:$0x3] %vm95_vm13, %v94_v29  }
  0x96   :  { %103 = vst.msk [vmem:[#allocation0] ss:$8 sm:$0x3] %vm102_vm14, %v101_v30  }
  0x97   :  { %110 = vst.msk [vmem:[#allocation0] ss:$8 sm:$0x3] %vm109_vm15, %v108_v25  }
  0x9e   :  { %v113_v31 = vld [vmem:[#allocation0] sm:$0x1]  ;;  %v118_v32 = vld [vmem:[#allocation0 + $0x8] sm:$0x1] }
  0x9f   :  { %116 = vst [vmem:[%s234_s1] sm:$0x1] %v113_v31 }
  0xa0   :  { %138 = vst [vmem:[%s234_s1 + $0x1] sm:$0x1] %v118_v32 }

// kernel: decoder_block_forward.8
= control target key start
LH: loop header
LB: loop body
LE: loop exit
PB: predicated region body
PF: predicated region fallthrough
CT: control target
= control target key end

     0   :  { %s1692_s24 = smov 0   ;;  %s2255_s0 = inlined_call_operand.vmem [shape: bf16[2,32,128], index: 0, kind: input, shape index: {}]   ;;  %s2256_s1 = inlined_call_operand.vmem [shape: f32[1,128], index: 1, kind: input, shape index: {}]   ;;  %s2257_s2 = inlined_call_operand.vmem [shape: f32[1,128], index: 2, kind: input, shape index: {}]   ;;  %s2258_s3 = inlined_call_operand.vmem [shape: bf16[3,136,256], index: 3, kind: input, shape index: {}]   ;;  %s2259_s4 = inlined_call_operand.vmem [shape: f32[1,256], index: 4, kind: input, shape index: {}]   ;;  %s2260_s5 = inlined_call_operand.vmem [shape: bf16[2,32,256], index: 5, kind: output, shape index: {0}]   ;;  %s2261_s6 = inlined_call_operand.vmem [shape: f32[2,1,256], index: 6, kind: output, shape index: {1}]   ;;  %s2262_s7 = inlined_call_operand.vmem [shape: f32[2,1,256], index: 7, kind: output, shape index: {2}]  }
   0x1 LB: > { %s1301_s25 = sadd.s32 4294967295, %s1648_s24   ;;  %p1305_p0 = scmp.ge.s32.totalorder %s1648_s24, 1  ;;  %s1648_s24 = sphi %s1692_s24, %s18_s24  }
   0x2   : > { %p242_p1 = scmp.lt.s32.totalorder %s1648_s24, 3 }
   0x4   : > { %p243_p2 = pnand %p1305_p0, %p242_p1 }
   0x5   : > { %p282_p3 = scmp.lt.s32.totalorder (!%p243_p2), %s1301_s25, 1  ;;  %s1651_s19 = smov (!%p243_p2), 4  }
   0x6   : > { %246 = sbr.rel (%p243_p2) target bundleno = 437 (0x1b5), region = 40 }
   0xb   : > { %s2276_s25 = smov (!%p282_p3, %s1301_s25), 1  ;;  %v1395_v0 = vld [vmem:[%s2258_s3 + $0xf8] sm:$0xf]  ;;  %v1595_v1 = vld [vmem:[%s2258_s3 + $0xfc] sm:$0xf0]  ;;  %vm329_vm0 = vcmask 1043456  }
   0xc   : > { %s1560_s30 = sshll.u32 %s2276_s25, 4  ;;  %v1396_v2 = vor.u32 %v1595_v1, %v1395_v0  ;;  %v1594_v3 = vld [vmem:[%s2258_s3 + $0xfc] sm:$0xf]  ;;  %v1397_v4 = vld [vmem:[%s2258_s3 + $0x100] sm:$0xf0]  ;;  %vm330_vm1 = vcmask 64516  }
   0xd   : > { %s286_s14 = scalar_lea.vmem %s2255_s0, %s1560_s30  ;;  %v1640_v5 = vld [vmem:[%s2256_s1] ss:$0 sm:$0xff]  ;;  %v1400_v6 = vor.u32 %v1594_v3, %v1397_v4  ;;  %vm331_vm2 = vmor %vm330_vm1, %vm329_vm0  ;;  %v1650_v14 = vmov 0   ;;  %vm344_vm3 = vsmask.f32 256  ;;  %vm336_vm6 = vcmask 1040384  }
   0xe   : > { %v1613_v7 = vld [vmem:[%s286_s14] sm:$0xff]   ;;  %v1620_v8 = vld [vmem:[%s286_s14 + $0x8] sm:$0xff]   ;;  %635 = vmatpush.bf16.msra.mxu0 %v1396_v2  ;;  %332 = vst.msk [vmem:[#allocation2] sm:$0xff] %vm331_vm2, %v1650_v14  ;;  %vm345_vm4 = vsmask.f32 4368  ;;  %vm337_vm7 = vcmask 61444  }
   0xf   : > { %v1614_v9 = vunpack.c.l.bf16 %v1613_v7  ;;  %v1615_v10 = vunpack.c.h.bf16 %v1613_v7  ;;  %v1619_v11 = vunpack.c.h.bf16 %v1620_v8  ;;  %v1641_v12 = vld [vmem:[%s2257_s2] ss:$0 sm:$0xff]  ;;  %v1618_v13 = vunpack.c.l.bf16 %v1620_v8  ;;  %673 = vmatpush.bf16.msra.mxu2 %v1400_v6  ;;  %333 = vst.msk [vmem:[#allocation2 + $0x8] sm:$0xff] %vm331_vm2, %v1650_v14  ;;  %vm1730_vm5 = vmor %vm344_vm3, %vm345_vm4  ;;  %v1387_v55 = vld [vmem:[%s2258_s3 + $0xe8] sm:$0xf]  ;;  %s1561_s23 = sshll.u32 %s2276_s25, 5 }
  0x10   : > { %334 = vst.msk [vmem:[#allocation2 + $0x10] sm:$0xff] %vm331_vm2, %v1650_v14  ;;  %v1593_v56 = vld [vmem:[%s2258_s3 + $0xec] sm:$0xf0]  ;;  %v1592_v57 = vld [vmem:[%s2258_s3 + $0xec] sm:$0xf]  ;;  %vm338_vm8 = vmor %vm337_vm7, %vm336_vm6  ;;  %vm424_vm9 = vcmask 1040416   ;;  %s2221_s28 = scalar_lea.vmem %s2260_s5, %s1561_s23 }
  0x11   : > { %v313_v15 = vmul.f32 %v1640_v5, %v1614_v9  ;;  %v314_v16 = vmul.f32 %v1640_v5, %v1615_v10  ;;  %v315_v17 = vmul.f32 %v1640_v5, %v1618_v13  ;;  %v316_v18 = vmul.f32 %v1640_v5, %v1619_v11  ;;  %335 = vst.msk [vmem:[#allocation2 + $0x18] sm:$0xff] %vm331_vm2, %v1650_v14  ;;  %v1389_v59 = vld [vmem:[%s2258_s3 + $0xf0] sm:$0xf0]  ;;  %v1379_v61 = vld [vmem:[%s2258_s3 + $0xd8] sm:$0xf]  ;;  %vm1761_vm12 = vmand %vm424_vm9, %vm344_vm3  ;;  %s1310_s29 = sshll.u32 %s2276_s25, 1 }
  0x12   : > { %v1388_v58 = vor.u32 %v1593_v56, %v1387_v55  ;;  %v1392_v60 = vor.u32 %v1592_v57, %v1389_v59  ;;  %339 = vst.msk [vmem:[#allocation2 + $0x20] sm:$0x11] %vm338_vm8, %v1650_v14  ;;  %vm426_vm10 = vcmask 28676   ;;  %vm427_vm11 = vsmask.f32 4352  ;;  %v1874_v55 = vld [vmem:[%s2258_s3 + $0x80] sm:$0xff]  ;;  %s295_s9 = scalar_lea.vmem %s2261_s6, %s1310_s29  ;;  %s299_s12 = scalar_lea.vmem %s2262_s7, %s1310_s29 }
  0x13   : > { %v321_v19 = vadd.f32 %v1641_v12, %v313_v15  ;;  %v322_v20 = vadd.f32 %v1641_v12, %v314_v16  ;;  %v323_v21 = vadd.f32 %v1641_v12, %v315_v17  ;;  %v324_v22 = vadd.f32 %v1641_v12, %v316_v18  ;;  %v1591_v62 = vld [vmem:[%s2258_s3 + $0xdc] sm:$0xf0]  ;;  %v1590_v1 = vld [vmem:[%s2258_s3 + $0xdc] sm:$0xf]  ;;  %v1381_v2 = vld [vmem:[%s2258_s3 + $0xe0] sm:$0xf0] }
  0x14   : > { %636 = vmatpush.bf16.msra.mxu0 %v1388_v58  ;;  %674 = vmatpush.bf16.msra.mxu2 %v1392_v60  ;;  %v1380_v0 = vor.u32 %v1591_v62, %v1379_v61  ;;  %vm1771_vm13 = vmand %vm426_vm10, %vm427_vm11  ;;  %v1384_v4 = vor.u32 %v1590_v1, %v1381_v2  ;;  %v1371_v6 = vld [vmem:[%s2258_s3 + $0xc8] sm:$0xf]  ;;  %v1589_v7 = vld [vmem:[%s2258_s3 + $0xcc] sm:$0xf0]  ;;  %vm397_vm15 = vcmask 31744   ;;  %vm408_vm1 = vcmask 1043488  }
  0x15   : > { %v325_v23 = vmax.f32 %v321_v19, 0.0  ;;  %v326_v24 = vmax.f32 %v322_v20, 0.0  ;;  %v327_v25 = vmax.f32 %v323_v21, 0.0  ;;  %v328_v26 = vmax.f32 %v324_v22, 0.0  ;;  %v1588_v8 = vld [vmem:[%s2258_s3 + $0xcc] sm:$0xf]  ;;  %vm429_vm14 = vmor %vm1771_vm13, %vm1761_vm12 }
  0x16   : > { %v1372_v11 = vor.u32 %v1589_v7, %v1371_v6  ;;  %v1373_v12 = vld [vmem:[%s2258_s3 + $0xd0] sm:$0xf0]  ;;  %v1363_v16 = vld [vmem:[%s2258_s3 + $0xb8] sm:$0xf]  ;;  %v1587_v17 = vld [vmem:[%s2258_s3 + $0xbc] sm:$0xf0]  ;;  %v762_v62 = vunpack.c.l.b16 %v1874_v55 }
  0x17   : > { %v340_v27 = vpack.c.bf16 %v325_v23, %v325_v23  ;;  %v341_v28 = vpack.c.bf16 %v326_v24, %v326_v24  ;;  %v342_v29 = vpack.c.bf16 %v327_v25, %v327_v25  ;;  %v343_v30 = vpack.c.bf16 %v328_v26, %v328_v26  ;;  %v1586_v18 = vld [vmem:[%s2258_s3 + $0xbc] sm:$0xf]  ;;  %v1365_v20 = vld [vmem:[%s2258_s3 + $0xc0] sm:$0xf0]  ;;  %v1355_v21 = vld [vmem:[%s2258_s3 + $0xa8] sm:$0xf] }
  0x18   : > { %637 = vmatpush.bf16.msra.mxu0 %v1380_v0  ;;  %675 = vmatpush.bf16.msra.mxu2 %v1384_v4  ;;  %v1376_v13 = vor.u32 %v1588_v8, %v1373_v12  ;;  %v1364_v19 = vor.u32 %v1587_v17, %v1363_v16  ;;  %v1368_v22 = vor.u32 %v1586_v18, %v1365_v20  ;;  %v1585_v23 = vld [vmem:[%s2258_s3 + $0xac] sm:$0xf0]  ;;  %v1584_v24 = vld [vmem:[%s2258_s3 + $0xac] sm:$0xf]  ;;  %v1357_v25 = vld [vmem:[%s2258_s3 + $0xb0] sm:$0xf0] }
  0x19   : > { %v348_v31 = vshrl.u32 %v340_v27, 16  ;;  %v351_v32 = vshll.u32 %v340_v27, 16  ;;  %v356_v33 = vshrl.u32 %v341_v28, 16  ;;  %v365_v34 = vshrl.u32 %v342_v29, 16  ;;  %v430_v9 = vld [vmem:[#allocation2 + $0x20] sm:$0x11] }
  0x1a   : > { %v368_v35 = vshll.u32 %v342_v29, 16  ;;  %v374_v36 = vshrl.u32 %v343_v30, 16  ;;  %v359_v41 = vshll.u32 %v341_v28, 16  ;;  %v377_v46 = vshll.u32 %v343_v30, 16  ;;  %v1347_v28 = vld [vmem:[%s2258_s3 + $0x98] sm:$0xf] }
  0x1b   : > { %v350_v37 = vrot.slane %v348_v31, 7  ;;  %v358_v38 = vrot.slane %v356_v33, 7  ;;  %v367_v39 = vrot.slane %v365_v34, 7  ;;  %v1356_v26 = vor.u32 %v1585_v23, %v1355_v21  ;;  %v1583_v29 = vld [vmem:[%s2258_s3 + $0x9c] sm:$0xf0] }
  0x1c   : > { %v376_v42 = vrot.slane %v374_v36, 7  ;;  %638 = vmatpush.bf16.msra.mxu0 %v1372_v11  ;;  %676 = vmatpush.bf16.msra.mxu2 %v1376_v13  ;;  %v1360_v27 = vor.u32 %v1584_v24, %v1357_v25  ;;  %v1582_v30 = vld [vmem:[%s2258_s3 + $0x9c] sm:$0xf]  ;;  %v1349_v31 = vld [vmem:[%s2258_s3 + $0xa0] sm:$0xf0]  ;;  %vm411_vm3 = vcmask 31748   ;;  %v780_v8 = vpack.c.b16 %v762_v62, %v762_v62 }
  0x1d   : > { %v353_v43 = vor.u32 %v351_v32, %v350_v37  ;;  %v363_v44 = vrot.slane %v358_v38, 4  ;;  %v370_v45 = vor.u32 %v368_v35, %v367_v39  ;;  %v354_v49 = vrot.slane %v350_v37, 4  ;;  %v1328_v32 = vld [vmem:[%s2258_s3 + $0x108] sm:$0xff]  ;;  %v1455_v57 = vld [vmem:[%s2258_s3 + $0x60] sm:$0xf]  ;;  %vm1898_vm9 = vmor %vm411_vm3, %vm408_vm1 }
  0x1e   : > { %v381_v47 = vrot.slane %v376_v42, 4  ;;  %v361_v50 = vor.u32 %v359_v41, %v358_v38  ;;  %v372_v51 = vrot.slane %v367_v39, 4  ;;  %v379_v52 = vor.u32 %v377_v46, %v376_v42  ;;  %v1339_v37 = vld [vmem:[%s2258_s3 + $0x88] sm:$0xf]  ;;  %v1581_v38 = vld [vmem:[%s2258_s3 + $0x8c] sm:$0xf0] }
  0x1f   : > { %382 = vrot.lane.b32.xlu0 %v353_v43, %s1651_s19  ;;  %v371_v48 = vsel %vm1730_vm5, %v363_v44, %v370_v45  ;;  %v586_v33 = vunpack.c.l.b16 %v1328_v32  ;;  %v587_v34 = vunpack.c.h.b16 %v1328_v32  ;;  %v1348_v35 = vor.u32 %v1583_v29, %v1347_v28  ;;  %v1580_v41 = vld [vmem:[%s2258_s3 + $0x8c] sm:$0xf]  ;;  %v1341_v42 = vld [vmem:[%s2258_s3 + $0x90] sm:$0xf0]  ;;  %v1577_v58 = vld [vmem:[%s2258_s3 + $0x64] sm:$0xf0] }
  0x20   : > { %386 = vrot.lane.b32.xlu1 %v371_v48, %s1651_s19  ;;  %390 = vrot.lane.b32.xlu2 %v381_v47, %s1651_s19  ;;  %v362_v53 = vsel %vm1730_vm5, %v354_v49, %v361_v50  ;;  %v380_v54 = vsel %vm1730_vm5, %v372_v51, %v379_v52  ;;  %v1352_v36 = vor.u32 %v1582_v30, %v1349_v31  ;;  %vm409_vm2 = vsmask.f32 7938  ;;  %v1463_v49 = vld [vmem:[%s2258_s3 + $0x70] sm:$0xf]  ;;  %v1579_v50 = vld [vmem:[%s2258_s3 + $0x74] sm:$0xf0] }
  0x21   : > { %639 = vmatpush.bf16.msra.mxu0 %v1364_v19  ;;  %677 = vmatpush.bf16.msra.mxu2 %v1368_v22  ;;  %v604_v39 = vpack.c.b16 %v586_v33, %v586_v33  ;;  %v605_v40 = vpack.c.b16 %v587_v34, %v587_v34  ;;  %v1340_v45 = vor.u32 %v1581_v38, %v1339_v37  ;;  %vm412_vm4 = vsmask.f32 7954  ;;  %vm1846_vm5 = vmand %vm408_vm1, %vm409_vm2  ;;  %v1578_v52 = vld [vmem:[%s2258_s3 + $0x74] sm:$0xf]  ;;  %v415_v59 = vld [vmem:[#allocation2] sm:$0xff] }
  0x22   : > { %v1344_v46 = vor.u32 %v1580_v41, %v1341_v42  ;;  %vm1851_vm7 = vmand %vm411_vm3, %vm412_vm4  ;;  %v1464_v51 = vor.u32 %v1579_v50, %v1463_v49  ;;  %v1456_v63 = vor.u32 %v1577_v58, %v1455_v57  ;;  %v1576_v0 = vld [vmem:[%s2258_s3 + $0x64] sm:$0xf]  ;;  %v1457_v1 = vld [vmem:[%s2258_s3 + $0x68] sm:$0xf0]  ;;  %v803_v13 = vsel %vm329_vm0, %v780_v8, 0 }
  0x23   : > { %v630_v43 = vsel %vm329_vm0, %v604_v39, 0  ;;  %v633_v44 = vsel %vm329_vm0, %v605_v40, 0  ;;  %vm414_vm8 = vmor %vm1851_vm7, %vm1846_vm5  ;;  %v1460_v3 = vor.u32 %v1576_v0, %v1457_v1  ;;  %v1447_v4 = vld [vmem:[%s2258_s3 + $0x50] sm:$0xf]  ;;  %v1439_v16 = vld [vmem:[%s2258_s3 + $0x40] sm:$0xf]  ;;  %v763_v39 = vunpack.c.h.b16 %v1874_v55 }
  0x24   : > { %661 = vmatpush.bf16.msra.mxu1 %v630_v43  ;;  %699 = vmatpush.bf16.msra.mxu3 %v633_v44  ;;  %v1573_v17 = vld [vmem:[%s2258_s3 + $0x44] sm:$0xf0]  ;;  %v1572_v18 = vld [vmem:[%s2258_s3 + $0x44] sm:$0xf]  ;;  %v1441_v19 = vld [vmem:[%s2258_s3 + $0x48] sm:$0xf0] }
  0x25   : > { %640 = vmatpush.bf16.msra.mxu0 %v1356_v26  ;;  %678 = vmatpush.bf16.msra.mxu2 %v1360_v27  ;;  %v1440_v23 = vor.u32 %v1573_v17, %v1439_v16  ;;  %v1444_v25 = vor.u32 %v1572_v18, %v1441_v19  ;;  %v1431_v29 = vld [vmem:[%s2258_s3 + $0x30] sm:$0xf]  ;;  %v1571_v30 = vld [vmem:[%s2258_s3 + $0x34] sm:$0xf0]  ;;  %v1570_v31 = vld [vmem:[%s2258_s3 + $0x34] sm:$0xf] }
  0x26   : > { %v1432_v33 = vor.u32 %v1571_v30, %v1431_v29  ;;  %v1433_v34 = vld [vmem:[%s2258_s3 + $0x38] sm:$0xf0]  ;;  %v1569_v37 = vld [vmem:[%s2258_s3 + $0x24] sm:$0xf0]  ;;  %v1568_v38 = vld [vmem:[%s2258_s3 + $0x24] sm:$0xf] }
  0x27   : > { %384 = vrot.lane.b32.xlu0 %v362_v53, %s1651_s19  ;;  %v1465_v53 = vld [vmem:[%s2258_s3 + $0x78] sm:$0xf0]  ;;  %v1425_v41 = vld [vmem:[%s2258_s3 + $0x28] sm:$0xf0]  ;;  %v1415_v44 = vld [vmem:[%s2258_s3 + $0x10] sm:$0xf] }
  0x28   : > { %388 = vrot.lane.b32.xlu1 %v380_v54, %s1651_s19  ;;  %v1468_v56 = vor.u32 %v1578_v52, %v1465_v53  ;;  %808 = vmatpush.bf16.msrb.mxu1 %v1464_v51  ;;  %v1428_v43 = vor.u32 %v1568_v38, %v1425_v41  ;;  %v1566_v49 = vld [vmem:[%s2258_s3 + $0x14] sm:$0xf]  ;;  %v1417_v50 = vld [vmem:[%s2258_s3 + $0x18] sm:$0xf0]  ;;  %vm908_vm10 = vcmask 1046528   ;;  %vm622_vm12 = vcmask 64512  }
  0x29   : > { %641 = vmatpush.bf16.msra.mxu0 %v1348_v35  ;;  %679 = vmatpush.bf16.msra.mxu2 %v1352_v36  ;;  %v1436_v35 = vor.u32 %v1570_v31, %v1433_v34  ;;  %v1423_v36 = vld [vmem:[%s2258_s3 + $0x20] sm:$0xf]  ;;  %vm494_vm11 = vsmask.f32 7424  ;;  %v1611_v30 = vld [vmem:[%s2258_s3 + $0x184] sm:$0xf0] }
  0x2a   : > { %834 = vmatpush.bf16.msrb.mxu3 %v803_v13  ;;  %v1424_v40 = vor.u32 %v1569_v37, %v1423_v36  ;;  %v1548_v29 = vld [vmem:[%s2258_s3 + $0x180] sm:$0xf]  ;;  %v1610_v31 = vld [vmem:[%s2258_s3 + $0x184] sm:$0xf]  ;;  %v1550_v34 = vld [vmem:[%s2258_s3 + $0x188] sm:$0xf0] }
  0x2b   : > { %v2043_v36 = vor.u32 %v1610_v31, %v1550_v34  ;;  %v1540_v37 = vld [vmem:[%s2258_s3 + $0x170] sm:$0xf]  ;;  %v1609_v38 = vld [vmem:[%s2258_s3 + $0x174] sm:$0xf0] }
  0x2c   : > { %809 = vmatpush.bf16.msrb.mxu1 %v1456_v63  ;;  %v1597_v34 = vld [vmem:[%s2258_s3 + $0x114] sm:$0xf0] }
  0x2d   : > { %642 = vmatpush.bf16.msra.mxu0 %v1340_v45  ;;  %680 = vmatpush.bf16.msra.mxu2 %v1344_v46  ;;  %v1567_v45 = vld [vmem:[%s2258_s3 + $0x14] sm:$0xf0]  ;;  %v781_v46 = vpack.c.b16 %v763_v39, %v763_v39  ;;  %v1608_v39 = vld [vmem:[%s2258_s3 + $0x174] sm:$0xf] }
  0x2f   : > { %v806_v62 = vsel %vm329_vm0, %v781_v46, 0 }
  0x31   : > { %846 = vmatpush.bf16.msrb.mxu0 %v1468_v56  ;;  %872 = vmatpush.bf16.msrb.mxu2 %v806_v62 }
  0x35   : > { %847 = vmatpush.bf16.msrb.mxu0 %v1460_v3  ;;  %v1565_v3 = vld [vmem:[%s2258_s3 + $0x4] sm:$0xf0] }
  0x7a   : > { %v391_v5 = vpop.permute.xlu2 %390 }
  0x7b   : > { %v396_v10 = vrot.slane %v391_v5, 4 }
  0x7d   : > { %v402_v14 = vsel %vm397_vm15, %v396_v10, %v391_v5  ;;  %v1575_v5 = vld [vmem:[%s2258_s3 + $0x54] sm:$0xf0]  ;;  %v1449_v10 = vld [vmem:[%s2258_s3 + $0x58] sm:$0xf0] }
  0x7e   : > { %v431_v15 = vsel %vm429_vm14, %v402_v14, %v430_v9  ;;  %v1574_v9 = vld [vmem:[%s2258_s3 + $0x54] sm:$0xf]  ;;  %v1448_v14 = vor.u32 %v1575_v5, %v1447_v4  ;;  %v1564_v4 = vld [vmem:[%s2258_s3 + $0x4] sm:$0xf]  ;;  %v1409_v5 = vld [vmem:[%s2258_s3 + $0x8] sm:$0xf0] }
  0x7f   : > { %432 = vst [vmem:[#allocation2 + $0x20] sm:$0x11] %v431_v15  ;;  %v1452_v15 = vor.u32 %v1574_v9, %v1449_v10 }
  0x80   : > { %810 = vmatpush.bf16.msrb.mxu1 %v1448_v14 }
  0x81   : > { %848 = vmatpush.bf16.msrb.mxu0 %v1452_v15  ;;  %v1412_v15 = vor.u32 %v1564_v4, %v1409_v5 }
  0x84   : > { %811 = vmatpush.bf16.msrb.mxu1 %v1440_v23 }
  0x85   : > { %849 = vmatpush.bf16.msrb.mxu0 %v1444_v25 }
  0x86   : > { %v1936_v28 = vld [vmem:[#allocation2 + $0x20] sm:$0x11] }
  0x87   : > { %v486_v32 = vunpack.c.l.b16 %v1936_v28 }
  0x88   : > { %812 = vmatpush.bf16.msrb.mxu1 %v1432_v33  ;;  %v1549_v33 = vor.u32 %v1611_v30, %v1548_v29  ;;  %v1502_v29 = vld [vmem:[%s2258_s3 + $0x128] sm:$0xf0] }
  0x89   : > { %850 = vmatpush.bf16.msrb.mxu0 %v1436_v35  ;;  %v1974_v48 = vpack.c.b16 %v486_v32, %v486_v32  ;;  %v487_v35 = vunpack.c.h.b16 %v1936_v28  ;;  %v1542_v28 = vld [vmem:[%s2258_s3 + $0x178] sm:$0xf0] }
  0x8a   : > { %v2058_v41 = vor.u32 %v1608_v39, %v1542_v28 }
  0x8b   : > { %v2072_v46 = vpack.c.b16 %v487_v35, %v487_v35 }
  0x8c   : > { %813 = vmatpush.bf16.msrb.mxu1 %v1424_v40  ;;  %v1541_v40 = vor.u32 %v1609_v38, %v1540_v37  ;;  %v1596_v37 = vld [vmem:[%s2258_s3 + $0x114] sm:$0xf]  ;;  %v1494_v38 = vld [vmem:[%s2258_s3 + $0x118] sm:$0xf0] }
  0x8d   : > { %851 = vmatpush.bf16.msrb.mxu0 %v1428_v43  ;;  %v1607_v43 = vld [vmem:[%s2258_s3 + $0x164] sm:$0xf0]  ;;  %v1497_v39 = vor.u32 %v1596_v37, %v1494_v38 }
  0x91   : > { %v383_v54 = vpop.permute.xlu0 %382 }
  0x92   : > { %v392_v60 = vrot.slane %v383_v54, 4  ;;  %v387_v61 = vpop.permute.xlu1 %386 }
  0x93   : > { %v394_v2 = vrot.slane %v387_v61, 4 }
  0x94   : > { %v398_v6 = vsel %vm397_vm15, %v392_v60, %v383_v54  ;;  %v1416_v60 = vor.u32 %v1567_v45, %v1415_v44  ;;  %v1606_v44 = vld [vmem:[%s2258_s3 + $0x164] sm:$0xf]  ;;  %v1534_v45 = vld [vmem:[%s2258_s3 + $0x168] sm:$0xf0] }
  0x95   : > { %v1913_v11 = vsel %vm414_vm8, %v398_v6, %v415_v59  ;;  %v400_v12 = vsel %vm397_vm15, %v394_v2, %v387_v61  ;;  %v1407_v61 = vld [vmem:[%s2258_s3] sm:$0xf]  ;;  %v1420_v2 = vor.u32 %v1566_v49, %v1417_v50  ;;  %v2077_v49 = vld [vmem:[%s2258_s3 + $0x190] sm:$0xff]  ;;  %v523_v50 = vshll.u32 %v1974_v48, 16 }
  0x96   : > { %417 = vst [vmem:[#allocation2] sm:$0xff] %v1913_v11  ;;  %v478_v52 = vunpack.c.l.b16 %v1913_v11  ;;  %v479_v56 = vunpack.c.h.b16 %v1913_v11  ;;  %v915_v11 = vrot.slane %v1974_v48, 1  ;;  %814 = vmatpush.bf16.msrb.mxu1 %v1416_v60  ;;  %v1408_v14 = vor.u32 %v1565_v3, %v1407_v61  ;;  %v1604_v48 = vld [vmem:[%s2258_s3 + $0x154] sm:$0xf]  ;;  %v1526_v60 = vld [vmem:[%s2258_s3 + $0x158] sm:$0xf0] }
  0x97   : > { %422 = vst.msk [vmem:[#allocation2 + $0x10] sm:$0xff] %vm1898_vm9, %v400_v12  ;;  %852 = vmatpush.bf16.msrb.mxu0 %v1420_v2  ;;  %v525_v3 = vrot.slane %v523_v50, 1 }
  0x99   : > { %v385_v20 = vpop.permute.xlu0 %384 }
  0x9a   : > { %v393_v21 = vrot.slane %v385_v20, 4  ;;  %v389_v22 = vpop.permute.xlu1 %388  ;;  %815 = vmatpush.bf16.msrb.mxu1 %v1408_v14  ;;  %v1602_v14 = vld [vmem:[%s2258_s3 + $0x144] sm:$0xf] }
  0x9b   : > { %v395_v24 = vrot.slane %v389_v22, 4  ;;  %853 = vmatpush.bf16.msrb.mxu0 %v1412_v15 }
  0x9c   : > { %v399_v26 = vsel %vm397_vm15, %v393_v21, %v385_v20 }
  0x9d   : > { %421 = vst.msk [vmem:[#allocation2 + $0x8] sm:$0xff] %vm1898_vm9, %v399_v26  ;;  %v401_v27 = vsel %vm397_vm15, %v395_v24, %v389_v22  ;;  %v1994_v63 = vld [vmem:[#allocation2] sm:$0xee] }
  0x9e   : > { %423 = vst.msk [vmem:[#allocation2 + $0x18] sm:$0xff] %vm1898_vm9, %v401_v27  ;;  %v1331_v42 = vld [vmem:[#allocation2 + $0x10] sm:$0xf]  ;;  %v1562_v54 = vld [vmem:[#allocation2 + $0x14] sm:$0xf]  ;;  %v904_v10 = vunpack.c.l.b16 %v1994_v63 }
  0xa4   : > { %v1972_v47 = vld [vmem:[#allocation2 + $0x8] sm:$0xff] }
  0xa5   : > { %v1563_v51 = vld [vmem:[#allocation2 + $0x14] sm:$0xf0]  ;;  %v480_v53 = vunpack.c.l.b16 %v1972_v47  ;;  %v1333_v55 = vld [vmem:[#allocation2 + $0x18] sm:$0xf0]  ;;  %v481_v57 = vunpack.c.h.b16 %v1972_v47  ;;  %v917_v47 = vrot.slane %v2072_v46, 1 }
  0xa6   : > { %v1986_v58 = vor.u32 %v1563_v51, %v1331_v42  ;;  %v1988_v59 = vor.u32 %v1562_v54, %v1333_v55  ;;  %v1532_v42 = vld [vmem:[%s2258_s3 + $0x160] sm:$0xf]  ;;  %v2083_v54 = vor.u32 %v1606_v44, %v1534_v45  ;;  %v1524_v55 = vld [vmem:[%s2258_s3 + $0x150] sm:$0xf] }
  0xa7   : > { %v1996_v0 = vpack.c.b16 %v480_v53, %v478_v52  ;;  %v2000_v1 = vpack.c.b16 %v481_v57, %v479_v56  ;;  %v906_v18 = vpack.c.b16 %v480_v53, %v904_v10  ;;  %v1533_v51 = vor.u32 %v1607_v43, %v1532_v42  ;;  %v1605_v56 = vld [vmem:[%s2258_s3 + $0x154] sm:$0xf0] }
  0xa8   : > { %v503_v6 = vshll.u32 %v1986_v58, 16  ;;  %v515_v7 = vshll.u32 %v1988_v59, 16  ;;  %v910_v19 = vrot.slane %v1986_v58, 1  ;;  %v971_v52 = vunpack.c.h.b16 %v2077_v49 }
  0xa9   : > { %v498_v8 = vshll.u32 %v1996_v0, 16  ;;  %v510_v9 = vshll.u32 %v2000_v1, 16  ;;  %v496_v12 = vshrl.u32 %v1996_v0, 16  ;;  %v508_v13 = vshrl.u32 %v2000_v1, 16 }
  0xaa   : > { %v505_v20 = vrot.slane %v503_v6, 1  ;;  %v517_v21 = vrot.slane %v515_v7, 1  ;;  %v909_v24 = vrot.slane %v906_v18, 1  ;;  %v2021_v25 = vsel %vm908_vm10, %v910_v19, %v915_v11  ;;  %v1601_v18 = vld [vmem:[%s2258_s3 + $0x134] sm:$0xf0] }
  0xab   : > { %v500_v16 = vrot.slane %v498_v8, 1  ;;  %v512_v17 = vrot.slane %v510_v9, 1  ;;  %v531_v53 = vshll.u32 %v2072_v46, 16  ;;  %v989_v61 = vpack.c.b16 %v971_v52, %v971_v52 }
  0xac   : > { %v2035_v32 = vsel %vm908_vm10, %v909_v24, %v910_v19  ;;  %v527_v2 = vshrl.u32 %v1988_v59, 16  ;;  %v1525_v4 = vor.u32 %v1605_v56, %v1524_v55  ;;  %v1529_v9 = vor.u32 %v1604_v48, %v1526_v60  ;;  %v1500_v24 = vld [vmem:[%s2258_s3 + $0x120] sm:$0xf] }
  0xad   : > { %v501_v22 = vor.u32 %v500_v16, %v496_v12  ;;  %v513_v23 = vor.u32 %v512_v17, %v508_v13  ;;  %v1016_v5 = vsel %vm329_vm0, %v989_v61, 0  ;;  %v533_v8 = vrot.slane %v531_v53, 1  ;;  %v1516_v12 = vld [vmem:[%s2258_s3 + $0x140] sm:$0xf]  ;;  %v1603_v13 = vld [vmem:[%s2258_s3 + $0x144] sm:$0xf0] }
  0xae   : > { %v529_v7 = vor.u32 %v527_v2, %v517_v21  ;;  %v1517_v15 = vor.u32 %v1603_v13, %v1516_v12  ;;  %v1518_v16 = vld [vmem:[%s2258_s3 + $0x148] sm:$0xf0]  ;;  %v1508_v17 = vld [vmem:[%s2258_s3 + $0x130] sm:$0xf]  ;;  %v905_v43 = vunpack.c.h.b16 %v1994_v63 }
  0xaf   : > { %v506_v26 = vsel %vm494_vm11, %v501_v22, %v505_v20  ;;  %v518_v27 = vsel %vm494_vm11, %v513_v23, %v517_v21  ;;  %v1521_v19 = vor.u32 %v1602_v14, %v1518_v16  ;;  %v1510_v21 = vld [vmem:[%s2258_s3 + $0x138] sm:$0xf0]  ;;  %v1509_v22 = vor.u32 %v1601_v18, %v1508_v17  ;;  %v1102_v18 = vld [vmem:[%s2259_s4] sm:$0x3] }
  0xb0   : > { %643 = vmatmul.bf16.vlgmr.msra.gmra.mxu0 %v506_v26  ;;  %1401 = vmatmul.msk.bf16.vlgmr.msra.gmra.mxu1 %vm622_vm12, %v518_v27  ;;  %v534_v11 = vsel %vm494_vm11, %v529_v7, %v533_v8 }
  0xb1   : > { %681 = vmatmul.bf16.vlgmr.msra.gmra.mxu2 %v506_v26  ;;  %1403 = vmatmul.msk.bf16.vlgmr.msra.gmra.mxu3 %vm622_vm12, %v518_v27  ;;  %v1599_v26 = vld [vmem:[%s2258_s3 + $0x124] sm:$0xf0]  ;;  %v1598_v27 = vld [vmem:[%s2258_s3 + $0x124] sm:$0xf] }
  0xb2   : > { %1621 = vmatpush.bf16.msra.mxu3 %v806_v62  ;;  %1018 = vmatpush.bf16.msra.mxu1 %v1549_v33  ;;  %v519_v62 = vshrl.u32 %v1986_v58, 16  ;;  %v1501_v30 = vor.u32 %v1599_v26, %v1500_v24  ;;  %v1505_v31 = vor.u32 %v1598_v27, %v1502_v29  ;;  %v1492_v33 = vld [vmem:[%s2258_s3 + $0x110] sm:$0xf]  ;;  %v2210_v24 = vperm.slane %v1102_v18, 1 }
  0xb3   : > { %1056 = vmatpush.bf16.msra.mxu0 %v2043_v36  ;;  %1082 = vmatpush.bf16.msra.mxu2 %v1016_v5  ;;  %v1493_v35 = vor.u32 %v1597_v34, %v1492_v33 }
  0xb4   : > { %v521_v6 = vor.u32 %v519_v62, %v505_v20  ;;  %v1600_v20 = vld [vmem:[%s2258_s3 + $0x134] sm:$0xf] }
  0xb5   : > { %v1513_v23 = vor.u32 %v1600_v20, %v1510_v21 }
  0xb6   : > { %1019 = vmatpush.bf16.msra.mxu1 %v1541_v40  ;;  %v526_v10 = vsel %vm494_vm11, %v521_v6, %v525_v3  ;;  %v970_v40 = vunpack.c.l.b16 %v2077_v49 }
  0xb7   : > { %1057 = vmatpush.bf16.msra.mxu0 %v2058_v41 }
  0xb8   : > { %v988_v28 = vpack.c.b16 %v970_v40, %v970_v40 }
  0xba   : > { %1020 = vmatpush.bf16.msra.mxu1 %v1533_v51  ;;  %v1013_v42 = vsel %vm329_vm0, %v988_v28, 0 }
  0xbb   : > { %1058 = vmatpush.bf16.msra.mxu0 %v2083_v54 }
  0xbe   : > { %1021 = vmatpush.bf16.msra.mxu1 %v1525_v4 }
  0xbf   : > { %1059 = vmatpush.bf16.msra.mxu0 %v1529_v9 }
  0xc0   : > { %648 = vmatmul.bf16.gmra.mxu0 %v526_v10  ;;  %1402 = vmatmul.msk.bf16.gmra.mxu1 %vm622_vm12, %v534_v11 }
  0xc1   : > { %686 = vmatmul.bf16.gmra.mxu2 %v526_v10  ;;  %1404 = vmatmul.msk.bf16.gmra.mxu3 %vm622_vm12, %v534_v11 }
  0xc2   : > { %1022 = vmatpush.bf16.msra.mxu1 %v1517_v15 }
  0xc3   : > { %1060 = vmatpush.bf16.msra.mxu0 %v1521_v19 }
  0xc6   : > { %1023 = vmatpush.bf16.msra.mxu1 %v1509_v22 }
  0xc7   : > { %1061 = vmatpush.bf16.msra.mxu0 %v1513_v23 }
  0xca   : > { %1024 = vmatpush.bf16.msra.mxu1 %v1501_v30 }
  0xcb   : > { %1062 = vmatpush.bf16.msra.mxu0 %v1505_v31 }
  0xce   : > { %1025 = vmatpush.bf16.msra.mxu1 %v1493_v35 }
  0xcf   : > { %1063 = vmatpush.bf16.msra.mxu0 %v1497_v39 }
  0xd0   : > { %816 = vmatmul.bf16.vlgmr.msrb.gmra.mxu1 %v1996_v0  ;;  %854 = vmatmul.bf16.vlgmr.msrb.gmra.mxu0 %v1996_v0  ;;  %v907_v0 = vpack.c.b16 %v481_v57, %v905_v43 }
  0xd1   : > { %1469 = vmatmul.msk.bf16.vlgmr.msrb.gmra.mxu3 %vm622_vm12, %v2000_v1  ;;  %1471 = vmatmul.msk.bf16.vlgmr.msrb.gmra.mxu2 %vm622_vm12, %v2000_v1  ;;  %v913_v1 = vrot.slane %v1988_v59, 1 }
  0xd2   : > { %1622 = vmatpush.bf16.msrb.mxu1 %v2043_v36  ;;  %1044 = vmatpush.bf16.msrb.mxu3 %v1013_v42  ;;  %v912_v44 = vrot.slane %v907_v0, 1 }
  0xd3   : > { %v918_v57 = vsel %vm908_vm10, %v913_v1, %v917_v47  ;;  %v2214_v47 = vperm.slane %v1102_v18, 0 }
  0xd4   : > { %v914_v36 = vsel %vm908_vm10, %v912_v44, %v913_v1 }
  0xd6   : > { %1623 = vmatpush.bf16.msrb.mxu1 %v2058_v41 }
  0xda   : > { %1624 = vmatpush.bf16.msrb.mxu1 %v2083_v54 }
  0xde   : > { %1625 = vmatpush.bf16.msrb.mxu1 %v1529_v9 }
  0xe0   : > { %821 = vmatmul.bf16.gmra.mxu1 %v1986_v58  ;;  %859 = vmatmul.bf16.gmra.mxu0 %v1986_v58 }
  0xe1   : > { %1470 = vmatmul.msk.bf16.gmra.mxu3 %vm622_vm12, %v1988_v59  ;;  %1556 = vmatmul.msk.bf16.vlgmr.msra.gmra.mxu2 %vm622_vm12, %v914_v36 }
  0xe2   : > { %1626 = vmatpush.bf16.msrb.mxu1 %v1521_v19 }
  0xe6   : > { %1627 = vmatpush.bf16.msrb.mxu1 %v1513_v23 }
  0xea   : > { %1628 = vmatpush.bf16.msrb.mxu1 %v1505_v31 }
  0xee   : > { %1629 = vmatpush.bf16.msrb.mxu1 %v1497_v39 }
  0xf0   : > { %1026 = vmatmul.bf16.vlgmr.msra.gmra.mxu1 %v2035_v32  ;;  %1064 = vmatmul.bf16.vlgmr.msra.gmra.mxu0 %v2035_v32 }
  0xf1   : > { %1472 = vmatmul.msk.bf16.vlgmr.msra.gmra.mxu3 %vm622_vm12, %v1988_v59  ;;  %1557 = vmatmul.msk.bf16.gmra.mxu2 %vm622_vm12, %v918_v57 }
 0x100   : > { %1031 = vmatmul.bf16.gmra.mxu1 %v2021_v25 }
 0x101   : > { %1554 = vmatmul.msk.bf16.vlgmr.msrb.gmra.mxu3 %vm622_vm12, %v914_v36 }
 0x110   : > { %1069 = vmatmul.bf16.vlgmr.msrb.gmra.mxu1 %v2021_v25 }
 0x111   : > { %1555 = vmatmul.msk.bf16.gmra.mxu3 %vm622_vm12, %v918_v57 }
 0x12d   : > { %v644_v58 = vpop.f32.mrf.mxu0  ;;  %v663_v63 = vpop.f32.mrf.mxu1 }
 0x12e   : > { %v664_v43 = vadd.f32 %v663_v63, %v644_v58 }
 0x134   : > { %v682_v41 = vpop.f32.mrf.mxu2  ;;  %v701_v45 = vpop.f32.mrf.mxu3 }
 0x135   : > { %v646_v32 = vpop.f32.mrf.mxu0  ;;  %v665_v46 = vpop.f32.mrf.mxu1  ;;  %v702_v15 = vadd.f32 %v701_v45, %v682_v41 }
 0x136   : > { %v666_v45 = vadd.f32 %v665_v46, %v646_v32 }
 0x13c   : > { %v684_v49 = vpop.f32.mrf.mxu2  ;;  %v703_v50 = vpop.f32.mrf.mxu3 }
 0x13d   : > { %v2185_v51 = vpop.f32.mrf.mxu0  ;;  %v2187_v59 = vpop.f32.mrf.mxu1  ;;  %v704_v19 = vadd.f32 %v703_v50, %v684_v49 }
 0x144   : > { %v687_v52 = vpop.f32.mrf.mxu2  ;;  %v706_v53 = vpop.f32.mrf.mxu3 }
 0x145   : > { %v2189_v54 = vpop.f32.mrf.mxu0  ;;  %v2191_v55 = vpop.f32.mrf.mxu1  ;;  %v707_v50 = vadd.f32 %v706_v53, %v687_v52  ;;  %v669_v52 = vadd.f32 %v2187_v59, %v2185_v51 }
 0x14c   : > { %v2193_v25 = vpop.f32.mrf.mxu2  ;;  %v2195_v56 = vpop.f32.mrf.mxu3 }
 0x14d   : > { %v817_v48 = vpop.f32.mrf.mxu1  ;;  %v855_v60 = vpop.f32.mrf.mxu0 }
 0x14e   : > { %v856_v16 = vadd.f32 %v855_v60, %v702_v15  ;;  %v818_v0 = vadd.f32 %v817_v48, %v664_v43 }
 0x154   : > { %v836_v61 = vpop.f32.mrf.mxu3  ;;  %v874_v3 = vpop.f32.mrf.mxu2 }
 0x155   : > { %v819_v62 = vpop.f32.mrf.mxu1  ;;  %v857_v2 = vpop.f32.mrf.mxu0  ;;  %v875_v20 = vadd.f32 %v874_v3, %v856_v16  ;;  %v837_v1 = vadd.f32 %v836_v61, %v818_v0 }
 0x156   : > { %v858_v21 = vadd.f32 %v857_v2, %v704_v19  ;;  %v820_v58 = vadd.f32 %v819_v62, %v666_v45  ;;  %v709_v62 = vadd.f32 %v2195_v56, %v2193_v25 }
 0x15c   : > { %v838_v4 = vpop.f32.mrf.mxu3  ;;  %v876_v7 = vpop.f32.mrf.mxu2 }
 0x15d   : > { %v2197_v5 = vpop.f32.mrf.mxu1  ;;  %v860_v6 = vpop.f32.mrf.mxu0  ;;  %v877_v30 = vadd.f32 %v876_v7, %v858_v21  ;;  %v839_v2 = vadd.f32 %v838_v4, %v820_v58 }
 0x15e   : > { %v861_v60 = vadd.f32 %v860_v6, %v707_v50  ;;  %v823_v6 = vadd.f32 %v2197_v5, %v669_v52 }
 0x164   : > { %v2199_v8 = vpop.f32.mrf.mxu3  ;;  %v1084_v11 = vpop.f32.mrf.mxu2 }
 0x165   : > { %v2201_v9 = vpop.f32.mrf.mxu1  ;;  %v2203_v10 = vpop.f32.mrf.mxu0  ;;  %v842_v59 = vadd.f32 %v2199_v8, %v823_v6 }
 0x166   : > { %v863_v18 = vadd.f32 %v2203_v10, %v709_v62 }
 0x16c   : > { %v2205_v12 = vpop.f32.mrf.mxu3  ;;  %v1086_v22 = vpop.f32.mrf.mxu2 }
 0x16d   : > { %v1027_v13 = vpop.f32.mrf.mxu1  ;;  %v1065_v14 = vpop.f32.mrf.mxu0 }
 0x16e   : > { %v1085_v17 = vadd.f32 %v1084_v11, %v1065_v14 }
 0x170   : > { %v1095_v23 = vadd.f32 %v1085_v17, %v875_v20 }
 0x172   : > { %v1109_v33 = vadd.f32 %v2210_v24, %v1095_v23 }
 0x174   : > { %v879_v26 = vpop.f32.mrf.mxu3  ;;  %v1153_v37 = vmul.f32 %v1109_v33, %v1109_v33  ;;  %v1089_v63 = vpop.f32.mrf.mxu2 }
 0x175   : > { %v1029_v27 = vpop.f32.mrf.mxu1  ;;  %v1067_v29 = vpop.f32.mrf.mxu0  ;;  %v880_v11 = vadd.f32 %v879_v26, %v861_v60 }
 0x176   : > { %v1087_v31 = vadd.f32 %v1086_v22, %v1067_v29 }
 0x178   : > { %v1097_v34 = vadd.f32 %v1087_v31, %v877_v30  ;;  %v671_v30 = vadd.f32 %v2191_v55, %v2189_v54 }
 0x17a   : > { %v1111_v35 = vadd.f32 %v2210_v24, %v1097_v34  ;;  %v825_v8 = vadd.f32 %v2201_v9, %v671_v30 }
 0x17c   : > { %v1133_v38 = vadd.f32 %v1111_v35, %v1109_v33  ;;  %v1155_v39 = vmul.f32 %v1111_v35, %v1111_v35  ;;  %v881_v40 = vpop.f32.mrf.mxu3  ;;  %v1091_v21 = vpop.f32.mrf.mxu2 }
 0x17d   : > { %v1032_v28 = vpop.f32.mrf.mxu1  ;;  %v882_v56 = vadd.f32 %v881_v40, %v863_v18  ;;  %v844_v40 = vadd.f32 %v2205_v12, %v825_v8 }
 0x17e   : > { %v1169_v42 = vadd.f32 %v1155_v39, %v1153_v37 }
 0x184   : > { %v1046_v44 = vpop.f32.mrf.mxu3 }
 0x185   : > { %v1047_v36 = vadd.f32 %v1046_v44, %v1027_v13  ;;  %v1034_v57 = vpop.f32.mrf.mxu1 }
 0x187   : > { %v1094_v41 = vadd.f32 %v1047_v36, %v837_v1 }
 0x189   : > { %v1108_v49 = vadd.f32 %v2214_v47, %v1094_v41 }
 0x18b   : > { %v1116_v48 = vpack.c.bf16 %v1109_v33, %v1108_v49  ;;  %v1152_v14 = vmul.f32 %v1108_v49, %v1108_v49 }
 0x18c   : > { %v1048_v61 = vpop.f32.mrf.mxu3 }
 0x18d   : > { %1120 = vst [vmem:[%s2221_s28] sm:$0xff] %v1116_v48  ;;  %v1049_v3 = vadd.f32 %v1048_v61, %v1029_v27  ;;  %v1070_v7 = vpop.f32.mrf.mxu1 }
 0x18e   : > { %v1090_v32 = vadd.f32 %v1089_v63, %v1070_v7 }
 0x18f   : > { %v1096_v46 = vadd.f32 %v1049_v3, %v839_v2 }
 0x190   : > { %v1099_v53 = vadd.f32 %v1090_v32, %v880_v11  ;;  %v1147_v11 = vlaneseq }
 0x191   : > { %v1110_v13 = vadd.f32 %v2214_v47, %v1096_v46 }
 0x192   : > { %v1113_v4 = vadd.f32 %v2210_v24, %v1099_v53  ;;  %vm1149_vm0 = vcmp.lt.s32.totalorder %v1147_v11, 256 }
 0x193   : > { %v1117_v15 = vpack.c.bf16 %v1111_v35, %v1110_v13  ;;  %v1124_v16 = vadd.f32 %v1110_v13, %v1108_v49  ;;  %v1154_v17 = vmul.f32 %v1110_v13, %v1110_v13 }
 0x194   : > { %v1134_v19 = vadd.f32 %v1133_v38, %v1113_v4  ;;  %v1157_v20 = vmul.f32 %v1113_v4, %v1113_v4  ;;  %v1051_v51 = vpop.f32.mrf.mxu3 }
 0x195   : > { %1121 = vst [vmem:[%s2221_s28 + $0x8] sm:$0xff] %v1117_v15  ;;  %v1160_v22 = vadd.f32 %v1154_v17, %v1152_v14  ;;  %v1052_v23 = vadd.f32 %v1051_v51, %v1032_v28  ;;  %v1072_v25 = vpop.f32.mrf.mxu1 }
 0x196   : > { %v1170_v5 = vadd.f32 %v1169_v42, %v1157_v20  ;;  %v1092_v26 = vadd.f32 %v1091_v21, %v1072_v25 }
 0x197   : > { %v1098_v27 = vadd.f32 %v1052_v23, %v842_v59 }
 0x198   : > { %v1101_v29 = vadd.f32 %v1092_v26, %v882_v56 }
 0x199   : > { %v1112_v10 = vadd.f32 %v2214_v47, %v1098_v27 }
 0x19a   : > { %v1115_v31 = vadd.f32 %v2210_v24, %v1101_v29 }
 0x19b   : > { %v1118_v33 = vpack.c.bf16 %v1113_v4, %v1112_v10  ;;  %v1125_v34 = vadd.f32 %v1124_v16, %v1112_v10  ;;  %v1156_v35 = vmul.f32 %v1112_v10, %v1112_v10 }
 0x19c   : > { %v1135_v37 = vadd.f32 %v1134_v19, %v1115_v31  ;;  %v1159_v38 = vmul.f32 %v1115_v31, %v1115_v31  ;;  %v1053_v39 = vpop.f32.mrf.mxu3 }
 0x19d   : > { %1122 = vst [vmem:[%s2221_s28 + $0x10] sm:$0xff] %v1118_v33  ;;  %v1161_v28 = vadd.f32 %v1160_v22, %v1156_v35  ;;  %v1054_v42 = vadd.f32 %v1053_v39, %v1034_v57 }
 0x19e   : > { %v1136_v43 = vrot.slane %v1135_v37, 4  ;;  %v1171_v54 = vadd.f32 %v1170_v5, %v1159_v38 }
 0x19f   : > { %v1100_v55 = vadd.f32 %v1054_v42, %v844_v40 }
 0x1a0   : > { %v1137_v0 = vadd.f32 %v1136_v43, %v1135_v37  ;;  %v1172_v44 = vrot.slane %v1171_v54, 4 }
 0x1a1   : > { %v1114_v24 = vadd.f32 %v2214_v47, %v1100_v55 }
 0x1a2   : > { %v1138_v9 = vrot.slane %v1137_v0, 2  ;;  %v1173_v1 = vadd.f32 %v1172_v44, %v1171_v54 }
 0x1a3   : > { %v1119_v36 = vpack.c.bf16 %v1115_v31, %v1114_v24  ;;  %v1126_v41 = vadd.f32 %v1125_v34, %v1114_v24  ;;  %v1158_v45 = vmul.f32 %v1114_v24, %v1114_v24 }
 0x1a4   : > { %v1139_v49 = vadd.f32 %v1138_v9, %v1137_v0  ;;  %v1174_v50 = vrot.slane %v1173_v1, 2 }
 0x1a5   : > { %1123 = vst [vmem:[%s2221_s28 + $0x18] sm:$0xff] %v1119_v36  ;;  %v1127_v12 = vrot.slane %v1126_v41, 4  ;;  %v1162_v58 = vadd.f32 %v1161_v28, %v1158_v45 }
 0x1a6   : > { %v1175_v63 = vadd.f32 %v1174_v50, %v1173_v1  ;;  %v1140_v57 = vrot.slane %v1139_v49, 1 }
 0x1a7   : > { %v1128_v48 = vadd.f32 %v1127_v12, %v1126_v41  ;;  %v1163_v60 = vrot.slane %v1162_v58, 4 }
 0x1a8   : > { %v1176_v61 = vrot.slane %v1175_v63, 1  ;;  %v1141_v7 = vadd.f32 %v1140_v57, %v1139_v49 }
 0x1a9   : > { %v1129_v2 = vrot.slane %v1128_v48, 2  ;;  %v1164_v3 = vadd.f32 %v1163_v60, %v1162_v58 }
 0x1aa   : > { %v1177_v46 = vadd.f32 %v1176_v61, %v1175_v63  ;;  %v1144_v13 = vrot.slane %v1141_v7, 7 }
 0x1ab   : > { %v1130_v47 = vadd.f32 %v1129_v2, %v1128_v48  ;;  %v1165_v32 = vrot.slane %v1164_v3, 2 }
 0x1ac   : > { %v1180_v4 = vrot.slane %v1177_v46, 7 }
 0x1ad   : > { %v1131_v52 = vrot.slane %v1130_v47, 1  ;;  %v1166_v53 = vadd.f32 %v1165_v32, %v1164_v3 }
 0x1af   : > { %v1132_v62 = vadd.f32 %v1131_v52, %v1130_v47  ;;  %v1167_v6 = vrot.slane %v1166_v53, 1 }
 0x1b1   : > { %v1145_v14 = vsel %vm336_vm6, %v1132_v62, %v1144_v13  ;;  %v1168_v15 = vadd.f32 %v1167_v6, %v1166_v53 }
 0x1b2   : > { %1151 = vst.msk [vmem:[%s295_s9] sm:$0x3] %vm1149_vm0, %v1145_v14 }
 0x1b3   : > { %v1181_v16 = vsel %vm336_vm6, %v1168_v15, %v1180_v4 }
 0x1b4   : > { %1183 = vst.msk [vmem:[%s299_s12] sm:$0x3] %vm1149_vm0, %v1181_v16 }
 0x1b5 PF: > { %s18_s24 = sadd.s32 1, %s1648_s24  }
 0x1b6   : > { %p15_p4 = scmp.ge.s32.totalorder %s18_s24, 4  }
 0x1b8   :  { %17 = sbr.rel (!%p15_p4) target bundleno = 1 (0x1), region = 96 }

// kernel: decoder_block_forward.9
= control target key start
LH: loop header
LB: loop body
LE: loop exit
PB: predicated region body
PF: predicated region fallthrough
CT: control target
= control target key end

     0   :  { %s331_s12 = smov 0   ;;  %s358_s0 = inlined_call_operand.vmem [shape: bf16[2,32,256], index: 0, kind: input, shape index: {}]   ;;  %s359_s1 = inlined_call_operand.vmem [shape: f32[1,256], index: 1, kind: input, shape index: {}]   ;;  %s360_s2 = inlined_call_operand.vmem [shape: f32[1,256], index: 2, kind: input, shape index: {}]   ;;  %s361_s3 = inlined_call_operand.vmem [shape: f32[2,32,256], index: 3, kind: output, shape index: {}]  }
   0x1 LB: > { %s282_s13 = sadd.s32 4294967295, %s309_s12   ;;  %p286_p0 = scmp.ge.s32.totalorder %s309_s12, 1  ;;  %s309_s12 = sphi %s331_s12, %s13_s12  }
   0x2   : > { %p137_p1 = scmp.lt.s32.totalorder %s309_s12, 3 }
   0x4   : > { %p138_p2 = pnand %p286_p0, %p137_p1 }
   0x5   : > { %p161_p3 = scmp.lt.s32.totalorder (!%p138_p2), %s282_s13, 1 }
   0x6   : > { %141 = sbr.rel (%p138_p2) target bundleno = 31 (0x1f), region = 32 }
   0xb   : > { %s363_s13 = smov (!%p161_p3, %s282_s13), 1  ;;  %v183_v0 = vld [vmem:[%s359_s1] sm:$0x3] }
   0xc   : > { %v197_v1 = vld [vmem:[%s360_s2] sm:$0x3]  ;;  %s293_s18 = sshll.u32 %s363_s13, 5  ;;  %v185_v2 = vperm.slane %v183_v0, 0  ;;  %v186_v3 = vperm.slane %v183_v0, 1  ;;  %s294_s22 = sshll.u32 %s363_s13, 6 }
   0xd   : > { %s165_s21 = scalar_lea.vmem %s358_s0, %s293_s18  ;;  %v199_v5 = vperm.slane %v197_v1, 0  ;;  %v200_v6 = vperm.slane %v197_v1, 1  ;;  %s170_s25 = scalar_lea.vmem %s361_s3, %s294_s22 }
   0xe   : > { %v171_v4 = vld [vmem:[%s165_s21] sm:$0xff]  ;;  %v172_v7 = vld [vmem:[%s165_s21 + $0x8] sm:$0xff]  ;;  %v173_v8 = vld [vmem:[%s165_s21 + $0x10] sm:$0xff] }
   0xf   : > { %v175_v9 = vunpack.c.l.bf16 %v171_v4  ;;  %v176_v10 = vunpack.c.h.bf16 %v171_v4  ;;  %v177_v11 = vunpack.c.l.bf16 %v172_v7  ;;  %v178_v12 = vunpack.c.h.bf16 %v172_v7  ;;  %v174_v13 = vld [vmem:[%s165_s21 + $0x18] sm:$0xff] }
  0x10   : > { %v179_v14 = vunpack.c.l.bf16 %v173_v8  ;;  %v180_v15 = vunpack.c.h.bf16 %v173_v8  ;;  %v181_v16 = vunpack.c.l.bf16 %v174_v13  ;;  %v182_v17 = vunpack.c.h.bf16 %v174_v13 }
  0x11   : > { %v189_v18 = vmul.f32 %v185_v2, %v175_v9  ;;  %v190_v19 = vmul.f32 %v186_v3, %v176_v10  ;;  %v191_v20 = vmul.f32 %v185_v2, %v177_v11  ;;  %v192_v21 = vmul.f32 %v186_v3, %v178_v12 }
  0x12   : > { %v193_v22 = vmul.f32 %v185_v2, %v179_v14  ;;  %v194_v23 = vmul.f32 %v186_v3, %v180_v15  ;;  %v195_v24 = vmul.f32 %v185_v2, %v181_v16  ;;  %v196_v25 = vmul.f32 %v186_v3, %v182_v17 }
  0x13   : > { %v203_v26 = vadd.f32 %v199_v5, %v189_v18  ;;  %v204_v27 = vadd.f32 %v200_v6, %v190_v19  ;;  %v205_v28 = vadd.f32 %v199_v5, %v191_v20  ;;  %v206_v29 = vadd.f32 %v200_v6, %v192_v21 }
  0x14   : > { %v207_v30 = vadd.f32 %v199_v5, %v193_v22  ;;  %v208_v31 = vadd.f32 %v200_v6, %v194_v23  ;;  %v209_v35 = vadd.f32 %v199_v5, %v195_v24  ;;  %v210_v37 = vadd.f32 %v200_v6, %v196_v25 }
  0x15   : > { %v211_v32 = vmax.f32 %v203_v26, 0.0  ;;  %v212_v33 = vmax.f32 %v204_v27, 0.0  ;;  %v213_v34 = vmax.f32 %v205_v28, 0.0  ;;  %v214_v36 = vmax.f32 %v206_v29, 0.0 }
  0x16   : > { %v215_v38 = vmax.f32 %v207_v30, 0.0  ;;  %v216_v39 = vmax.f32 %v208_v31, 0.0  ;;  %v217_v40 = vmax.f32 %v209_v35, 0.0  ;;  %v218_v41 = vmax.f32 %v210_v37, 0.0 }
  0x17   : > { %219 = vst [vmem:[%s170_s25] sm:$0xff] %v211_v32 }
  0x18   : > { %220 = vst [vmem:[%s170_s25 + $0x8] sm:$0xff] %v212_v33 }
  0x19   : > { %221 = vst [vmem:[%s170_s25 + $0x10] sm:$0xff] %v213_v34 }
  0x1a   : > { %222 = vst [vmem:[%s170_s25 + $0x18] sm:$0xff] %v214_v36 }
  0x1b   : > { %223 = vst [vmem:[%s170_s25 + $0x20] sm:$0xff] %v215_v38 }
  0x1c   : > { %224 = vst [vmem:[%s170_s25 + $0x28] sm:$0xff] %v216_v39 }
  0x1d   : > { %225 = vst [vmem:[%s170_s25 + $0x30] sm:$0xff] %v217_v40 }
  0x1e   : > { %226 = vst [vmem:[%s170_s25 + $0x38] sm:$0xff] %v218_v41 }
  0x1f PF: > { %s13_s12 = sadd.s32 1, %s309_s12  }
  0x20   : > { %p10_p4 = scmp.ge.s32.totalorder %s13_s12, 4  }
  0x22   :  { %12 = sbr.rel (!%p10_p4) target bundleno = 1 (0x1), region = 62 }

</bundles_post_ra>
